<compile_context>
chip_gen: v7x
topology: tpu7x:2x2x1
jax: 0.10.0
libtpu: 0.0.40
codegen_flags: <defaults>
</compile_context>

<pallas_src>
import jax
import jax.numpy as jnp
from jax import lax
from jax.experimental import pallas as pl
from jax.experimental.pallas import tpu as pltpu

EPS = 1e-5


# ---------------------------------------------------------------------------
# Fused Bottleneck kernel (one grid step == one image)
# ---------------------------------------------------------------------------
def _bottleneck_kernel(x_ref, w1_ref, w2_ref, w3_ref,
                       b1_ref, b2_ref, b3_ref, o_ref, h1flat):
    # x_ref : (1, H, W, Cin) f32   pipelined image (also the residual)
    # w1    : (Cin, P)  bf16 (BN1 scale folded in)
    # w2    : (9, P, P) bf16 (3x3 taps, BN2 scale folded in)
    # w3    : (P, Cout) bf16 (BN3 scale folded in)
    # b*    : (1, C)    f32  folded BN biases
    # o_ref : (1, H, W, Cout) f32
    # h1flat: (BUF, P) bf16  flattened zero-padded conv1 output
    H = x_ref.shape[1]
    W = x_ref.shape[2]
    Cin = x_ref.shape[3]
    P = w1_ref.shape[1]
    Cout = w3_ref.shape[1]
    Wp = W + 2                 # padded row width (conv2 padding = 1)
    M2 = H * Wp                # conv2 matmul M (2 junk cols per image row)

    x2d = x_ref[...].reshape(H * W, Cin)          # f32 (view), residual + conv1 input

    # ---- stage 1: conv1 (1x1) + bn1 + relu -------------------------------
    y1 = jnp.dot(x2d.astype(jnp.bfloat16), w1_ref[...],
                 preferred_element_type=jnp.float32)
    y1 = jnp.maximum(y1 + b1_ref[...], 0.0).astype(jnp.bfloat16)

    # Zero-pad (1 row top, 2 rows bottom, 1 col left/right) and write the whole
    # padded tile with ONE contiguous store.  Every cell any conv2 tap reads is
    # (re)written here each step -> no stale data, no per-step masked zero fills.
    y1_ext = jnp.pad(y1.reshape(H, W, P), ((1, 2), (1, 1), (0, 0)))
    h1flat[pl.ds(0, (H + 3) * Wp), :] = y1_ext.reshape((H + 3) * Wp, P)

    # ---- stage 2: conv2 (3x3, pad=1) as 9 CONTIGUOUS-slice matmuls --------
    acc = None
    for ky in range(3):
        for kx in range(3):
            tap = h1flat[pl.ds(ky * Wp + kx, M2), :]          # contiguous slice
            d = jnp.dot(tap, w2_ref[3 * ky + kx],
                        preferred_element_type=jnp.float32)
            acc = d if acc is None else acc + d
    h2 = jnp.maximum(acc + b2_ref[...], 0.0).astype(jnp.bfloat16)
    # drop the 2 junk columns per row (single selection, before conv3)
    h2 = h2.reshape(H, Wp, P)[:, :W, :].reshape(H * W, P)

    # ---- stage 3: conv3 (1x1) + bn3 + residual add + relu -----------------
    y = jnp.dot(h2, w3_ref[...], preferred_element_type=jnp.float32)
    y = y + b3_ref[...] + x2d                      # exact f32 residual (Cin == Cout)
    o_ref[...] = jnp.maximum(y, 0.0).reshape(1, H, W, Cout)


# ---------------------------------------------------------------------------
# Wrappers
# ---------------------------------------------------------------------------
def bottleneck_forward_nhwc(x_nhwc, params):
    """Preferred entry point: NHWC in / NHWC out (no layout round trips)."""
    x = x_nhwc.astype(jnp.float32)
    N, H, W, Cin = x.shape
    P = params["w1"].shape[1]
    Cout = params["w3"].shape[1]
    assert Cin == Cout, "downsample=None requires inplanes == planes*expansion"

    Wp = W + 2
    buf_rows = (((H + 3) * Wp) + 7) // 8 * 8      # flattened padded-h1 scratch rows

    return pl.pallas_call(
        _bottleneck_kernel,
        out_shape=jax.ShapeDtypeStruct((N, H, W, Cout), jnp.float32),
        grid_spec=pltpu.PrefetchScalarGridSpec(
            num_scalar_prefetch=0,
            grid=(N,),
            in_specs=[
                pl.BlockSpec((1, H, W, Cin), lambda n: (n, 0, 0, 0)),  # x (pipelined)
                pl.BlockSpec((Cin, P), lambda n: (0, 0)),              # w1 (VMEM resident)
                pl.BlockSpec((9, P, P), lambda n: (0, 0, 0)),          # w2 taps
                pl.BlockSpec((P, Cout), lambda n: (0, 0)),             # w3
                pl.BlockSpec((1, P), lambda n: (0, 0)),                # b1
                pl.BlockSpec((1, P), lambda n: (0, 0)),                # b2
                pl.BlockSpec((1, Cout), lambda n: (0, 0)),             # b3
            ],
            out_specs=pl.BlockSpec((1, H, W, Cout), lambda n: (n, 0, 0, 0)),
            scratch_shapes=[
                pltpu.VMEM((buf_rows, P), jnp.bfloat16),   # flattened padded conv1 tile
            ],
        ),
        compiler_params=pltpu.CompilerParams(
            dimension_semantics=("parallel",),              # megacore split over batch
            vmem_limit_bytes=32 * 1024 * 1024,              # explicit for v5e (16 MiB default)
        ),
    )(x, params["w1"], params["w2"], params["w3"],
      params["b1"], params["b2"], params["b3"])


def bottleneck_forward(x_nchw, params):
    """NCHW wrapper matching the PyTorch module contract."""
    x = jnp.transpose(x_nchw, (0, 2, 3, 1))
    out = bottleneck_forward_nhwc(x, params)
    return jnp.transpose(out, (0, 3, 1, 2))


# ---------------------------------------------------------------------------
# Parameter setup: synthetic conv + BN params, BN scale folded into bf16 weights
# ---------------------------------------------------------------------------
def make_params(inplanes, planes, key):
    expansion = 4
    cout = planes * expansion
    keys = jax.random.split(key, 6)

    def bn(k, c):
        kg, kb, km, kv = jax.random.split(k, 4)
        gamma = 1.0 + 0.1 * jax.random.normal(kg, (c,), jnp.float32)
        beta = 0.1 * jax.random.normal(kb, (c,), jnp.float32)
        mean = 0.1 * jax.random.normal(km, (c,), jnp.float32)
        var = jax.random.uniform(kv, (c,), jnp.float32, minval=0.5, maxval=1.5)
        scale = gamma / jnp.sqrt(var + EPS)
        bias = beta - mean * scale
        return scale, bias

    w1 = 0.1 * jax.random.normal(keys[0], (inplanes, planes), jnp.float32)
    w2 = 0.1 * jax.random.normal(keys[1], (3, 3, planes, planes), jnp.float32)  # HWIO
    w3 = 0.1 * jax.random.normal(keys[2], (planes, cout), jnp.float32)
    s1, b1 = bn(keys[3], planes)
    s2, b2 = bn(keys[4], planes)
    s3, b3 = bn(keys[5], cout)

    return dict(
        w1=(w1 * s1[None, :]).astype(jnp.bfloat16),
        w2=(w2 * s2[None, None, None, :]).reshape(9, planes, planes).astype(jnp.bfloat16),
        w3=(w3 * s3[None, :]).astype(jnp.bfloat16),
        b1=b1.reshape(1, -1).astype(jnp.float32),
        b2=b2.reshape(1, -1).astype(jnp.float32),
        b3=b3.reshape(1, -1).astype(jnp.float32),
    )


# ---------------------------------------------------------------------------
# Pure-JAX reference with the same precision choices (bf16 matmul operands,
# f32 accumulation, bf16 intermediate activations, f32 residual/epilogue).
# ---------------------------------------------------------------------------
def bottleneck_reference(x_nchw, params):
    x = jnp.transpose(x_nchw, (0, 2, 3, 1)).astype(jnp.float32)
    dn = ("NHWC", "HWIO", "NHWC")
    hp = lax.Precision.HIGHEST
    Cin = x.shape[-1]
    P = params["w1"].shape[1]
    Cout = params["w3"].shape[1]

    w1 = params["w1"].astype(jnp.float32).reshape(1, 1, Cin, P)
    w2 = params["w2"].astype(jnp.float32).reshape(3, 3, P, P)
    w3 = params["w3"].astype(jnp.float32).reshape(1, 1, P, Cout)

    xb = x.astype(jnp.bfloat16).astype(jnp.float32)
    h = lax.conv_general_dilated(xb, w1, (1, 1), "VALID",
                                 dimension_numbers=dn, precision=hp)
    h = jnp.maximum(h + params["b1"][0], 0.0)
    h = h.astype(jnp.bfloat16).astype(jnp.float32)
    h = lax.conv_general_dilated(h, w2, (1, 1), [(1, 1), (1, 1)],
                                 dimension_numbers=dn, precision=hp)
    h = jnp.maximum(h + params["b2"][0], 0.0)
    h = h.astype(jnp.bfloat16).astype(jnp.float32)
    h = lax.conv_general_dilated(h, w3, (1, 1), "VALID",
                                 dimension_numbers=dn, precision=hp)
    h = jnp.maximum(h + params["b3"][0] + x, 0.0)
    return jnp.transpose(h, (0, 3, 1, 2))


# ---------------------------------------------------------------------------
if __name__ == "__main__":
    # ResNet-50 layer1-style bottleneck: 256 -> 64 -> 64 -> 256 (identity path).
    N, inplanes, H, W = 2, 256, 16, 16
    planes = 64                       # expansion=4 -> Cout = 256 = inplanes

    key = jax.random.PRNGKey(0)
    kx, kp = jax.random.split(key)
    x = jax.random.normal(kx, (N, inplanes, H, W), jnp.float32)   # NCHW like PyTorch
    params = make_params(inplanes, planes, kp)

    fwd = jax.jit(bottleneck_forward)
    out = jax.block_until_ready(fwd(x, params))

    ref = jax.block_until_ready(bottleneck_reference(x, params))
    assert out.shape == (N, planes * 4, H, W)
    if not jnp.allclose(out, ref, atol=5e-3, rtol=5e-3):
        err = float(jnp.max(jnp.abs(out - ref)))
        raise AssertionError(f"Pallas bottleneck mismatch vs reference (max abs err {err})")

    print("KERNEL_OK")
</pallas_src>

<mosaic_0001>
module attributes {stable_mosaic.version = 11 : i64} {
  func.func @_bottleneck_kernel(%arg0: i32, %arg1: memref<1x16x16x256xf32, #tpu.memory_space<vmem>>, %arg2: memref<256x64xbf16, #tpu.memory_space<vmem>>, %arg3: memref<9x64x64xbf16, #tpu.memory_space<vmem>>, %arg4: memref<64x256xbf16, #tpu.memory_space<vmem>>, %arg5: memref<1x64xf32, #tpu.memory_space<vmem>>, %arg6: memref<1x64xf32, #tpu.memory_space<vmem>>, %arg7: memref<1x256xf32, #tpu.memory_space<vmem>>, %arg8: memref<1x16x16x256xf32, #tpu.memory_space<vmem>>, %arg9: memref<344x64xbf16, #tpu.memory_space<vmem>>) attributes {dimension_semantics = [#tpu.dimension_semantics<parallel>], iteration_bounds = array<i64: 2>, scalar_prefetch = 0 : i64, scratch_operands = 1 : i64, tpu.core_type = #tpu.core_type<tc>, window_params = [{transform_indices = @transform_0, window_bounds = array<i64: 1, 16, 16, 256>}, {pipeline_mode = #tpu.pipeline_mode<synchronous>, transform_indices = @transform_1, window_bounds = array<i64: 256, 64>}, {pipeline_mode = #tpu.pipeline_mode<synchronous>, transform_indices = @transform_2, window_bounds = array<i64: 9, 64, 64>}, {pipeline_mode = #tpu.pipeline_mode<synchronous>, transform_indices = @transform_3, window_bounds = array<i64: 64, 256>}, {pipeline_mode = #tpu.pipeline_mode<synchronous>, transform_indices = @transform_4, window_bounds = array<i64: 1, 64>}, {pipeline_mode = #tpu.pipeline_mode<synchronous>, transform_indices = @transform_5, window_bounds = array<i64: 1, 64>}, {pipeline_mode = #tpu.pipeline_mode<synchronous>, transform_indices = @transform_6, window_bounds = array<i64: 1, 256>}, {transform_indices = @transform_7, window_bounds = array<i64: 1, 16, 16, 256>}]} {
    %c0 = arith.constant 0 : index
    %c0_0 = arith.constant 0 : index
    %c0_1 = arith.constant 0 : index
    %c0_2 = arith.constant 0 : index
    %0 = vector.load %arg1[%c0, %c0_0, %c0_1, %c0_2] : memref<1x16x16x256xf32, #tpu.memory_space<vmem>>, vector<1x16x16x256xf32>
    %1 = vector.shape_cast %0 : vector<1x16x16x256xf32> to vector<256x256xf32>
    %2 = arith.truncf %1 : vector<256x256xf32> to vector<256x256xbf16>
    %c0_3 = arith.constant 0 : index
    %c0_4 = arith.constant 0 : index
    %3 = vector.load %arg2[%c0_3, %c0_4] : memref<256x64xbf16, #tpu.memory_space<vmem>>, vector<256x64xbf16>
    %cst = arith.constant dense<0.000000e+00> : vector<256x64xf32>
    %4 = tpu.matmul %2, %3, %cst {dimension_numbers = #tpu.dot_dimension_numbers<[1], [0], [0], [1], [0, 0, 1, 1], [], []>} : vector<256x256xbf16>, vector<256x64xbf16>, vector<256x64xf32> -> vector<256x64xf32>
    %c0_5 = arith.constant 0 : index
    %c0_6 = arith.constant 0 : index
    %5 = vector.load %arg5[%c0_5, %c0_6] : memref<1x64xf32, #tpu.memory_space<vmem>>, vector<1x64xf32>
    %6 = vector.broadcast %5 : vector<1x64xf32> to vector<256x64xf32>
    %7 = arith.addf %4, %6 : vector<256x64xf32>
    %cst_7 = arith.constant 0.000000e+00 : f32
    %8 = vector.broadcast %cst_7 : f32 to vector<256x64xf32>
    %9 = arith.maximumf %7, %8 : vector<256x64xf32>
    %10 = arith.truncf %9 : vector<256x64xf32> to vector<256x64xbf16>
    %11 = vector.shape_cast %10 : vector<256x64xbf16> to vector<16x16x64xbf16>
    %c0_i32 = arith.constant 0 : i32
    %12 = arith.sitofp %c0_i32 : i32 to bf16
    %13 = vector.broadcast %12 : bf16 to vector<1x16x64xbf16>
    %14 = tpu.concatenate %13, %11 in 0 : vector<1x16x64xbf16>, vector<16x16x64xbf16> -> vector<17x16x64xbf16>
    %15 = vector.broadcast %12 : bf16 to vector<2x16x64xbf16>
    %16 = tpu.concatenate %14, %15 in 0 : vector<17x16x64xbf16>, vector<2x16x64xbf16> -> vector<19x16x64xbf16>
    %17 = vector.broadcast %12 : bf16 to vector<19x1x64xbf16>
    %18 = tpu.concatenate %17, %16 in 1 : vector<19x1x64xbf16>, vector<19x16x64xbf16> -> vector<19x17x64xbf16>
    %19 = vector.broadcast %12 : bf16 to vector<19x1x64xbf16>
    %20 = tpu.concatenate %18, %19 in 1 : vector<19x17x64xbf16>, vector<19x1x64xbf16> -> vector<19x18x64xbf16>
    %21 = vector.shape_cast %20 : vector<19x18x64xbf16> to vector<342x64xbf16>
    %c0_8 = arith.constant 0 : index
    %c0_9 = arith.constant 0 : index
    %22 = vector.load %arg9[%c0_8, %c0_9] : memref<344x64xbf16, #tpu.memory_space<vmem>>, vector<342x64xbf16>
    tpu.vector_store %arg9[%c0_8, %c0_9], %21 {strides = array<i32>} : memref<344x64xbf16, #tpu.memory_space<vmem>>, vector<342x64xbf16>,
    %c0_10 = arith.constant 0 : index
    %c0_11 = arith.constant 0 : index
    %23 = vector.load %arg9[%c0_10, %c0_11] : memref<344x64xbf16, #tpu.memory_space<vmem>>, vector<288x64xbf16>
    %c0_12 = arith.constant 0 : index
    %c0_13 = arith.constant 0 : index
    %c0_14 = arith.constant 0 : index
    %24 = vector.load %arg3[%c0_12, %c0_13, %c0_14] : memref<9x64x64xbf16, #tpu.memory_space<vmem>>, vector<1x64x64xbf16>
    %25 = vector.shape_cast %24 : vector<1x64x64xbf16> to vector<64x64xbf16>
    %cst_15 = arith.constant dense<0.000000e+00> : vector<288x64xf32>
    %26 = tpu.matmul %23, %25, %cst_15 {dimension_numbers = #tpu.dot_dimension_numbers<[1], [0], [0], [1], [0, 0, 1, 1], [], []>} : vector<288x64xbf16>, vector<64x64xbf16>, vector<288x64xf32> -> vector<288x64xf32>
    %c1 = arith.constant 1 : index
    %c0_16 = arith.constant 0 : index
    %27 = vector.load %arg9[%c1, %c0_16] : memref<344x64xbf16, #tpu.memory_space<vmem>>, vector<288x64xbf16>
    %c1_17 = arith.constant 1 : index
    %c0_18 = arith.constant 0 : index
    %c0_19 = arith.constant 0 : index
    %28 = vector.load %arg3[%c1_17, %c0_18, %c0_19] : memref<9x64x64xbf16, #tpu.memory_space<vmem>>, vector<1x64x64xbf16>
    %29 = vector.shape_cast %28 : vector<1x64x64xbf16> to vector<64x64xbf16>
    %cst_20 = arith.constant dense<0.000000e+00> : vector<288x64xf32>
    %30 = tpu.matmul %27, %29, %cst_20 {dimension_numbers = #tpu.dot_dimension_numbers<[1], [0], [0], [1], [0, 0, 1, 1], [], []>} : vector<288x64xbf16>, vector<64x64xbf16>, vector<288x64xf32> -> vector<288x64xf32>
    %31 = arith.addf %26, %30 : vector<288x64xf32>
    %c2 = arith.constant 2 : index
    %c0_21 = arith.constant 0 : index
    %32 = vector.load %arg9[%c2, %c0_21] : memref<344x64xbf16, #tpu.memory_space<vmem>>, vector<288x64xbf16>
    %c2_22 = arith.constant 2 : index
    %c0_23 = arith.constant 0 : index
    %c0_24 = arith.constant 0 : index
    %33 = vector.load %arg3[%c2_22, %c0_23, %c0_24] : memref<9x64x64xbf16, #tpu.memory_space<vmem>>, vector<1x64x64xbf16>
    %34 = vector.shape_cast %33 : vector<1x64x64xbf16> to vector<64x64xbf16>
    %cst_25 = arith.constant dense<0.000000e+00> : vector<288x64xf32>
    %35 = tpu.matmul %32, %34, %cst_25 {dimension_numbers = #tpu.dot_dimension_numbers<[1], [0], [0], [1], [0, 0, 1, 1], [], []>} : vector<288x64xbf16>, vector<64x64xbf16>, vector<288x64xf32> -> vector<288x64xf32>
    %36 = arith.addf %31, %35 : vector<288x64xf32>
    %c18 = arith.constant 18 : index
    %c0_26 = arith.constant 0 : index
    %37 = vector.load %arg9[%c18, %c0_26] : memref<344x64xbf16, #tpu.memory_space<vmem>>, vector<288x64xbf16>
    %c3 = arith.constant 3 : index
    %c0_27 = arith.constant 0 : index
    %c0_28 = arith.constant 0 : index
    %38 = vector.load %arg3[%c3, %c0_27, %c0_28] : memref<9x64x64xbf16, #tpu.memory_space<vmem>>, vector<1x64x64xbf16>
    %39 = vector.shape_cast %38 : vector<1x64x64xbf16> to vector<64x64xbf16>
    %cst_29 = arith.constant dense<0.000000e+00> : vector<288x64xf32>
    %40 = tpu.matmul %37, %39, %cst_29 {dimension_numbers = #tpu.dot_dimension_numbers<[1], [0], [0], [1], [0, 0, 1, 1], [], []>} : vector<288x64xbf16>, vector<64x64xbf16>, vector<288x64xf32> -> vector<288x64xf32>
    %41 = arith.addf %36, %40 : vector<288x64xf32>
    %c19 = arith.constant 19 : index
    %c0_30 = arith.constant 0 : index
    %42 = vector.load %arg9[%c19, %c0_30] : memref<344x64xbf16, #tpu.memory_space<vmem>>, vector<288x64xbf16>
    %c4 = arith.constant 4 : index
    %c0_31 = arith.constant 0 : index
    %c0_32 = arith.constant 0 : index
    %43 = vector.load %arg3[%c4, %c0_31, %c0_32] : memref<9x64x64xbf16, #tpu.memory_space<vmem>>, vector<1x64x64xbf16>
    %44 = vector.shape_cast %43 : vector<1x64x64xbf16> to vector<64x64xbf16>
    %cst_33 = arith.constant dense<0.000000e+00> : vector<288x64xf32>
    %45 = tpu.matmul %42, %44, %cst_33 {dimension_numbers = #tpu.dot_dimension_numbers<[1], [0], [0], [1], [0, 0, 1, 1], [], []>} : vector<288x64xbf16>, vector<64x64xbf16>, vector<288x64xf32> -> vector<288x64xf32>
    %46 = arith.addf %41, %45 : vector<288x64xf32>
    %c20 = arith.constant 20 : index
    %c0_34 = arith.constant 0 : index
    %47 = vector.load %arg9[%c20, %c0_34] : memref<344x64xbf16, #tpu.memory_space<vmem>>, vector<288x64xbf16>
    %c5 = arith.constant 5 : index
    %c0_35 = arith.constant 0 : index
    %c0_36 = arith.constant 0 : index
    %48 = vector.load %arg3[%c5, %c0_35, %c0_36] : memref<9x64x64xbf16, #tpu.memory_space<vmem>>, vector<1x64x64xbf16>
    %49 = vector.shape_cast %48 : vector<1x64x64xbf16> to vector<64x64xbf16>
    %cst_37 = arith.constant dense<0.000000e+00> : vector<288x64xf32>
    %50 = tpu.matmul %47, %49, %cst_37 {dimension_numbers = #tpu.dot_dimension_numbers<[1], [0], [0], [1], [0, 0, 1, 1], [], []>} : vector<288x64xbf16>, vector<64x64xbf16>, vector<288x64xf32> -> vector<288x64xf32>
    %51 = arith.addf %46, %50 : vector<288x64xf32>
    %c36 = arith.constant 36 : index
    %c0_38 = arith.constant 0 : index
    %52 = vector.load %arg9[%c36, %c0_38] : memref<344x64xbf16, #tpu.memory_space<vmem>>, vector<288x64xbf16>
    %c6 = arith.constant 6 : index
    %c0_39 = arith.constant 0 : index
    %c0_40 = arith.constant 0 : index
    %53 = vector.load %arg3[%c6, %c0_39, %c0_40] : memref<9x64x64xbf16, #tpu.memory_space<vmem>>, vector<1x64x64xbf16>
    %54 = vector.shape_cast %53 : vector<1x64x64xbf16> to vector<64x64xbf16>
    %cst_41 = arith.constant dense<0.000000e+00> : vector<288x64xf32>
    %55 = tpu.matmul %52, %54, %cst_41 {dimension_numbers = #tpu.dot_dimension_numbers<[1], [0], [0], [1], [0, 0, 1, 1], [], []>} : vector<288x64xbf16>, vector<64x64xbf16>, vector<288x64xf32> -> vector<288x64xf32>
    %56 = arith.addf %51, %55 : vector<288x64xf32>
    %c37 = arith.constant 37 : index
    %c0_42 = arith.constant 0 : index
    %57 = vector.load %arg9[%c37, %c0_42] : memref<344x64xbf16, #tpu.memory_space<vmem>>, vector<288x64xbf16>
    %c7 = arith.constant 7 : index
    %c0_43 = arith.constant 0 : index
    %c0_44 = arith.constant 0 : index
    %58 = vector.load %arg3[%c7, %c0_43, %c0_44] : memref<9x64x64xbf16, #tpu.memory_space<vmem>>, vector<1x64x64xbf16>
    %59 = vector.shape_cast %58 : vector<1x64x64xbf16> to vector<64x64xbf16>
    %cst_45 = arith.constant dense<0.000000e+00> : vector<288x64xf32>
    %60 = tpu.matmul %57, %59, %cst_45 {dimension_numbers = #tpu.dot_dimension_numbers<[1], [0], [0], [1], [0, 0, 1, 1], [], []>} : vector<288x64xbf16>, vector<64x64xbf16>, vector<288x64xf32> -> vector<288x64xf32>
    %61 = arith.addf %56, %60 : vector<288x64xf32>
    %c38 = arith.constant 38 : index
    %c0_46 = arith.constant 0 : index
    %62 = vector.load %arg9[%c38, %c0_46] : memref<344x64xbf16, #tpu.memory_space<vmem>>, vector<288x64xbf16>
    %c8 = arith.constant 8 : index
    %c0_47 = arith.constant 0 : index
    %c0_48 = arith.constant 0 : index
    %63 = vector.load %arg3[%c8, %c0_47, %c0_48] : memref<9x64x64xbf16, #tpu.memory_space<vmem>>, vector<1x64x64xbf16>
    %64 = vector.shape_cast %63 : vector<1x64x64xbf16> to vector<64x64xbf16>
    %cst_49 = arith.constant dense<0.000000e+00> : vector<288x64xf32>
    %65 = tpu.matmul %62, %64, %cst_49 {dimension_numbers = #tpu.dot_dimension_numbers<[1], [0], [0], [1], [0, 0, 1, 1], [], []>} : vector<288x64xbf16>, vector<64x64xbf16>, vector<288x64xf32> -> vector<288x64xf32>
    %66 = arith.addf %61, %65 : vector<288x64xf32>
    %c0_50 = arith.constant 0 : index
    %c0_51 = arith.constant 0 : index
    %67 = vector.load %arg6[%c0_50, %c0_51] : memref<1x64xf32, #tpu.memory_space<vmem>>, vector<1x64xf32>
    %68 = vector.broadcast %67 : vector<1x64xf32> to vector<288x64xf32>
    %69 = arith.addf %66, %68 : vector<288x64xf32>
    %cst_52 = arith.constant 0.000000e+00 : f32
    %70 = vector.broadcast %cst_52 : f32 to vector<288x64xf32>
    %71 = arith.maximumf %69, %70 : vector<288x64xf32>
    %72 = arith.truncf %71 : vector<288x64xf32> to vector<288x64xbf16>
    %73 = vector.shape_cast %72 : vector<288x64xbf16> to vector<16x18x64xbf16>
    %74 = vector.extract_strided_slice %73 {offsets = [0, 0, 0], sizes = [16, 16, 64], strides = [1, 1, 1]} : vector<16x18x64xbf16> to vector<16x16x64xbf16>
    %75 = vector.shape_cast %74 : vector<16x16x64xbf16> to vector<256x64xbf16>
    %c0_53 = arith.constant 0 : index
    %c0_54 = arith.constant 0 : index
    %76 = vector.load %arg4[%c0_53, %c0_54] : memref<64x256xbf16, #tpu.memory_space<vmem>>, vector<64x256xbf16>
    %cst_55 = arith.constant dense<0.000000e+00> : vector<256x256xf32>
    %77 = tpu.matmul %75, %76, %cst_55 {dimension_numbers = #tpu.dot_dimension_numbers<[1], [0], [0], [1], [0, 0, 1, 1], [], []>} : vector<256x64xbf16>, vector<64x256xbf16>, vector<256x256xf32> -> vector<256x256xf32>
    %c0_56 = arith.constant 0 : index
    %c0_57 = arith.constant 0 : index
    %78 = vector.load %arg7[%c0_56, %c0_57] : memref<1x256xf32, #tpu.memory_space<vmem>>, vector<1x256xf32>
    %79 = vector.broadcast %78 : vector<1x256xf32> to vector<256x256xf32>
    %80 = arith.addf %77, %79 : vector<256x256xf32>
    %81 = arith.addf %80, %1 : vector<256x256xf32>
    %cst_58 = arith.constant 0.000000e+00 : f32
    %82 = vector.broadcast %cst_58 : f32 to vector<256x256xf32>
    %83 = arith.maximumf %81, %82 : vector<256x256xf32>
    %84 = vector.shape_cast %83 : vector<256x256xf32> to vector<1x16x16x256xf32>
    %c0_59 = arith.constant 0 : index
    %c0_60 = arith.constant 0 : index
    %c0_61 = arith.constant 0 : index
    %c0_62 = arith.constant 0 : index
    %85 = vector.load %arg8[%c0_59, %c0_60, %c0_61, %c0_62] : memref<1x16x16x256xf32, #tpu.memory_space<vmem>>, vector<1x16x16x256xf32>
    tpu.vector_store %arg8[%c0_59, %c0_60, %c0_61, %c0_62], %84 {strides = array<i32>} : memref<1x16x16x256xf32, #tpu.memory_space<vmem>>, vector<1x16x16x256xf32>,
    return
  }
  func.func @transform_0(%arg0: i32) -> (i32, i32, i32, i32) {
    %c0_i32 = arith.constant 0 : i32
    %c0_i32_0 = arith.constant 0 : i32
    %c0_i32_1 = arith.constant 0 : i32
    %c0_i32_2 = arith.constant 0 : i32
    return %arg0, %c0_i32, %c0_i32_0, %c0_i32_1 : i32, i32, i32, i32
  }
  func.func @transform_1(%arg0: i32) -> (i32, i32) {
    %c0_i32 = arith.constant 0 : i32
    %c0_i32_0 = arith.constant 0 : i32
    %c0_i32_1 = arith.constant 0 : i32
    return %c0_i32, %c0_i32_0 : i32, i32
  }
  func.func @transform_2(%arg0: i32) -> (i32, i32, i32) {
    %c0_i32 = arith.constant 0 : i32
    %c0_i32_0 = arith.constant 0 : i32
    %c0_i32_1 = arith.constant 0 : i32
    %c0_i32_2 = arith.constant 0 : i32
    return %c0_i32, %c0_i32_0, %c0_i32_1 : i32, i32, i32
  }
  func.func @transform_3(%arg0: i32) -> (i32, i32) {
    %c0_i32 = arith.constant 0 : i32
    %c0_i32_0 = arith.constant 0 : i32
    %c0_i32_1 = arith.constant 0 : i32
    return %c0_i32, %c0_i32_0 : i32, i32
  }
  func.func @transform_4(%arg0: i32) -> (i32, i32) {
    %c0_i32 = arith.constant 0 : i32
    %c0_i32_0 = arith.constant 0 : i32
    %c0_i32_1 = arith.constant 0 : i32
    return %c0_i32, %c0_i32_0 : i32, i32
  }
  func.func @transform_5(%arg0: i32) -> (i32, i32) {
    %c0_i32 = arith.constant 0 : i32
    %c0_i32_0 = arith.constant 0 : i32
    %c0_i32_1 = arith.constant 0 : i32
    return %c0_i32, %c0_i32_0 : i32, i32
  }
  func.func @transform_6(%arg0: i32) -> (i32, i32) {
    %c0_i32 = arith.constant 0 : i32
    %c0_i32_0 = arith.constant 0 : i32
    %c0_i32_1 = arith.constant 0 : i32
    return %c0_i32, %c0_i32_0 : i32, i32
  }
  func.func @transform_7(%arg0: i32) -> (i32, i32, i32, i32) {
    %c0_i32 = arith.constant 0 : i32
    %c0_i32_0 = arith.constant 0 : i32
    %c0_i32_1 = arith.constant 0 : i32
    %c0_i32_2 = arith.constant 0 : i32
    return %arg0, %c0_i32, %c0_i32_0, %c0_i32_1 : i32, i32, i32, i32
  }
}

</mosaic_0001>

<bundles_post_ra>
// kernel: bottleneck_forward.1
= control target key start
LH: loop header
LB: loop body
LE: loop exit
PB: predicated region body
PF: predicated region fallthrough
CT: control target
= control target key end

     0   :  { %12 = vsyncpa [#allocation4], 0  ;;  %s13838_s0 = inlined_call_operand.hbm [shape: f32[2,16,16,256], index: 0, kind: input, shape index: {}]   ;;  %s13839_s1 = inlined_call_operand.vmem [shape: bf16[256,64], index: 1, kind: input, shape index: {}]   ;;  %s13840_s2 = inlined_call_operand.hbm [shape: bf16[9,64,64], index: 2, kind: input, shape index: {}]   ;;  %s13841_s3 = inlined_call_operand.vmem [shape: bf16[64,256], index: 3, kind: input, shape index: {}]   ;;  %s13842_s4 = inlined_call_operand.vmem [shape: f32[1,64], index: 4, kind: input, shape index: {}]   ;;  %s13843_s5 = inlined_call_operand.vmem [shape: f32[1,64], index: 5, kind: input, shape index: {}]   ;;  %s13844_s6 = inlined_call_operand.vmem [shape: f32[1,256], index: 6, kind: input, shape index: {}]   ;;  %s13845_s7 = inlined_call_operand.hbm [shape: f32[2,16,16,256], index: 7, kind: output, shape index: {}]  }
   0x1   :  { %14 = vsyncpa [#allocation4 + $0x1], 0 }
   0x2   :  { %15 = vsyncpa [#allocation7], 0 }
   0x3   :  { %16 = vsyncpa [#allocation5], 0 }
   0x4   :  { %18 = vsyncpa [#allocation5 + $0x1], 0  ;;  %s11017_s24 = smov 0   ;;  %s11019_s25 = smov 0  }
   0x5   :  { %s11021_s26 = smov 0   ;;  %s11023_s27 = smov 0  }
   0x6 LB: > { %s11038_s28 = sadd.s32 4294967295, %s10963_s27   ;;  %s9205_s29 = sadd.s32 4294967294, %s10963_s27   ;;  %s10963_s27 = sphi %s11023_s27, %s14008_s27   ;;  %s10959_s26 = sphi %s11021_s26, %s14007_s26   ;;  %s10955_s25 = sphi %s11019_s25, %s14006_s25   ;;  %s10951_s24 = sphi %s11017_s24, %s14005_s24  }
   0x7   : > { %p44_p0 = scmp.ne.s32.totalorder %s10955_s25, %s10951_s24  ;;  %p13846_p1 = scmp.eq.s32.totalorder %s11038_s28, 0 }
   0x8   : > { %p200_p3 = scmp.eq.s32.totalorder %s9205_s29, 1  ;;  %p9206_p5 = scmp.ge.s32.totalorder %s10963_s27, 1 }
   0x9   : > { %p11047_p4 = por %p13846_p1, %p44_p0  ;;  %p207_p7 = scmp.lt.s32.totalorder %s10963_s27, 3 }
   0xa   : > { %p11052_p6 = por %p200_p3, %p44_p0  ;;  %s10965_s10 = smov [#allocation6]  }
   0xb   : > { %s13862_s30 = scalar_select %p11047_p4, 1, 0 }
   0xc   : > { %s13863_s8 = scalar_select %p11052_p6, 1, 0 }
   0xd   : > { %p11057_p8 = pnand %p9206_p5, %p207_p7  ;;  %s222_s11 = sshll.u32 %s10965_s10, 4  ;;  %s11061_s11 = int_to_ptr.vmem [resolvable:$true] %s222_s11 }
   0xe   : > { %s11073_s13 = sadd.s32 1, %s10963_s27   ;;  %s31_s14 = sadd.s32 1, %s10959_s26 }
   0xf   : > { %s13864_s9 = scalar_select %p11057_p8, 1, 0 }
  0x10   : > { %p10569_p9 = pneg %p11057_p8  ;;  %s28_s15 = ssub.s32 %s10963_s27, %s11073_s13 }
  0x11   : > { %s10835_s18 = scalar_lea.hbm %s13840_s2, 4608 }
  0x12   : > { %p11068_p11 = pnand %p10569_p9, %p13846_p1  ;;  %p10836_p12 = scmp.ne.s32.totalorder %s13840_s2, %s10835_s18 }
  0x13   : > { %p10842_p5 = scmp.lt.u32.totalorder %s10835_s18, %s13840_s2 }
  0x14   : > { %p10837_p13 = pneg %p11068_p11 }
  0x16   : > { %p10838_p0 = pnand %p10837_p13, %p10836_p12 }
  0x18   : > { %p10839_p3 = pneg %p10838_p0 }
  0x1a   : > { %p10844_p7 = pnand %p10842_p5, %p10839_p3 }
  0x1c   : > { %10847 = shalt.err (!%p10844_p7)
}
  0x1d   : > { %s10848_s23 = scalar_lea.vmem %s11061_s11, 4608  ;;  %p10856_p2 = scmp.lt.s32.totalorder %s11061_s11, %s11061_s11 }
  0x1e   : > { %p10849_p9 = scmp.ne.s32.totalorder %s11061_s11, %s10848_s23  ;;  %p10857_p6 = scmp.lt.s32.totalorder %s10848_s23, %s10848_s23 }
  0x20   : > { %p10851_p10 = pnand %p10849_p9, %p10837_p13  ;;  %p10858_p4 = por %p10857_p6, %p10856_p2 }
  0x22   : > { %p10852_p1 = pneg %p10851_p10 }
  0x24   : > { %p10859_p8 = pnand %p10858_p4, %p10852_p1 }
  0x26   : > { %10862 = shalt.err (!%p10859_p8)
}
  0x27   : > { %s10966_s29 = smov 64   ;;  %s10967_s10 = smov 4  }
  0x28   : > { %10572 = dma.hbm_to_vmem [thread:$0]  (!%p11068_p11), %s13840_s2, 4608, %s11061_s11, [#allocation7], %s10966_s29, %s10966_s29, %s10967_s10  }
  0x29   : > { %p29_p2 = scmp.eq.s32.totalorder %s28_s15, 0  ;;  %p38_p1 = scmp.ne.s32.totalorder %s10959_s26, %s10955_s25 }
  0x2a   : > { %p39_p4 = scmp.eq.s32.totalorder %s10963_s27, 0  ;;  %p10582_p6 = scmp.lt.s32.totalorder %s10963_s27, 2 }
  0x2b   : > { %s11104_s18 = scalar_select %p29_p2, %s10959_s26, %s31_s14  }
  0x2c   : > { %p40_p8 = por %p39_p4, %p38_p1  ;;  %p13866_p10 = scmp.eq.s32.totalorder %s11038_s28, 1 }
  0x2d   : > { %s248_s20 = sand.u32 1, %s10959_s26   ;;  %s9557_s21 = sshll.u32 %s10963_s27, 13 }
  0x2e   : > { %p11108_p12 = por %p13866_p10, %p38_p1  ;;  %s9209_s22 = sshll.u32 %s248_s20, 9 }
  0x2f   : > { %s11117_s16 = scalar_lea.hbm %s13838_s0, %s9557_s21  ;;  %s252_s11 = scalar_lea.vmem [#allocation3], %s9209_s22 }
  0x30   : > { %s259_s14 = sshll.u32 %s252_s11, 4  ;;  %p11119_p11 = pnand %p10582_p6, %p40_p8  ;;  %s11123_s14 = int_to_ptr.vmem [resolvable:$true] %s259_s14 }
  0x31   : > { %s11125_s29 = scalar_lea.sflag [#allocation4], %s248_s20  ;;  %s10863_s10 = scalar_lea.hbm %s11117_s16, 8192 }
  0x32   : > { %p10864_p13 = scmp.ne.s32.totalorder %s11117_s16, %s10863_s10  ;;  %p10865_p0 = pneg %p11119_p11 }
  0x33   : > { %s10868_s22 = scalar_lea.hbm %s13838_s0, 16384  ;;  %p10869_p7 = scmp.lt.u32.totalorder %s11117_s16, %s13838_s0 }
  0x34   : > { %p10866_p3 = pnand %p10865_p0, %p10864_p13  ;;  %p10870_p9 = scmp.lt.u32.totalorder %s10868_s22, %s10863_s10 }
  0x35   : > { %p10872_p1 = scmp.lt.u32.totalorder %s10863_s10, %s11117_s16 }
  0x36   : > { %p10867_p5 = pneg %p10866_p3  ;;  %p10871_p2 = por %p10870_p9, %p10869_p7 }
  0x38   : > { %p10873_p4 = por %p10872_p1, %p10871_p2 }
  0x3a   : > { %p10874_p6 = pnand %p10873_p4, %p10867_p5 }
  0x3c   : > { %10877 = shalt.err (!%p10874_p6)
}
  0x3d   : > { %s10878_s20 = scalar_lea.vmem %s11123_s14, 8192  ;;  %s10968_s11 = smov [#allocation3]  }
  0x3e   : > { %p10879_p8 = scmp.ne.s32.totalorder %s11123_s14, %s10878_s20  ;;  %s10883_s17 = sshll.u32 %s10968_s11, 4  ;;  %s10884_s17 = int_to_ptr.vmem [resolvable:$false] %s10883_s17 }
  0x3f   : > { %s10885_s21 = scalar_lea.vmem %s10884_s17, 16384  ;;  %p10886_p3 = scmp.lt.s32.totalorder %s11123_s14, %s10884_s17 }
  0x40   : > { %p10881_p10 = pnand %p10879_p8, %p10865_p0  ;;  %p10887_p7 = scmp.lt.s32.totalorder %s10885_s21, %s10878_s20 }
  0x42   : > { %p10882_p13 = pneg %p10881_p10  ;;  %p10888_p9 = por %p10887_p7, %p10886_p3 }
  0x44   : > { %p10889_p2 = pnand %p10888_p9, %p10882_p13 }
  0x46   : > { %10892 = shalt.err (!%p10889_p2)
}
  0x47   : > { %s10969_s10 = smov 256   ;;  %s10970_s22 = smov 16  }
  0x48   : > { %10576 = dma.hbm_to_vmem [thread:$0]  (!%p11119_p11), %s11117_s16, 8192, %s11123_s14, %s11125_s29, %s10969_s10, %s10969_s10, %s10970_s22  }
  0x49   : > { %p13869_p0 = scmp.ne.s32.totalorder %s13864_s9, 0 }
  0x4b   : > { %271 = sbr.rel (%p13869_p0) target bundleno = 1571 (0x623), region = 48 }
  0x52   : > { %s11156_s12 = sand.u32 1, %s10955_s25   ;;  %p13870_p5 = scmp.ne.s32.totalorder %s13862_s30, 0 }
  0x53   : > { %s9213_s23 = sshll.u32 %s11156_s12, 9  ;;  %s274_s20 = scalar_lea.sflag [#allocation4], %s11156_s12 }
  0x54   : > { %s11162_s11 = scalar_lea.vmem [#allocation3], %s9213_s23 }
  0x55   : > { %10938 = dma.done.wait (%p13870_p5), %s274_s20, 8192  }
  0x56   : > { %10940 = vsyncadd (%p13870_p5), %s274_s20, 4294959104  ;;  %p13871_p11 = scmp.eq.s32.totalorder %s11038_s28, 0 }
  0x58   : > { %10942 = dma.done.wait (%p13871_p11), [#allocation7], 4608   ;;  %p13872_p1 = pmov %p13871_p11 }
  0x59   : > { %v10627_v0 = vld [vmem:[%s13839_s1 + $0x40] sm:$0xff]   ;;  %v10629_v2 = vld [vmem:[%s13839_s1 + $0x48] sm:$0xff]   ;;  %v10631_v4 = vld [vmem:[%s13839_s1 + $0x50] sm:$0xff]   ;;  %vm906_vm0 = vcmask 1040384   ;;  %vm907_vm1 = vsmask.f32 256 }
  0x5a   : > { %10944 = vsyncadd (%p13872_p1), [#allocation7], 4294962688  ;;  %v10628_v1 = vld [vmem:[%s13839_s1] sm:$0xff]   ;;  %9559 = vmatprep.subr.bf16.mxu0 %v10627_v0  ;;  %v10630_v3 = vld [vmem:[%s13839_s1 + $0x8] sm:$0xff]   ;;  %vm3098_vm3 = vcmask 519168   ;;  %vm3463_vm5 = vcmask 523264  }
  0x5b   : > { %9560 = vmatpush3.bf16.msra.mxu0 %v10628_v1  ;;  %v10632_v5 = vld [vmem:[%s13839_s1 + $0x10] sm:$0xff]   ;;  %v10633_v6 = vld [vmem:[%s13839_s1 + $0x58] sm:$0xff]   ;;  %v10635_v8 = vld [vmem:[%s13839_s1 + $0x60] sm:$0xff]   ;;  %vm3290_vm4 = vsmask.f32 7424  ;;  %vm3945_vm6 = vcmask 1046528  }
  0x5c   : > { %9561 = vmatprep.subr.bf16.mxu0 %v10629_v2  ;;  %v10634_v7 = vld [vmem:[%s13839_s1 + $0x18] sm:$0xff]   ;;  %v10636_v9 = vld [vmem:[%s13839_s1 + $0x20] sm:$0xff]   ;;  %v10637_v10 = vld [vmem:[%s13839_s1 + $0x68] sm:$0xff]   ;;  %vm4754_vm7 = vsmask.f32 6400  ;;  %vm5229_vm8 = vcmask 1045504  }
  0x5d   : > { %v314_v11 = vld [vmem:[%s11162_s11 + $0x8] sm:$0xff]  ;;  %v316_v12 = vld [vmem:[%s11162_s11 + $0x18] sm:$0xff]  ;;  %v313_v19 = vld [vmem:[%s11162_s11] sm:$0xff]  ;;  %vm6038_vm9 = vsmask.f32 5376  ;;  %vm6513_vm10 = vcmask 1044480  }
  0x5e   : > { %v378_v13 = vpack.c.bf16 %v316_v12, %v314_v11  ;;  %v10638_v14 = vld [vmem:[%s13839_s1 + $0x28] sm:$0xff]   ;;  %v10639_v15 = vld [vmem:[%s13839_s1 + $0x70] sm:$0xff]   ;;  %v10641_v17 = vld [vmem:[%s13839_s1 + $0x78] sm:$0xff]   ;;  %s13601_s16 = scalar_lea.vmem [#allocation8], %s9213_s23  ;;  %s9558_s23 = sshll.u32 %s11038_s28, 13 }
  0x5f   : > { %9562 = vmatpush3.bf16.msra.mxu0 %v10630_v3  ;;  %v10640_v16 = vld [vmem:[%s13839_s1 + $0x30] sm:$0xff]   ;;  %v10642_v18 = vld [vmem:[%s13839_s1 + $0x38] sm:$0xff]   ;;  %v320_v22 = vld [vmem:[%s11162_s11 + $0x38] sm:$0xff]  ;;  %s9122_s14 = sshll.u32 %s13601_s16, 4  ;;  %s13789_s17 = scalar_lea.hbm %s13845_s7, %s9558_s23  ;;  %s13791_s14 = int_to_ptr.vmem [resolvable:$true] %s9122_s14 }
  0x60   : > { %9563 = vmatprep.subr.bf16.mxu0 %v10631_v4  ;;  %576 = vmatprep.mubr.bf16.mxu0 %v378_v13  ;;  %v315_v20 = vld [vmem:[%s11162_s11 + $0x10] sm:$0xff]  ;;  %v318_v21 = vld [vmem:[%s11162_s11 + $0x28] sm:$0xff]  ;;  %v317_v25 = vld [vmem:[%s11162_s11 + $0x20] sm:$0xff]  ;;  %s9109_s28 = scalar_lea.sflag [#allocation5], %s11156_s12  ;;  %s10893_s30 = scalar_lea.vmem %s13791_s14, 8192 }
  0x61   : > { %v377_v23 = vpack.c.bf16 %v315_v20, %v313_v19  ;;  %v380_v24 = vpack.c.bf16 %v320_v22, %v318_v21  ;;  %v319_v26 = vld [vmem:[%s11162_s11 + $0x30] sm:$0xff]  ;;  %v322_v27 = vld [vmem:[%s11162_s11 + $0x48] sm:$0xff]  ;;  %v324_v28 = vld [vmem:[%s11162_s11 + $0x58] sm:$0xff]  ;;  %p10894_p4 = scmp.ne.s32.totalorder %s13791_s14, %s10893_s30 }
  0x62   : > { %v379_v29 = vpack.c.bf16 %v319_v26, %v317_v25  ;;  %v382_v30 = vpack.c.bf16 %v324_v28, %v322_v27  ;;  %v321_v31 = vld [vmem:[%s11162_s11 + $0x40] sm:$0xff]  ;;  %v323_v32 = vld [vmem:[%s11162_s11 + $0x50] sm:$0xff]  ;;  %v326_v33 = vld [vmem:[%s11162_s11 + $0x68] sm:$0xff] }
  0x63   : > { %9564 = vmatpush3.bf16.msra.mxu0 %v10632_v5  ;;  %v328_v34 = vld [vmem:[%s11162_s11 + $0x78] sm:$0xff]  ;;  %v381_v35 = vpack.c.bf16 %v323_v32, %v321_v31  ;;  %v325_v37 = vld [vmem:[%s11162_s11 + $0x60] sm:$0xff]  ;;  %v327_v38 = vld [vmem:[%s11162_s11 + $0x70] sm:$0xff]  ;;  %p10895_p6 = pnand %p10894_p4, %p11108_p12 }
  0x64   : > { %9565 = vmatprep.subr.bf16.mxu0 %v10633_v6  ;;  %v384_v36 = vpack.c.bf16 %v328_v34, %v326_v33  ;;  %v330_v39 = vld [vmem:[%s11162_s11 + $0x88] sm:$0xff]  ;;  %v332_v40 = vld [vmem:[%s11162_s11 + $0x98] sm:$0xff]  ;;  %v383_v41 = vpack.c.bf16 %v327_v38, %v325_v37  ;;  %v329_v43 = vld [vmem:[%s11162_s11 + $0x80] sm:$0xff]  ;;  %v10971_v33 = vmov 1966171168  }
  0x65   : > { %v386_v42 = vpack.c.bf16 %v332_v40, %v330_v39  ;;  %v331_v44 = vld [vmem:[%s11162_s11 + $0x90] sm:$0xff]  ;;  %v334_v45 = vld [vmem:[%s11162_s11 + $0xa8] sm:$0xff]  ;;  %v336_v46 = vld [vmem:[%s11162_s11 + $0xb8] sm:$0xff]  ;;  %v979_v34 = vunpack.c.l.s4 %v10971_v33  ;;  %p10896_p8 = pneg %p10895_p6 }
  0x66   : > { %v385_v47 = vpack.c.bf16 %v331_v44, %v329_v43  ;;  %v388_v48 = vpack.c.bf16 %v336_v46, %v334_v45  ;;  %v333_v49 = vld [vmem:[%s11162_s11 + $0xa0] sm:$0xff]  ;;  %v335_v50 = vld [vmem:[%s11162_s11 + $0xb0] sm:$0xff]  ;;  %v338_v51 = vld [vmem:[%s11162_s11 + $0xc8] sm:$0xff] }
  0x67   : > { %9566 = vmatpush3.bf16.msra.mxu0 %v10634_v7  ;;  %v340_v52 = vld [vmem:[%s11162_s11 + $0xd8] sm:$0xff]  ;;  %v387_v53 = vpack.c.bf16 %v335_v50, %v333_v49  ;;  %v337_v55 = vld [vmem:[%s11162_s11 + $0xc0] sm:$0xff]  ;;  %v339_v56 = vld [vmem:[%s11162_s11 + $0xd0] sm:$0xff]  ;;  %v980_v39 = vunpack.c.0.s8 %v979_v34 }
  0x68   : > { %9567 = vmatprep.subr.bf16.mxu0 %v10635_v8  ;;  %v390_v54 = vpack.c.bf16 %v340_v52, %v338_v51  ;;  %v342_v57 = vld [vmem:[%s11162_s11 + $0xe8] sm:$0xff]  ;;  %v344_v58 = vld [vmem:[%s11162_s11 + $0xf8] sm:$0xff]  ;;  %v389_v59 = vpack.c.bf16 %v339_v56, %v337_v55  ;;  %v341_v61 = vld [vmem:[%s11162_s11 + $0xe0] sm:$0xff] }
  0x69   : > { %v392_v60 = vpack.c.bf16 %v344_v58, %v342_v57  ;;  %v343_v62 = vld [vmem:[%s11162_s11 + $0xf0] sm:$0xff]  ;;  %v346_v63 = vld [vmem:[%s11162_s11 + $0x108] sm:$0xff]  ;;  %v348_v0 = vld [vmem:[%s11162_s11 + $0x118] sm:$0xff] }
  0x6a   : > { %v391_v1 = vpack.c.bf16 %v343_v62, %v341_v61  ;;  %v394_v2 = vpack.c.bf16 %v348_v0, %v346_v63  ;;  %v345_v3 = vld [vmem:[%s11162_s11 + $0x100] sm:$0xff]  ;;  %v347_v4 = vld [vmem:[%s11162_s11 + $0x110] sm:$0xff]  ;;  %v350_v5 = vld [vmem:[%s11162_s11 + $0x128] sm:$0xff] }
  0x6b   : > { %9568 = vmatpush3.bf16.msra.mxu0 %v10636_v9  ;;  %v352_v6 = vld [vmem:[%s11162_s11 + $0x138] sm:$0xff]  ;;  %v393_v7 = vpack.c.bf16 %v347_v4, %v345_v3  ;;  %v349_v9 = vld [vmem:[%s11162_s11 + $0x120] sm:$0xff]  ;;  %v354_v11 = vld [vmem:[%s11162_s11 + $0x148] sm:$0xff] }
  0x6c   : > { %9569 = vmatprep.subr.bf16.mxu0 %v10637_v10  ;;  %v396_v8 = vpack.c.bf16 %v352_v6, %v350_v5  ;;  %v351_v10 = vld [vmem:[%s11162_s11 + $0x130] sm:$0xff]  ;;  %v356_v12 = vld [vmem:[%s11162_s11 + $0x158] sm:$0xff]  ;;  %v357_v21 = vld [vmem:[%s11162_s11 + $0x160] sm:$0xff] }
  0x6d   : > { %v395_v13 = vpack.c.bf16 %v351_v10, %v349_v9  ;;  %v359_v22 = vld [vmem:[%s11162_s11 + $0x170] sm:$0xff]  ;;  %v361_v27 = vld [vmem:[%s11162_s11 + $0x180] sm:$0xff]  ;;  %vm11275_vm2 = vmand %vm906_vm0, %vm907_vm1 }
  0x6e   : > { %v399_v25 = vpack.c.bf16 %v359_v22, %v357_v21  ;;  %v363_v28 = vld [vmem:[%s11162_s11 + $0x190] sm:$0xff]  ;;  %v370_v46 = vld [vmem:[%s11162_s11 + $0x1c8] sm:$0xff]  ;;  %v369_v62 = vld [vmem:[%s11162_s11 + $0x1c0] sm:$0xff] }
  0x6f   : > { %9570 = vmatpush3.bf16.msra.mxu0 %v10638_v14  ;;  %v398_v14 = vpack.c.bf16 %v356_v12, %v354_v11  ;;  %v401_v31 = vpack.c.bf16 %v363_v28, %v361_v27  ;;  %v367_v43 = vld [vmem:[%s11162_s11 + $0x1b0] sm:$0xff]  ;;  %v374_v3 = vld [vmem:[%s11162_s11 + $0x1e8] sm:$0xff]  ;;  %v376_v4 = vld [vmem:[%s11162_s11 + $0x1f8] sm:$0xff] }
  0x70   : > { %9571 = vmatprep.subr.bf16.mxu0 %v10639_v15  ;;  %v353_v15 = vld [vmem:[%s11162_s11 + $0x140] sm:$0xff]  ;;  %v371_v63 = vld [vmem:[%s11162_s11 + $0x1d0] sm:$0xff]  ;;  %v408_v12 = vpack.c.bf16 %v376_v4, %v374_v3 }
  0x71   : > { %v405_v10 = vpack.c.bf16 %v371_v63, %v369_v62 }
  0x73   : > { %9572 = vmatpush3.bf16.msra.mxu0 %v10640_v16  ;;  %v355_v16 = vld [vmem:[%s11162_s11 + $0x150] sm:$0xff] }
  0x74   : > { %9573 = vmatprep.subr.bf16.mxu0 %v10641_v17  ;;  %v358_v17 = vld [vmem:[%s11162_s11 + $0x168] sm:$0xff]  ;;  %v397_v19 = vpack.c.bf16 %v355_v16, %v353_v15 }
  0x77   : > { %9574 = vmatpush3.bf16.msra.mxu0 %v10642_v18  ;;  %v360_v18 = vld [vmem:[%s11162_s11 + $0x178] sm:$0xff] }
  0x78   : > { %v400_v20 = vpack.c.bf16 %v360_v18, %v358_v17 }
  0x7a   : > { %577 = vmatmul.mubr.bf16.vlgmr.msra.gmra.mrb[0].mxu0 %v377_v23  ;;  %v362_v23 = vld [vmem:[%s11162_s11 + $0x188] sm:$0xff] }
  0x7b   : > { %584 = vmatprep.mubr.bf16.mxu0 %v380_v24  ;;  %v364_v24 = vld [vmem:[%s11162_s11 + $0x198] sm:$0xff] }
  0x7c   : > { %v402_v26 = vpack.c.bf16 %v364_v24, %v362_v23 }
  0x82   : > { %585 = vmatmul.mubr.bf16.gmra.mrb[4].mxu0 %v379_v29  ;;  %v366_v29 = vld [vmem:[%s11162_s11 + $0x1a8] sm:$0xff] }
  0x83   : > { %592 = vmatprep.mubr.bf16.mxu0 %v382_v30  ;;  %v368_v30 = vld [vmem:[%s11162_s11 + $0x1b8] sm:$0xff] }
  0x84   : > { %v404_v32 = vpack.c.bf16 %v368_v30, %v366_v29 }
  0x8a   : > { %593 = vmatmul.mubr.bf16.gmra.mrb[8].mxu0 %v381_v35  ;;  %v981_v35 = vlaneseq }
  0x8b   : > { %600 = vmatprep.mubr.bf16.mxu0 %v384_v36  ;;  %v13849_v36 = vmov 0  }
  0x8c   : > { %v756_v37 = vrot.slane %v13849_v36, 7  ;;  %v11279_v40 = vshrl.u32 %v981_v35, 7 }
  0x8e   : > { %13875 = vst [vmem:[#allocation12_spill] sm:$0xff] %v11279_v40  ;;  %v11286_v45 = vsub.s32 %v980_v39, %v11279_v40  ;;  %v926_v5 = vsel %vm11275_vm2, %v756_v37, 0  ;;  %v10644_v39 = vld [vmem:[#allocation6 + $0x28] sm:$0xff]  }
  0x90   : > { %13876 = vst [vmem:[#allocation13_spill] sm:$0xff] %v11286_v45  ;;  %v1032_v16 = vrot.slane %v926_v5, %v11286_v45 }
  0x92   : > { %601 = vmatmul.mubr.bf16.gmra.mrb[12].mxu0 %v383_v41  ;;  %v909_v41 = vsel %vm11275_vm2, 0, %v756_v37  ;;  %v11322_v23 = vrot.slane %v1032_v16, %v11286_v45  ;;  %v10643_v37 = vld [vmem:[#allocation6 + $0x20] sm:$0xff]  }
  0x93   : > { %608 = vmatprep.mubr.bf16.mxu0 %v386_v42  ;;  %v365_v42 = vld [vmem:[%s11162_s11 + $0x1a0] sm:$0xff]  ;;  %v977_v44 = vcombine.high %v909_v41, %v909_v41  ;;  %9869 = vmatprep.subr.bf16.mxu0 %v10643_v37 }
  0x94   : > { %v403_v50 = vpack.c.bf16 %v367_v43, %v365_v42  ;;  %9870 = vmatpush3.bf16.msra.mxu0 %v10643_v37  ;;  %v10648_v42 = vld [vmem:[#allocation6 + $0x38] sm:$0xff]  }
  0x95   : > { %v991_v49 = vrot.slane %v977_v44, %v11286_v45  ;;  %9871 = vmatprep.subr.bf16.mxu0 %v10644_v39  ;;  %v11339_v44 = vld [vmem:[%s13842_s4] ss:$0 sm:$0xff] }
  0x97   : > { %v1007_v55 = vrot.slane %v991_v49, %v11286_v45 }
  0x98   : > { %9872 = vmatpush3.bf16.msra.mxu0 %v10644_v39 }
  0x99   : > { %v1023_v61 = vcombine.high %v1007_v55, %v1007_v55 }
  0x9a   : > { %609 = vmatmul.mubr.bf16.gmra.mrb[16].mxu0 %v385_v47  ;;  %v372_v47 = vld [vmem:[%s11162_s11 + $0x1d8] sm:$0xff] }
  0x9b   : > { %616 = vmatprep.mubr.bf16.mxu0 %v388_v48  ;;  %v984_v48 = vrot.slane %v909_v41, %v11286_v45  ;;  %v406_v51 = vpack.c.bf16 %v372_v47, %v370_v46  ;;  %v2072_v9 = vcombine.low %v1007_v55, %v1023_v61  ;;  %v10645_v41 = vld [vmem:[#allocation6 + $0x30] sm:$0xff]  }
  0x9c   : > { %9873 = vmatprep.subr.bf16.mxu0 %v10645_v41 }
  0x9d   : > { %v992_v52 = vcombine.high %v984_v48, %v984_v48  ;;  %9874 = vmatpush3.bf16.msra.mxu0 %v10645_v41 }
  0x9e   : > { %9875 = vmatprep.subr.bf16.mxu0 %v10648_v42 }
  0x9f   : > { %v11295_v56 = vrot.slane %v992_v52, %v11286_v45 }
  0xa1   : > { %v1024_v0 = vcombine.high %v11295_v56, %v11295_v56  ;;  %v2993_v28 = vcombine.low %v11322_v23, %v11295_v56  ;;  %9876 = vmatpush3.bf16.msra.mxu0 %v10648_v42 }
  0xa2   : > { %617 = vmatmul.mubr.bf16.gmra.mrb[20].mxu0 %v387_v53  ;;  %v993_v53 = vcombine.high %v991_v49, %v991_v49 }
  0xa3   : > { %624 = vmatprep.mubr.bf16.mxu0 %v390_v54  ;;  %v1000_v54 = vrot.slane %v984_v48, %v11286_v45 }
  0xa4   : > { %v1021_v57 = vrot.slane %v993_v53, %v11286_v45 }
  0xa5   : > { %v1022_v58 = vcombine.high %v1000_v54, %v1000_v54 }
  0xa7   : > { %v2048_v6 = vcombine.low %v1000_v54, %v1022_v58 }
  0xaa   : > { %625 = vmatmul.mubr.bf16.gmra.mrb[24].mxu0 %v389_v59  ;;  %v10973_v59 = vmov 1935823168  }
  0xab   : > { %632 = vmatprep.mubr.bf16.mxu0 %v392_v60  ;;  %v2051_v60 = vunpack.c.l.s4 %v10973_v59 }
  0xb2   : > { %633 = vmatmul.mubr.bf16.gmra.mrb[28].mxu0 %v391_v1  ;;  %v1025_v1 = vcombine.high %v1021_v57, %v1021_v57 }
  0xb3   : > { %640 = vmatprep.mubr.bf16.mxu0 %v394_v2  ;;  %v2052_v2 = vunpack.c.0.s8 %v2051_v60 }
  0xb4   : > { %v2073_v11 = vcombine.low %v1021_v57, %v1025_v1  ;;  %v2992_v27 = vcombine.low %v1025_v1, %v1000_v54 }
  0xba   : > { %641 = vmatmul.mubr.bf16.gmra.mrb[32].mxu0 %v393_v7  ;;  %v2049_v7 = vcombine.low %v11295_v56, %v1024_v0 }
  0xbb   : > { %648 = vmatprep.mubr.bf16.mxu0 %v396_v8  ;;  %v11308_v8 = vsub.s32 %v2052_v2, %v11279_v40 }
  0xbd   : > { %v2080_v15 = vrot.slane %v2072_v9, %v11308_v8  ;;  %v2087_v17 = vrot.slane %v2073_v11, %v11308_v8  ;;  %v3000_v30 = vrot.slane %v2992_v27, %v11308_v8 }
  0xbf   : > { %v2088_v21 = vcombine.low %v2080_v15, %v2087_v17 }
  0xc1   : > { %v2095_v24 = vrot.slane %v2088_v21, %v11308_v8 }
  0xc2   : > { %649 = vmatmul.mubr.bf16.gmra.mrb[36].mxu0 %v395_v13  ;;  %v11311_v13 = vrot.slane %v2048_v6, %v11308_v8 }
  0xc3   : > { %656 = vmatprep.mubr.bf16.mxu0 %v398_v14  ;;  %v2063_v14 = vrot.slane %v2049_v7, %v11308_v8  ;;  %3100 = vst.msk [vmem:[#allocation2 + $0x4] sm:$0xf] %vm3098_vm3, %v2095_v24 }
  0xc5   : > { %v2064_v18 = vcombine.low %v11311_v13, %v2063_v14 }
  0xc7   : > { %v2071_v22 = vrot.slane %v2064_v18, %v11308_v8 }
  0xc9   : > { %3099 = vst.msk [vmem:[#allocation2] sm:$0xf] %vm3098_vm3, %v2071_v22 }
  0xca   : > { %657 = vmatmul.mubr.bf16.gmra.mrb[40].mxu0 %v397_v19  ;;  %v373_v19 = vld [vmem:[%s11162_s11 + $0x1e0] sm:$0xff]  ;;  %v3144_v54 = vld [vmem:[#allocation2 + $0x4] sm:$0xf] }
  0xcb   : > { %664 = vmatprep.mubr.bf16.mxu0 %v400_v20  ;;  %v375_v20 = vld [vmem:[%s11162_s11 + $0x1f0] sm:$0xff] }
  0xd0   : > { %v3143_v53 = vld [vmem:[#allocation2] sm:$0xf] }
  0xd1   : > { %v11343_v60 = vcombine.low %v3143_v53, %v3144_v54 }
  0xd2   : > { %665 = vmatmul.mubr.bf16.gmra.mrb[44].mxu0 %v399_v25  ;;  %v407_v25 = vpack.c.bf16 %v375_v20, %v373_v19 }
  0xd3   : > { %672 = vmatprep.mubr.bf16.mxu0 %v402_v26  ;;  %v2976_v26 = vcombine.low %v1024_v0, %v1021_v57  ;;  %v3294_v4 = vshll.u32 %v11343_v60, 16  ;;  %v3292_v16 = vshrl.u32 %v11343_v60, 16 }
  0xd5   : > { %v2983_v29 = vrot.slane %v2976_v26, %v11308_v8  ;;  %v3296_v17 = vrot.slane %v3294_v4, 1 }
  0xda   : > { %673 = vmatmul.mubr.bf16.gmra.mrb[48].mxu0 %v401_v31  ;;  %v3007_v31 = vrot.slane %v2993_v28, %v11308_v8 }
  0xdb   : > { %680 = vmatprep.mubr.bf16.mxu0 %v404_v32  ;;  %v2984_v32 = vcombine.low %v2983_v29, %v2080_v15 }
  0xdc   : > { %v3008_v33 = vcombine.low %v3000_v30, %v3007_v31 }
  0xdd   : > { %v2991_v34 = vrot.slane %v2984_v32, %v11308_v8 }
  0xde   : > { %v3015_v35 = vrot.slane %v3008_v33, %v11308_v8  ;;  %v11360_v33 = vor.u32 %v3296_v17, %v3292_v16 }
  0xdf   : > { %3138 = vst.msk [vmem:[#allocation2 + $0x9c] sm:$0xf] %vm3098_vm3, %v2991_v34 }
  0xe0   : > { %3139 = vst.msk [vmem:[#allocation2 + $0xa0] sm:$0xf] %vm3098_vm3, %v3015_v35 }
  0xe2   : > { %681 = vmatmul.mubr.bf16.gmra.mrb[52].mxu0 %v403_v50 }
  0xe3   : > { %688 = vmatprep.mubr.bf16.mxu0 %v406_v51 }
  0xea   : > { %689 = vmatmul.mubr.bf16.gmra.mrb[56].mxu0 %v405_v10 }
  0xeb   : > { %696 = vmatprep.mubr.bf16.mxu0 %v408_v12 }
  0xf2   : > { %697 = vmatmul.mubr.bf16.gmra.mrb[60].mxu0 %v407_v25 }
 0x14d   : > { %v9575_v43 = vpop.f32.mrb[0].mxu0 }
 0x14e   : > { %v9576_v46 = vpop.f32.mrb[1].mxu0 }
 0x14f   : > { %v9577_v47 = vadd.f32 %v9576_v46, %v9575_v43  ;;  %v9578_v48 = vpop.f32.mrb[2].mxu0 }
 0x150   : > { %v9579_v49 = vpop.f32.mrb[3].mxu0 }
 0x151   : > { %v579_v50 = vadd.f32 %v9577_v47, %v11339_v44  ;;  %v9580_v51 = vadd.f32 %v9579_v49, %v9578_v48 }
 0x153   : > { %v582_v52 = vadd.f32 %v9580_v51, %v11339_v44  ;;  %v705_v55 = vmax.f32 %v579_v50, 0.0 }
 0x155   : > { %v706_v57 = vmax.f32 %v582_v52, 0.0  ;;  %v9581_v58 = vpop.f32.mrb[4].mxu0 }
 0x156   : > { %v9582_v59 = vpop.f32.mrb[5].mxu0 }
 0x157   : > { %v737_v61 = vpack.c.bf16 %v706_v57, %v705_v55  ;;  %v9583_v62 = vadd.f32 %v9582_v59, %v9581_v58  ;;  %v9584_v63 = vpop.f32.mrb[6].mxu0 }
 0x158   : > { %v9585_v0 = vpop.f32.mrb[7].mxu0 }
 0x159   : > { %v761_v1 = vshrl.u32 %v737_v61, 16  ;;  %v587_v2 = vadd.f32 %v9583_v62, %v11339_v44  ;;  %v9586_v3 = vadd.f32 %v9585_v0, %v9584_v63  ;;  %v764_v6 = vshll.u32 %v737_v61, 16 }
 0x15b   : > { %v763_v5 = vrot.slane %v761_v1, 7  ;;  %v590_v7 = vadd.f32 %v9586_v3, %v11339_v44  ;;  %v707_v11 = vmax.f32 %v587_v2, 0.0 }
 0x15d   : > { %v766_v9 = vor.u32 %v764_v6, %v763_v5  ;;  %v927_v10 = vsel %vm11275_vm2, %v763_v5, 0  ;;  %v708_v12 = vmax.f32 %v590_v7, 0.0  ;;  %v9587_v14 = vpop.f32.mrb[8].mxu0 }
 0x15e   : > { %v9588_v15 = vpop.f32.mrb[9].mxu0  ;;  %v11354_v19 = vrot.slane %v927_v10, %v11286_v45 }
 0x15f   : > { %v910_v18 = vsel %vm11275_vm2, 0, %v766_v9  ;;  %v738_v20 = vpack.c.bf16 %v708_v12, %v707_v11  ;;  %v9589_v21 = vadd.f32 %v9588_v15, %v9587_v14  ;;  %v9590_v22 = vpop.f32.mrb[10].mxu0 }
 0x160   : > { %v1040_v24 = vcombine.high %v910_v18, %v910_v18  ;;  %v1047_v25 = vrot.slane %v910_v18, %v11286_v45  ;;  %v9591_v26 = vpop.f32.mrb[11].mxu0  ;;  %v1102_v34 = vrot.slane %v11354_v19, %v11286_v45 }
 0x161   : > { %v768_v27 = vshrl.u32 %v738_v20, 16  ;;  %v595_v28 = vadd.f32 %v9589_v21, %v11339_v44  ;;  %v9592_v29 = vadd.f32 %v9591_v26, %v9590_v22  ;;  %v771_v37 = vshll.u32 %v738_v20, 16 }
 0x162   : > { %v1054_v30 = vrot.slane %v1040_v24, %v11286_v45  ;;  %v1055_v31 = vcombine.high %v1047_v25, %v1047_v25  ;;  %v1063_v32 = vrot.slane %v1047_v25, %v11286_v45 }
 0x163   : > { %v770_v35 = vrot.slane %v768_v27, 7  ;;  %v598_v39 = vadd.f32 %v9592_v29, %v11339_v44  ;;  %v709_v49 = vmax.f32 %v595_v28, 0.0 }
 0x164   : > { %v1056_v41 = vcombine.high %v1054_v30, %v1054_v30  ;;  %v1070_v42 = vrot.slane %v1054_v30, %v11286_v45  ;;  %v1077_v43 = vrot.slane %v1055_v31, %v11286_v45  ;;  %v1085_v46 = vcombine.high %v1063_v32, %v1063_v32 }
 0x165   : > { %v773_v47 = vor.u32 %v771_v37, %v770_v35  ;;  %v928_v48 = vsel %vm11275_vm2, %v770_v35, 0  ;;  %v710_v50 = vmax.f32 %v598_v39, 0.0  ;;  %v9593_v51 = vpop.f32.mrb[12].mxu0 }
 0x166   : > { %v1084_v52 = vrot.slane %v1056_v41, %v11286_v45  ;;  %v1086_v53 = vcombine.high %v1070_v42, %v1070_v42  ;;  %v1087_v54 = vcombine.high %v1077_v43, %v1077_v43  ;;  %v2096_v55 = vcombine.low %v11322_v23, %v1077_v43  ;;  %v9594_v57 = vpop.f32.mrb[13].mxu0 }
 0x167   : > { %v2097_v58 = vcombine.low %v1063_v32, %v1085_v46  ;;  %v911_v59 = vsel %vm11275_vm2, 0, %v773_v47  ;;  %v1158_v61 = vrot.slane %v928_v48, %v11286_v45  ;;  %v739_v62 = vpack.c.bf16 %v710_v50, %v709_v49  ;;  %v9596_v63 = vpop.f32.mrb[14].mxu0 }
 0x168   : > { %v2104_v0 = vrot.slane %v2096_v55, %v11308_v8  ;;  %v2120_v1 = vcombine.low %v1087_v54, %v1084_v52  ;;  %v2121_v2 = vcombine.low %v1070_v42, %v1086_v53  ;;  %v1088_v3 = vcombine.high %v1084_v52, %v1084_v52  ;;  %v9597_v4 = vpop.f32.mrb[15].mxu0 }
 0x169   : > { %v2111_v5 = vrot.slane %v2097_v58, %v11308_v8  ;;  %v1103_v6 = vcombine.high %v911_v59, %v911_v59  ;;  %v1110_v23 = vrot.slane %v911_v59, %v11286_v45  ;;  %v1165_v7 = vrot.slane %v1158_v61, %v11286_v45 }
 0x16a   : > { %v2128_v9 = vrot.slane %v2120_v1, %v11308_v8  ;;  %v2135_v10 = vrot.slane %v2121_v2, %v11308_v8  ;;  %v775_v11 = vshrl.u32 %v739_v62, 16  ;;  %v778_v12 = vshll.u32 %v739_v62, 16 }
 0x16b   : > { %v2112_v14 = vcombine.low %v2104_v0, %v2111_v5  ;;  %v1117_v15 = vrot.slane %v1103_v6, %v11286_v45  ;;  %v1118_v16 = vcombine.high %v1110_v23, %v1110_v23  ;;  %v1126_v17 = vrot.slane %v1110_v23, %v11286_v45 }
 0x16c   : > { %v2136_v18 = vcombine.low %v2128_v9, %v2135_v10  ;;  %v777_v19 = vrot.slane %v775_v11, 7  ;;  %v9595_v20 = vadd.f32 %v9594_v57, %v9593_v51  ;;  %v9598_v21 = vadd.f32 %v9597_v4, %v9596_v63 }
 0x16d   : > { %v2119_v22 = vrot.slane %v2112_v14, %v11308_v8  ;;  %v1119_v24 = vcombine.high %v1117_v15, %v1117_v15  ;;  %v1133_v25 = vrot.slane %v1117_v15, %v11286_v45  ;;  %v1140_v26 = vrot.slane %v1118_v16, %v11286_v45  ;;  %v9599_v27 = vpop.f32.mrb[16].mxu0 }
 0x16e   : > { %v2143_v28 = vrot.slane %v2136_v18, %v11308_v8  ;;  %v1148_v29 = vcombine.high %v1126_v17, %v1126_v17  ;;  %v2144_v30 = vcombine.low %v1088_v3, %v1126_v17  ;;  %v780_v31 = vor.u32 %v778_v12, %v777_v19  ;;  %v9600_v32 = vpop.f32.mrb[17].mxu0  ;;  %v11404_v3 = vld [vmem:[#allocation6 + $0x40] sm:$0xff]  }
 0x16f   : > { %3101 = vst.msk [vmem:[#allocation2 + $0x8] sm:$0xf] %vm3098_vm3, %v2119_v22  ;;  %v1147_v35 = vrot.slane %v1119_v24, %v11286_v45  ;;  %v1149_v37 = vcombine.high %v1133_v25, %v1133_v25  ;;  %v1150_v39 = vcombine.high %v1140_v26, %v1140_v26  ;;  %v2145_v41 = vcombine.low %v1102_v34, %v1140_v26  ;;  %v9602_v42 = vpop.f32.mrb[18].mxu0  ;;  %v10659_v26 = vld [vmem:[#allocation6 + $0x48] sm:$0xff]  }
 0x170   : > { %3102 = vst.msk [vmem:[#allocation2 + $0xc] sm:$0xf] %vm3098_vm3, %v2143_v28  ;;  %v2152_v43 = vrot.slane %v2144_v30, %v11308_v8  ;;  %v2168_v46 = vcombine.low %v1148_v29, %v1133_v25  ;;  %v912_v47 = vsel %vm11275_vm2, 0, %v780_v31  ;;  %v929_v48 = vsel %vm11275_vm2, %v777_v19, 0  ;;  %v9603_v49 = vpop.f32.mrb[19].mxu0  ;;  %10265 = vmatprep.subr.bf16.mxu1 %v11404_v3 }
 0x171   : > { %v2159_v50 = vrot.slane %v2145_v41, %v11308_v8  ;;  %v2169_v51 = vcombine.low %v1150_v39, %v1147_v35  ;;  %v2192_v52 = vcombine.low %v1149_v37, %v1165_v7  ;;  %v1151_v53 = vcombine.high %v1147_v35, %v1147_v35  ;;  %10269 = vmatpush3.bf16.msra.mxu1 %v11404_v3 }
 0x172   : > { %v2176_v34 = vrot.slane %v2168_v46, %v11308_v8  ;;  %v1166_v54 = vcombine.high %v912_v47, %v912_v47  ;;  %v1173_v55 = vrot.slane %v912_v47, %v11286_v45  ;;  %v1221_v57 = vrot.slane %v929_v48, %v11286_v45  ;;  %10266 = vmatprep.subr.bf16.mxu1 %v10659_v26 }
 0x173   : > { %v2160_v58 = vcombine.low %v2152_v43, %v2159_v50  ;;  %v2183_v59 = vrot.slane %v2169_v51, %v11308_v8  ;;  %v2200_v61 = vrot.slane %v2192_v52, %v11308_v8  ;;  %v603_v62 = vadd.f32 %v9595_v20, %v11339_v44 }
 0x174   : > { %v1180_v63 = vrot.slane %v1166_v54, %v11286_v45  ;;  %v1181_v0 = vcombine.high %v1173_v55, %v1173_v55  ;;  %v1189_v1 = vrot.slane %v1173_v55, %v11286_v45  ;;  %v1228_v2 = vrot.slane %v1221_v57, %v11286_v45 }
 0x175   : > { %v2167_v4 = vrot.slane %v2160_v58, %v11308_v8  ;;  %v2184_v5 = vcombine.low %v2176_v34, %v2183_v59  ;;  %v711_v6 = vmax.f32 %v603_v62, 0.0  ;;  %v606_v23 = vadd.f32 %v9598_v21, %v11339_v44  ;;  %v9605_v7 = vpop.f32.mrb[20].mxu0  ;;  %10270 = vmatpush3.bf16.msra.mxu1 %v10659_v26 }
 0x176   : > { %v1182_v9 = vcombine.high %v1180_v63, %v1180_v63  ;;  %v1196_v10 = vrot.slane %v1180_v63, %v11286_v45  ;;  %v1203_v11 = vrot.slane %v1181_v0, %v11286_v45  ;;  %v1211_v12 = vcombine.high %v1189_v1, %v1189_v1  ;;  %v9606_v14 = vpop.f32.mrb[21].mxu0 }
 0x177   : > { %v2191_v15 = vrot.slane %v2184_v5, %v11308_v8  ;;  %3103 = vst.msk [vmem:[#allocation2 + $0x10] sm:$0xf] %vm3098_vm3, %v2167_v4  ;;  %v2193_v16 = vcombine.low %v1151_v53, %v1189_v1  ;;  %v712_v17 = vmax.f32 %v606_v23, 0.0  ;;  %v9601_v18 = vadd.f32 %v9600_v32, %v9599_v27  ;;  %v9608_v19 = vpop.f32.mrb[22].mxu0  ;;  %v11419_v39 = vld [vmem:[#allocation2 + $0x8] sm:$0xff]  }
 0x178   : > { %v1210_v20 = vrot.slane %v1182_v9, %v11286_v45  ;;  %v1212_v21 = vcombine.high %v1196_v10, %v1196_v10  ;;  %v1213_v22 = vcombine.high %v1203_v11, %v1203_v11  ;;  %v2217_v24 = vcombine.low %v1211_v12, %v1196_v10  ;;  %v9609_v25 = vpop.f32.mrb[23].mxu0 }
 0x179   : > { %3104 = vst.msk [vmem:[#allocation2 + $0x14] sm:$0xf] %vm3098_vm3, %v2191_v15  ;;  %v2207_v28 = vrot.slane %v2193_v16, %v11308_v8  ;;  %v740_v29 = vpack.c.bf16 %v712_v17, %v711_v6  ;;  %v611_v30 = vadd.f32 %v9601_v18, %v11339_v44  ;;  %v9604_v31 = vadd.f32 %v9603_v49, %v9602_v42  ;;  %v10660_v49 = vld [vmem:[#allocation6 + $0x50] sm:$0xff]  }
 0x17a   : > { %v1214_v35 = vcombine.high %v1210_v20, %v1210_v20  ;;  %v2216_v27 = vcombine.low %v1203_v11, %v1213_v22  ;;  %v2231_v32 = vrot.slane %v2217_v24, %v11308_v8  ;;  %v2241_v37 = vcombine.low %v1212_v21, %v1228_v2  ;;  %10267 = vmatprep.subr.bf16.mxu1 %v10660_v49 }
 0x17b   : > { %v2208_v41 = vcombine.low %v2200_v61, %v2207_v28  ;;  %v782_v43 = vshrl.u32 %v740_v29, 16  ;;  %v785_v46 = vshll.u32 %v740_v29, 16  ;;  %v713_v47 = vmax.f32 %v611_v30, 0.0  ;;  %10271 = vmatpush3.bf16.msra.mxu1 %v10660_v49 }
 0x17c   : > { %v2224_v48 = vrot.slane %v2216_v27, %v11308_v8  ;;  %v2240_v50 = vcombine.low %v1210_v20, %v1214_v35  ;;  %v2255_v51 = vrot.slane %v2241_v37, %v11308_v8  ;;  %v614_v42 = vadd.f32 %v9604_v31, %v11339_v44  ;;  %v10662_v27 = vld [vmem:[#allocation6 + $0x58] sm:$0xff]  }
 0x17d   : > { %v2215_v52 = vrot.slane %v2208_v41, %v11308_v8  ;;  %v784_v53 = vrot.slane %v782_v43, 7  ;;  %v9607_v34 = vadd.f32 %v9606_v14, %v9605_v7  ;;  %v9610_v54 = vadd.f32 %v9609_v25, %v9608_v19  ;;  %v9611_v55 = vpop.f32.mrb[24].mxu0  ;;  %10268 = vmatprep.subr.bf16.mxu1 %v10662_v27 }
 0x17e   : > { %v2232_v57 = vcombine.low %v2224_v48, %v2231_v32  ;;  %v2248_v58 = vrot.slane %v2240_v50, %v11308_v8  ;;  %v714_v59 = vmax.f32 %v614_v42, 0.0  ;;  %v9612_v61 = vpop.f32.mrb[25].mxu0  ;;  %v3299_v62 = vshll.u32 %v11419_v39, 16 }
 0x17f   : > { %3105 = vst.msk [vmem:[#allocation2 + $0x18] sm:$0xf] %vm3098_vm3, %v2215_v52  ;;  %v787_v63 = vor.u32 %v785_v46, %v784_v53  ;;  %v930_v0 = vsel %vm11275_vm2, %v784_v53, 0  ;;  %v619_v1 = vadd.f32 %v9607_v34, %v11339_v44  ;;  %v622_v2 = vadd.f32 %v9610_v54, %v11339_v44  ;;  %v11432_v4 = vpop.f32.mrb[26].mxu0  ;;  %10272 = vmatpush3.bf16.msra.mxu1 %v10662_v27 }
 0x180   : > { %v2239_v5 = vrot.slane %v2232_v57, %v11308_v8  ;;  %v2256_v6 = vcombine.low %v2248_v58, %v2255_v51  ;;  %v11436_v23 = vrot.slane %v930_v0, %v11286_v45  ;;  %v741_v7 = vpack.c.bf16 %v714_v59, %v713_v47  ;;  %v11438_v9 = vpop.f32.mrb[27].mxu0 }
 0x181   : > { %v913_v10 = vsel %vm11275_vm2, 0, %v787_v63  ;;  %v715_v11 = vmax.f32 %v619_v1, 0.0  ;;  %v716_v12 = vmax.f32 %v622_v2, 0.0  ;;  %v9613_v14 = vadd.f32 %v9612_v61, %v9611_v55 }
 0x182   : > { %v2263_v15 = vrot.slane %v2256_v6, %v11308_v8  ;;  %3106 = vst.msk [vmem:[#allocation2 + $0x1c] sm:$0xf] %vm3098_vm3, %v2239_v5  ;;  %v1229_v16 = vcombine.high %v913_v10, %v913_v10  ;;  %v1236_v17 = vrot.slane %v913_v10, %v11286_v45  ;;  %v1291_v18 = vrot.slane %v11436_v23, %v11286_v45 }
 0x183   : > { %v789_v19 = vshrl.u32 %v741_v7, 16  ;;  %v792_v20 = vshll.u32 %v741_v7, 16  ;;  %v742_v21 = vpack.c.bf16 %v716_v12, %v715_v11  ;;  %v11450_v26 = vrot.slane %v3299_v62, 1 }
 0x184   : > { %3107 = vst.msk [vmem:[#allocation2 + $0x20] sm:$0xf] %vm3098_vm3, %v2263_v15  ;;  %v1243_v22 = vrot.slane %v1229_v16, %v11286_v45  ;;  %v1244_v24 = vcombine.high %v1236_v17, %v1236_v17  ;;  %v1252_v25 = vrot.slane %v1236_v17, %v11286_v45  ;;  %v11453_v31 = vadd.f32 %v9613_v14, %v11339_v44 }
 0x185   : > { %v791_v28 = vrot.slane %v789_v19, 7  ;;  %v796_v29 = vshrl.u32 %v742_v21, 16  ;;  %v799_v30 = vshll.u32 %v742_v21, 16  ;;  %v11455_v35 = vpop.f32.mrb[28].mxu0  ;;  %v3302_v51 = vsel %vm3290_vm4, %v11360_v33, %v11450_v26 }
 0x186   : > { %v1245_v32 = vcombine.high %v1243_v22, %v1243_v22  ;;  %v1259_v37 = vrot.slane %v1243_v22, %v11286_v45  ;;  %v1266_v41 = vrot.slane %v1244_v24, %v11286_v45  ;;  %v1274_v43 = vcombine.high %v1252_v25, %v1252_v25  ;;  %v11459_v46 = vpop.f32.mrb[29].mxu0  ;;  %9877 = vmatprep.mubr.msk.bf16.mxu0 %vm3463_vm5, %v3302_v51 }
 0x187   : > { %v794_v47 = vor.u32 %v792_v20, %v791_v28  ;;  %v931_v48 = vsel %vm11275_vm2, %v791_v28, 0  ;;  %v798_v50 = vrot.slane %v796_v29, 7  ;;  %v11466_v42 = vpop.f32.mrb[30].mxu0 }
 0x188   : > { %v1273_v49 = vrot.slane %v1245_v32, %v11286_v45  ;;  %v1275_v52 = vcombine.high %v1259_v37, %v1259_v37  ;;  %v1276_v53 = vcombine.high %v1266_v41, %v1266_v41  ;;  %v2264_v34 = vcombine.low %v1252_v25, %v1274_v43  ;;  %v11470_v54 = vpop.f32.mrb[31].mxu0 }
 0x189   : > { %v914_v55 = vsel %vm11275_vm2, 0, %v794_v47  ;;  %v11475_v57 = vrot.slane %v931_v48, %v11286_v45  ;;  %v801_v58 = vor.u32 %v799_v30, %v798_v50  ;;  %v932_v33 = vsel %vm11275_vm2, %v798_v50, 0 }
 0x18a   : > { %v1277_v59 = vcombine.high %v1273_v49, %v1273_v49  ;;  %v2265_v61 = vcombine.low %v1266_v41, %v1276_v53  ;;  %v2272_v62 = vrot.slane %v2264_v34, %v11308_v8  ;;  %v2288_v63 = vcombine.low %v1259_v37, %v1275_v52 }
 0x18b   : > { %v1292_v0 = vcombine.high %v914_v55, %v914_v55  ;;  %v1299_v1 = vrot.slane %v914_v55, %v11286_v45  ;;  %v1354_v2 = vrot.slane %v11475_v57, %v11286_v45  ;;  %v915_v5 = vsel %vm11275_vm2, 0, %v801_v58 }
 0x18c   : > { %v2279_v6 = vrot.slane %v2265_v61, %v11308_v8  ;;  %v2289_v7 = vcombine.low %v1273_v49, %v1277_v59  ;;  %v2296_v10 = vrot.slane %v2288_v63, %v11308_v8  ;;  %v1355_v11 = vcombine.high %v915_v5, %v915_v5 }
 0x18d   : > { %v1306_v12 = vrot.slane %v1292_v0, %v11286_v45  ;;  %v1307_v14 = vcombine.high %v1299_v1, %v1299_v1  ;;  %v1315_v15 = vrot.slane %v1299_v1, %v11286_v45  ;;  %v1362_v16 = vrot.slane %v915_v5, %v11286_v45  ;;  %v11490_v17 = vpop.f32.mrb[32].mxu0 }
 0x18e   : > { %v2280_v19 = vcombine.low %v2272_v62, %v2279_v6  ;;  %v2303_v20 = vrot.slane %v2289_v7, %v11308_v8  ;;  %v1369_v21 = vrot.slane %v1355_v11, %v11286_v45  ;;  %v1410_v22 = vrot.slane %v932_v33, %v11286_v45  ;;  %v11495_v24 = vpop.f32.mrb[33].mxu0 }
 0x18f   : > { %v1308_v25 = vcombine.high %v1306_v12, %v1306_v12  ;;  %v1322_v28 = vrot.slane %v1306_v12, %v11286_v45  ;;  %v1329_v29 = vrot.slane %v1307_v14, %v11286_v45  ;;  %v1337_v30 = vcombine.high %v1315_v15, %v1315_v15  ;;  %v11499_v27 = vpop.f32.mrb[34].mxu0 }
 0x190   : > { %v2287_v32 = vrot.slane %v2280_v19, %v11308_v8  ;;  %v2304_v37 = vcombine.low %v2296_v10, %v2303_v20  ;;  %v1370_v41 = vcombine.high %v1362_v16, %v1362_v16  ;;  %v1371_v43 = vcombine.high %v1369_v21, %v1369_v21  ;;  %v11502_v47 = vpop.f32.mrb[35].mxu0 }
 0x191   : > { %v1336_v48 = vrot.slane %v1308_v25, %v11286_v45  ;;  %v1338_v50 = vcombine.high %v1322_v28, %v1322_v28  ;;  %v1339_v51 = vcombine.high %v1329_v29, %v1329_v29  ;;  %v2312_v49 = vcombine.low %v1291_v18, %v1329_v29 }
 0x192   : > { %v2311_v52 = vrot.slane %v2304_v37, %v11308_v8  ;;  %3108 = vst.msk [vmem:[#allocation2 + $0x24] sm:$0xf] %vm3098_vm3, %v2287_v32  ;;  %v2313_v53 = vcombine.low %v1315_v15, %v1337_v30  ;;  %v1378_v34 = vrot.slane %v1362_v16, %v11286_v45  ;;  %v1385_v55 = vrot.slane %v1369_v21, %v11286_v45  ;;  %v10649_v21 = vld [vmem:[#allocation2 + $0x10] sm:$0xff]  }
 0x193   : > { %v2320_v57 = vrot.slane %v2312_v49, %v11308_v8  ;;  %v2336_v58 = vcombine.low %v1339_v51, %v1336_v48  ;;  %v2337_v33 = vcombine.low %v1322_v28, %v1338_v50  ;;  %v1340_v59 = vcombine.high %v1336_v48, %v1336_v48  ;;  %v10650_v49 = vld [vmem:[#allocation2 + $0x18] sm:$0xff]  }
 0x194   : > { %3109 = vst.msk [vmem:[#allocation2 + $0x28] sm:$0xf] %vm3098_vm3, %v2311_v52  ;;  %v2327_v61 = vrot.slane %v2313_v53, %v11308_v8  ;;  %v1392_v23 = vrot.slane %v1370_v41, %v11286_v45  ;;  %v11517_v18 = vrot.slane %v1371_v43, %v11286_v45  ;;  %v1400_v62 = vcombine.high %v1378_v34, %v1378_v34 }
 0x195   : > { %v2344_v63 = vrot.slane %v2336_v58, %v11308_v8  ;;  %v2351_v0 = vrot.slane %v2337_v33, %v11308_v8  ;;  %v1401_v1 = vcombine.high %v1385_v55, %v1385_v55  ;;  %v1417_v5 = vrot.slane %v1410_v22, %v11286_v45  ;;  %v11522_v6 = vpop.f32.mrb[36].mxu0 }
 0x196   : > { %v2328_v7 = vcombine.low %v2320_v57, %v2327_v61  ;;  %v1402_v10 = vcombine.high %v1392_v23, %v1392_v23  ;;  %v2360_v11 = vcombine.low %v1340_v59, %v1378_v34  ;;  %v2361_v12 = vcombine.low %v1354_v2, %v1392_v23  ;;  %v9630_v14 = vpop.f32.mrb[37].mxu0 }
 0x197   : > { %v2352_v15 = vcombine.low %v2344_v63, %v2351_v0  ;;  %v2384_v16 = vcombine.low %v1400_v62, %v1385_v55  ;;  %v11524_v19 = vcombine.low %v1401_v1, %v1417_v5  ;;  %v3303_v20 = vshrl.u32 %v11419_v39, 16  ;;  %v11527_v25 = vpop.f32.mrb[38].mxu0  ;;  %v10666_v5 = vld [vmem:[#allocation6 + $0x60] sm:$0xff]  }
 0x198   : > { %v2335_v28 = vrot.slane %v2328_v7, %v11308_v8  ;;  %v2368_v22 = vrot.slane %v2360_v11, %v11308_v8  ;;  %v2375_v29 = vrot.slane %v2361_v12, %v11308_v8  ;;  %v2385_v30 = vcombine.low %v1402_v10, %v11517_v18  ;;  %v11533_v32 = vpop.f32.mrb[39].mxu0  ;;  %10001 = vmatprep.subr.bf16.mxu1 %v10666_v5 }
 0x199   : > { %v2359_v2 = vrot.slane %v2352_v15, %v11308_v8  ;;  %v2392_v37 = vrot.slane %v2384_v16, %v11308_v8  ;;  %v2416_v39 = vrot.slane %v11524_v19, %v11308_v8  ;;  %v717_v41 = vmax.f32 %v11453_v31, 0.0  ;;  %v10673_v15 = vld [vmem:[#allocation6 + $0x8] sm:$0xff]  }
 0x19a   : > { %3110 = vst.msk [vmem:[#allocation2 + $0x2c] sm:$0xf] %vm3098_vm3, %v2335_v28  ;;  %v2376_v43 = vcombine.low %v2368_v22, %v2375_v29  ;;  %v2399_v48 = vrot.slane %v2385_v30, %v11308_v8  ;;  %v3305_v50 = vor.u32 %v3303_v20, %v11450_v26  ;;  %v9616_v51 = vadd.f32 %v11438_v9, %v11432_v4 }
 0x19b   : > { %3111 = vst.msk [vmem:[#allocation2 + $0x30] sm:$0xf] %vm3098_vm3, %v2359_v2  ;;  %v9619_v52 = vadd.f32 %v11459_v46, %v11455_v35  ;;  %v3307_v53 = vshll.u32 %v10649_v21, 16  ;;  %v9622_v31 = vadd.f32 %v11470_v54, %v11466_v42  ;;  %v9625_v34 = vadd.f32 %v11495_v24, %v11490_v17  ;;  %v11557_v46 = vld [vmem:[#allocation2 + $0x20] sm:$0xff]  }
 0x19c   : > { %v2383_v55 = vrot.slane %v2376_v43, %v11308_v8  ;;  %v2400_v57 = vcombine.low %v2392_v37, %v2399_v48  ;;  %v630_v26 = vadd.f32 %v9616_v51, %v11339_v44  ;;  %v3311_v58 = vshrl.u32 %v10649_v21, 16 }
 0x19d   : > { %v635_v4 = vadd.f32 %v9619_v52, %v11339_v44  ;;  %v3309_v9 = vrot.slane %v3307_v53, 1  ;;  %v638_v33 = vadd.f32 %v9622_v31, %v11339_v44  ;;  %v643_v35 = vadd.f32 %v9625_v34, %v11339_v44  ;;  %v11559_v59 = vpop.f32.mrb[40].mxu0 }
 0x19e   : > { %v2407_v42 = vrot.slane %v2400_v57, %v11308_v8  ;;  %3112 = vst.msk [vmem:[#allocation2 + $0x34] sm:$0xf] %vm3098_vm3, %v2383_v55  ;;  %v718_v54 = vmax.f32 %v630_v26, 0.0  ;;  %v3315_v17 = vshll.u32 %v10650_v49, 16  ;;  %v9628_v24 = vadd.f32 %v11502_v47, %v11499_v27  ;;  %v11565_v61 = vpop.f32.mrb[41].mxu0  ;;  %v10671_v47 = vld [vmem:[#allocation6] sm:$0xff]  }
 0x19f   : > { %v719_v23 = vmax.f32 %v635_v4, 0.0  ;;  %v3310_v62 = vsel %vm3290_vm4, %v3305_v50, %v3309_v9  ;;  %v720_v63 = vmax.f32 %v638_v33, 0.0  ;;  %v721_v0 = vmax.f32 %v643_v35, 0.0  ;;  %v11568_v1 = vpop.f32.mrb[42].mxu0  ;;  %9913 = vmatprep.subr.bf16.mxu0 %v10671_v47 }
 0x1a0   : > { %3113 = vst.msk [vmem:[#allocation2 + $0x38] sm:$0xf] %vm3098_vm3, %v2407_v42  ;;  %v743_v7 = vpack.c.bf16 %v718_v54, %v717_v41  ;;  %9878 = vmatmul.mubr.msk.bf16.vlgmr.msra.gmra.mrb[64].mxu0 %vm3463_vm5, %v3310_v62  ;;  %v3313_v10 = vor.u32 %v3311_v58, %v3309_v9  ;;  %v3317_v11 = vrot.slane %v3315_v17, 1  ;;  %v646_v12 = vadd.f32 %v9628_v24, %v11339_v44  ;;  %v11573_v27 = vpop.f32.mrb[43].mxu0 }
 0x1a1   : > { %v744_v16 = vpack.c.bf16 %v720_v63, %v719_v23  ;;  %v9631_v20 = vadd.f32 %v9630_v14, %v11522_v6  ;;  %v3319_v21 = vshrl.u32 %v10650_v49, 16  ;;  %v3323_v28 = vshll.u32 %v11557_v46, 16  ;;  %v11578_v37 = vld [vmem:[#allocation2 + $0x28] sm:$0xff]   ;;  %9914 = vmatpush3.bf16.msra.mxu0 %v10671_v47 }
 0x1a2   : > { %v803_v22 = vshrl.u32 %v743_v7, 16  ;;  %v806_v29 = vshll.u32 %v743_v7, 16  ;;  %v3318_v30 = vsel %vm3290_vm4, %v3313_v10, %v3317_v11  ;;  %v722_v2 = vmax.f32 %v646_v12, 0.0  ;;  %9915 = vmatprep.subr.bf16.mxu0 %v10673_v15 }
 0x1a3   : > { %v1403_v41 = vcombine.high %v11517_v18, %v11517_v18  ;;  %v810_v43 = vshrl.u32 %v744_v16, 16  ;;  %v813_v48 = vshll.u32 %v744_v16, 16  ;;  %9881 = vmatprep.mubr.msk.bf16.mxu0 %vm3463_vm5, %v3318_v30  ;;  %v11584_v6 = vadd.f32 %v9631_v20, %v11339_v44 }
 0x1a4   : > { %v805_v14 = vrot.slane %v803_v22, 7  ;;  %v745_v50 = vpack.c.bf16 %v722_v2, %v721_v0  ;;  %v11586_v51 = vrot.slane %v3323_v28, 1  ;;  %v9634_v49 = vadd.f32 %v11533_v32, %v11527_v25  ;;  %v10679_v28 = vld [vmem:[#allocation6 + $0x18] sm:$0xff]  }
 0x1a5   : > { %v812_v52 = vrot.slane %v810_v43, 7  ;;  %v723_v53 = vmax.f32 %v11584_v6, 0.0  ;;  %v3321_v18 = vor.u32 %v3319_v21, %v3317_v11  ;;  %v3327_v31 = vshrl.u32 %v11557_v46, 16  ;;  %v11592_v34 = vpop.f32.mrb[44].mxu0  ;;  %9916 = vmatpush3.bf16.msra.mxu0 %v10673_v15  ;;  %v10678_v21 = vld [vmem:[#allocation6 + $0x10] sm:$0xff]  }
 0x1a6   : > { %v808_v55 = vor.u32 %v806_v29, %v805_v14  ;;  %v933_v57 = vsel %vm11275_vm2, %v805_v14, 0  ;;  %v817_v26 = vshrl.u32 %v745_v50, 16  ;;  %v3331_v58 = vshll.u32 %v11578_v37, 16  ;;  %v11597_v4 = vpop.f32.mrb[45].mxu0  ;;  %9917 = vmatprep.subr.bf16.mxu0 %v10678_v21 }
 0x1a7   : > { %v1473_v25 = vrot.slane %v933_v57, %v11286_v45  ;;  %v815_v32 = vor.u32 %v813_v48, %v812_v52  ;;  %v934_v9 = vsel %vm11275_vm2, %v812_v52, 0  ;;  %v3326_v33 = vsel %vm3290_vm4, %v3321_v18, %v11586_v51  ;;  %v11604_v35 = vpop.f32.mrb[46].mxu0 }
 0x1a8   : > { %v916_v42 = vsel %vm11275_vm2, 0, %v808_v55  ;;  %v11609_v54 = vrot.slane %v934_v9, %v11286_v45  ;;  %v11611_v17 = vrot.slane %v817_v26, 7  ;;  %v820_v24 = vshll.u32 %v745_v50, 16  ;;  %9882 = vmatmul.mubr.msk.bf16.gmra.mrb[68].mxu0 %vm3463_vm5, %v3326_v33  ;;  %v11614_v23 = vpop.f32.mrb[47].mxu0 }
 0x1a9   : > { %v1418_v62 = vcombine.high %v916_v42, %v916_v42  ;;  %v1425_v63 = vrot.slane %v916_v42, %v11286_v45  ;;  %v917_v0 = vsel %vm11275_vm2, 0, %v815_v32  ;;  %v11620_v5 = vadd.f32 %v9634_v49, %v11339_v44  ;;  %9918 = vmatpush3.bf16.msra.mxu0 %v10678_v21 }
 0x1aa   : > { %v1480_v7 = vrot.slane %v1473_v25, %v11286_v45  ;;  %v1481_v10 = vcombine.high %v917_v0, %v917_v0  ;;  %v1488_v11 = vrot.slane %v917_v0, %v11286_v45  ;;  %v1543_v12 = vrot.slane %v11609_v54, %v11286_v45  ;;  %9919 = vmatprep.subr.bf16.mxu0 %v10679_v28 }
 0x1ab   : > { %v1432_v47 = vrot.slane %v1418_v62, %v11286_v45  ;;  %v1433_v15 = vcombine.high %v1425_v63, %v1425_v63  ;;  %v1441_v16 = vrot.slane %v1425_v63, %v11286_v45  ;;  %v822_v20 = vor.u32 %v820_v24, %v11611_v17 }
 0x1ac   : > { %v1495_v44 = vrot.slane %v1481_v10, %v11286_v45  ;;  %v1496_v22 = vcombine.high %v1488_v11, %v1488_v11  ;;  %v1504_v29 = vrot.slane %v1488_v11, %v11286_v45  ;;  %v935_v30 = vsel %vm11275_vm2, %v11611_v17, 0 }
 0x1ad   : > { %v1434_v2 = vcombine.high %v1432_v47, %v1432_v47  ;;  %v1448_v43 = vrot.slane %v1432_v47, %v11286_v45  ;;  %v1455_v48 = vrot.slane %v1433_v15, %v11286_v45  ;;  %v1463_v14 = vcombine.high %v1441_v16, %v1441_v16  ;;  %v11636_v50 = vpop.f32.mrb[48].mxu0  ;;  %9920 = vmatpush3.bf16.msra.mxu0 %v10679_v28 }
 0x1ae   : > { %v2409_v49 = vcombine.low %v1403_v41, %v1441_v16  ;;  %v1497_v52 = vcombine.high %v1495_v44, %v1495_v44  ;;  %v1511_v18 = vrot.slane %v1495_v44, %v11286_v45  ;;  %v1518_v55 = vrot.slane %v1496_v22, %v11286_v45  ;;  %v11640_v57 = vpop.f32.mrb[49].mxu0  ;;  %9957 = vmatprep.subr.bf16.mxu0 %v11404_v3 }
 0x1af   : > { %v1462_v26 = vrot.slane %v1434_v2, %v11286_v45  ;;  %v1464_v25 = vcombine.high %v1448_v43, %v1448_v43  ;;  %v1465_v32 = vcombine.high %v1455_v48, %v1455_v48  ;;  %v2433_v9 = vcombine.low %v1463_v14, %v1448_v43  ;;  %v11643_v33 = vpop.f32.mrb[50].mxu0 }
 0x1b0   : > { %v2423_v42 = vrot.slane %v2409_v49, %v11308_v8  ;;  %v1525_v41 = vrot.slane %v1497_v52, %v11286_v45  ;;  %v1526_v24 = vcombine.high %v1504_v29, %v1504_v29  ;;  %v1527_v62 = vcombine.high %v1511_v18, %v1511_v18  ;;  %v11647_v63 = vpop.f32.mrb[51].mxu0 }
 0x1b1   : > { %v1466_v0 = vcombine.high %v1462_v26, %v1462_v26  ;;  %v2432_v10 = vcombine.low %v1455_v48, %v1465_v32  ;;  %v2457_v11 = vcombine.low %v1464_v25, %v1480_v7  ;;  %v918_v47 = vsel %vm11275_vm2, 0, %v822_v20 }
 0x1b2   : > { %v2424_v15 = vcombine.low %v2416_v39, %v2423_v42  ;;  %v1528_v16 = vcombine.high %v1518_v55, %v1518_v55  ;;  %v1529_v21 = vcombine.high %v1525_v41, %v1525_v41  ;;  %v2480_v44 = vcombine.low %v1504_v29, %v1526_v24 }
 0x1b3   : > { %v2440_v22 = vrot.slane %v2432_v10, %v11308_v8  ;;  %v2447_v2 = vrot.slane %v2433_v9, %v11308_v8  ;;  %v2456_v43 = vcombine.low %v1462_v26, %v1466_v0  ;;  %v2504_v14 = vcombine.low %v1511_v18, %v1527_v62 }
 0x1b4   : > { %v2431_v7 = vrot.slane %v2424_v15, %v11308_v8  ;;  %v2471_v20 = vrot.slane %v2457_v11, %v11308_v8  ;;  %v2481_v48 = vcombine.low %v1518_v55, %v1528_v16  ;;  %v2505_v49 = vcombine.low %v1525_v41, %v1529_v21 }
 0x1b5   : > { %v2448_v19 = vcombine.low %v2440_v22, %v2447_v2  ;;  %v2464_v39 = vrot.slane %v2456_v43, %v11308_v8  ;;  %v2488_v29 = vrot.slane %v2480_v44, %v11308_v8  ;;  %v1544_v28 = vcombine.high %v918_v47, %v918_v47  ;;  %v11661_v52 = vpop.f32.mrb[52].mxu0 }
 0x1b6   : > { %3114 = vst.msk [vmem:[#allocation2 + $0x3c] sm:$0xf] %vm3098_vm3, %v2431_v7  ;;  %v2495_v18 = vrot.slane %v2481_v48, %v11308_v8  ;;  %v2512_v3 = vrot.slane %v2504_v14, %v11308_v8  ;;  %v2519_v26 = vrot.slane %v2505_v49, %v11308_v8  ;;  %v1551_v25 = vrot.slane %v918_v47, %v11286_v45  ;;  %v11668_v55 = vpop.f32.mrb[53].mxu0 }
 0x1b7   : > { %v2455_v32 = vrot.slane %v2448_v19, %v11308_v8  ;;  %v2472_v9 = vcombine.low %v2464_v39, %v2471_v20  ;;  %v1558_v42 = vrot.slane %v1544_v28, %v11286_v45  ;;  %v724_v41 = vmax.f32 %v11620_v5, 0.0  ;;  %v11673_v24 = vpop.f32.mrb[54].mxu0  ;;  %v11707_v39 = vld [vmem:[#allocation2 + $0x30] sm:$0xff]  }
 0x1b8   : > { %v2496_v62 = vcombine.low %v2488_v29, %v2495_v18  ;;  %v2520_v0 = vcombine.low %v2512_v3, %v2519_v26  ;;  %v1559_v10 = vcombine.high %v1551_v25, %v1551_v25  ;;  %v1567_v11 = vrot.slane %v1551_v25, %v11286_v45  ;;  %v11676_v15 = vpop.f32.mrb[55].mxu0 }
 0x1b9   : > { %v2479_v47 = vrot.slane %v2472_v9, %v11308_v8  ;;  %3115 = vst.msk [vmem:[#allocation2 + $0x40] sm:$0xf] %vm3098_vm3, %v2455_v32  ;;  %v1560_v16 = vcombine.high %v1558_v42, %v1558_v42  ;;  %v1574_v21 = vrot.slane %v1558_v42, %v11286_v45  ;;  %v11686_v5 = vrot.slane %v935_v30, %v11286_v45 }
 0x1ba   : > { %v2503_v44 = vrot.slane %v2496_v62, %v11308_v8  ;;  %v2527_v22 = vrot.slane %v2520_v0, %v11308_v8  ;;  %v1581_v2 = vrot.slane %v1559_v10, %v11286_v45  ;;  %v1589_v43 = vcombine.high %v1567_v11, %v1567_v11 }
 0x1bb   : > { %3116 = vst.msk [vmem:[#allocation2 + $0x44] sm:$0xf] %vm3098_vm3, %v2479_v47  ;;  %v11693_v14 = vrot.slane %v1560_v16, %v11286_v45  ;;  %v1590_v7 = vcombine.high %v1574_v21, %v1574_v21  ;;  %v746_v20 = vpack.c.bf16 %v724_v41, %v723_v53  ;;  %v3329_v17 = vor.u32 %v3327_v31, %v11586_v51 }
 0x1bc   : > { %3117 = vst.msk [vmem:[#allocation2 + $0x48] sm:$0xf] %vm3098_vm3, %v2503_v44  ;;  %3118 = vst.msk [vmem:[#allocation2 + $0x4c] sm:$0xf] %vm3098_vm3, %v2527_v22  ;;  %v1591_v30 = vcombine.high %v1581_v2, %v1581_v2  ;;  %v2528_v48 = vcombine.low %v1543_v12, %v1581_v2  ;;  %v2529_v49 = vcombine.low %v1567_v11, %v1589_v43  ;;  %v3333_v19 = vrot.slane %v3331_v58, 1 }
 0x1bd   : > { %v1606_v6 = vrot.slane %v11686_v5, %v11286_v45  ;;  %v2553_v46 = vcombine.low %v1574_v21, %v1590_v7  ;;  %v824_v51 = vshrl.u32 %v746_v20, 16  ;;  %v827_v53 = vshll.u32 %v746_v20, 16  ;;  %v11711_v31 = vpop.f32.mrb[56].mxu0 }
 0x1be   : > { %v2536_v29 = vrot.slane %v2528_v48, %v11308_v8  ;;  %v2543_v28 = vrot.slane %v2529_v49, %v11308_v8  ;;  %v2552_v54 = vcombine.low %v1591_v30, %v11693_v14  ;;  %v3334_v12 = vsel %vm3290_vm4, %v3329_v17, %v3333_v19  ;;  %v11717_v18 = vpop.f32.mrb[57].mxu0 }
 0x1bf   : > { %v2567_v58 = vrot.slane %v2553_v46, %v11308_v8  ;;  %v826_v3 = vrot.slane %v824_v51, 7  ;;  %9885 = vmatprep.mubr.msk.bf16.mxu0 %vm3463_vm5, %v3334_v12  ;;  %v9637_v26 = vadd.f32 %v11565_v61, %v11559_v59  ;;  %v9640_v25 = vadd.f32 %v11573_v27, %v11568_v1  ;;  %v11725_v32 = vpop.f32.mrb[58].mxu0  ;;  %v11737_v59 = vld [vmem:[%s13842_s4] ss:$0 sm:$0xff] }
 0x1c0   : > { %v2544_v9 = vcombine.low %v2536_v29, %v2543_v28  ;;  %v2560_v42 = vrot.slane %v2552_v54, %v11308_v8  ;;  %v3335_v41 = vshrl.u32 %v11578_v37, 16  ;;  %v3339_v62 = vshll.u32 %v11707_v39, 16  ;;  %v11730_v0 = vpop.f32.mrb[59].mxu0 }
 0x1c1   : > { %v829_v10 = vor.u32 %v827_v53, %v826_v3  ;;  %v936_v11 = vsel %vm11275_vm2, %v826_v3, 0  ;;  %v659_v61 = vadd.f32 %v11737_v59, %v9637_v26  ;;  %v662_v1 = vadd.f32 %v11737_v59, %v9640_v25 }
 0x1c2   : > { %v2551_v27 = vrot.slane %v2544_v9, %v11308_v8  ;;  %v2568_v37 = vcombine.low %v2560_v42, %v2567_v58  ;;  %v1662_v47 = vrot.slane %v936_v11, %v11286_v45  ;;  %v3337_v16 = vor.u32 %v3335_v41, %v3333_v19 }
 0x1c3   : > { %v919_v21 = vsel %vm11275_vm2, 0, %v829_v10  ;;  %v725_v44 = vmax.f32 %v659_v61, 0.0  ;;  %v726_v22 = vmax.f32 %v662_v1, 0.0  ;;  %v11745_v2 = vrot.slane %v3339_v62, 1 }
 0x1c4   : > { %v2575_v43 = vrot.slane %v2568_v37, %v11308_v8  ;;  %3119 = vst.msk [vmem:[#allocation2 + $0x50] sm:$0xf] %vm3098_vm3, %v2551_v27  ;;  %v1592_v7 = vcombine.high %v11693_v14, %v11693_v14  ;;  %v1607_v20 = vcombine.high %v919_v21, %v919_v21  ;;  %v1614_v17 = vrot.slane %v919_v21, %v11286_v45 }
 0x1c5   : > { %v747_v30 = vpack.c.bf16 %v726_v22, %v725_v44  ;;  %v3342_v48 = vsel %vm3290_vm4, %v3337_v16, %v11745_v2  ;;  %v9643_v49 = vadd.f32 %v11597_v4, %v11592_v34  ;;  %v9646_v19 = vadd.f32 %v11614_v23, %v11604_v35  ;;  %v11758_v46 = vpop.f32.mrb[60].mxu0 }
 0x1c6   : > { %3120 = vst.msk [vmem:[#allocation2 + $0x54] sm:$0xf] %vm3098_vm3, %v2575_v43  ;;  %v1621_v51 = vrot.slane %v1607_v20, %v11286_v45  ;;  %v1622_v14 = vcombine.high %v1614_v17, %v1614_v17  ;;  %v1630_v53 = vrot.slane %v1614_v17, %v11286_v45  ;;  %v1669_v29 = vrot.slane %v1662_v47, %v11286_v45  ;;  %v11765_v28 = vpop.f32.mrb[61].mxu0 }
 0x1c7   : > { %9886 = vmatmul.mubr.msk.bf16.gmra.mrb[72].mxu0 %vm3463_vm5, %v3342_v48  ;;  %v831_v54 = vshrl.u32 %v747_v30, 16  ;;  %v667_v34 = vadd.f32 %v11737_v59, %v9643_v49  ;;  %v670_v4 = vadd.f32 %v11737_v59, %v9646_v19  ;;  %v3343_v35 = vshrl.u32 %v11707_v39, 16  ;;  %v11770_v23 = vpop.f32.mrb[62].mxu0 }
 0x1c8   : > { %v1623_v12 = vcombine.high %v1621_v51, %v1621_v51  ;;  %v1637_v58 = vrot.slane %v1621_v51, %v11286_v45  ;;  %v1644_v3 = vrot.slane %v1622_v14, %v11286_v45  ;;  %v1652_v26 = vcombine.high %v1630_v53, %v1630_v53  ;;  %v11774_v25 = vpop.f32.mrb[63].mxu0 }
 0x1c9   : > { %v2576_v9 = vcombine.low %v1592_v7, %v1630_v53  ;;  %v833_v42 = vrot.slane %v831_v54, 7  ;;  %v834_v41 = vshll.u32 %v747_v30, 16  ;;  %v728_v62 = vmax.f32 %v670_v4, 0.0 }
 0x1ca   : > { %v1651_v10 = vrot.slane %v1623_v12, %v11286_v45  ;;  %v1653_v11 = vcombine.high %v1637_v58, %v1637_v58  ;;  %v1654_v61 = vcombine.high %v1644_v3, %v1644_v3  ;;  %v2577_v39 = vcombine.low %v1606_v6, %v1644_v3  ;;  %v11787_v6 = vld [vmem:[#allocation2 + $0x38] sm:$0xff]  }
 0x1cb   : > { %v2600_v1 = vcombine.low %v1652_v26, %v1637_v58  ;;  %v836_v27 = vor.u32 %v834_v41, %v833_v42  ;;  %v937_v37 = vsel %vm11275_vm2, %v833_v42, 0  ;;  %v727_v47 = vmax.f32 %v667_v34, 0.0 }
 0x1cc   : > { %v2584_v16 = vrot.slane %v2576_v9, %v11308_v8  ;;  %v2591_v21 = vrot.slane %v2577_v39, %v11308_v8  ;;  %v2601_v44 = vcombine.low %v1654_v61, %v1651_v10  ;;  %v2624_v22 = vcombine.low %v1653_v11, %v1669_v29 }
 0x1cd   : > { %v920_v43 = vsel %vm11275_vm2, 0, %v836_v27  ;;  %v1655_v7 = vcombine.high %v1651_v10, %v1651_v10  ;;  %v1725_v20 = vrot.slane %v937_v37, %v11286_v45  ;;  %v748_v5 = vpack.c.bf16 %v728_v62, %v727_v47 }
 0x1ce   : > { %v2592_v17 = vcombine.low %v2584_v16, %v2591_v21  ;;  %v2608_v30 = vrot.slane %v2600_v1, %v11308_v8  ;;  %v2615_v48 = vrot.slane %v2601_v44, %v11308_v8  ;;  %v1670_v49 = vcombine.high %v920_v43, %v920_v43 }
 0x1cf   : > { %v2632_v19 = vrot.slane %v2624_v22, %v11308_v8  ;;  %v1677_v51 = vrot.slane %v920_v43, %v11286_v45  ;;  %v1732_v14 = vrot.slane %v1725_v20, %v11286_v45  ;;  %v838_v53 = vshrl.u32 %v748_v5, 16 }
 0x1d0   : > { %v2599_v29 = vrot.slane %v2592_v17, %v11308_v8  ;;  %v2616_v54 = vcombine.low %v2608_v30, %v2615_v48  ;;  %v1684_v34 = vrot.slane %v1670_v49, %v11286_v45  ;;  %v841_v4 = vshll.u32 %v748_v5, 16 }
 0x1d1   : > { %v1685_v12 = vcombine.high %v1677_v51, %v1677_v51  ;;  %v1693_v58 = vrot.slane %v1677_v51, %v11286_v45  ;;  %v840_v3 = vrot.slane %v838_v53, 7  ;;  %v3347_v26 = vshll.u32 %v11787_v6, 16 }
 0x1d2   : > { %v2623_v9 = vrot.slane %v2616_v54, %v11308_v8  ;;  %3121 = vst.msk [vmem:[#allocation2 + $0x58] sm:$0xf] %vm3098_vm3, %v2599_v29  ;;  %v1686_v42 = vcombine.high %v1684_v34, %v1684_v34  ;;  %v1700_v41 = vrot.slane %v1684_v34, %v11286_v45  ;;  %v9649_v62 = vadd.f32 %v11640_v57, %v11636_v50 }
 0x1d3   : > { %v1707_v10 = vrot.slane %v1685_v12, %v11286_v45  ;;  %v1715_v11 = vcombine.high %v1693_v58, %v1693_v58  ;;  %v2625_v61 = vcombine.low %v1655_v7, %v1693_v58  ;;  %v843_v39 = vor.u32 %v841_v4, %v840_v3 }
 0x1d4   : > { %3122 = vst.msk [vmem:[#allocation2 + $0x5c] sm:$0xf] %vm3098_vm3, %v2623_v9  ;;  %v1714_v1 = vrot.slane %v1686_v42, %v11286_v45  ;;  %v1716_v27 = vcombine.high %v1700_v41, %v1700_v41  ;;  %v938_v37 = vsel %vm11275_vm2, %v840_v3, 0  ;;  %v3345_v47 = vor.u32 %v3343_v35, %v11745_v2  ;;  %v10655_v9 = vld [vmem:[#allocation2 + $0x40] sm:$0xff]  }
 0x1d5   : > { %v1717_v16 = vcombine.high %v1707_v10, %v1707_v10  ;;  %v2639_v21 = vrot.slane %v2625_v61, %v11308_v8  ;;  %v2649_v44 = vcombine.low %v1715_v11, %v1700_v41  ;;  %v921_v50 = vsel %vm11275_vm2, 0, %v843_v39 }
 0x1d6   : > { %v1718_v57 = vcombine.high %v1714_v1, %v1714_v1  ;;  %v2673_v22 = vcombine.low %v1716_v27, %v1732_v14  ;;  %v1733_v43 = vcombine.high %v921_v50, %v921_v50  ;;  %v1740_v7 = vrot.slane %v921_v50, %v11286_v45 }
 0x1d7   : > { %v2640_v20 = vcombine.low %v2632_v19, %v2639_v21  ;;  %v2648_v5 = vcombine.low %v1707_v10, %v1717_v16  ;;  %v2663_v17 = vrot.slane %v2649_v44, %v11308_v8  ;;  %v3349_v30 = vrot.slane %v3347_v26, 1 }
 0x1d8   : > { %v2672_v48 = vcombine.low %v1714_v1, %v1718_v57  ;;  %v1747_v2 = vrot.slane %v1733_v43, %v11286_v45  ;;  %v1748_v35 = vcombine.high %v1740_v7, %v1740_v7  ;;  %v11816_v49 = vrot.slane %v938_v37, %v11286_v45 }
 0x1d9   : > { %v2647_v51 = vrot.slane %v2640_v20, %v11308_v8  ;;  %v2656_v53 = vrot.slane %v2648_v5, %v11308_v8  ;;  %v2687_v14 = vrot.slane %v2673_v22, %v11308_v8  ;;  %v1756_v29 = vrot.slane %v1740_v7, %v11286_v45  ;;  %v10656_v22 = vld [vmem:[#allocation2 + $0x48] sm:$0xff]  }
 0x1da   : > { %v2680_v19 = vrot.slane %v2672_v48, %v11308_v8  ;;  %v1749_v54 = vcombine.high %v1747_v2, %v1747_v2  ;;  %v1763_v34 = vrot.slane %v1747_v2, %v11286_v45  ;;  %v1770_v4 = vrot.slane %v1748_v35, %v11286_v45 }
 0x1db   : > { %v2664_v12 = vcombine.low %v2656_v53, %v2663_v17  ;;  %3123 = vst.msk [vmem:[#allocation2 + $0x60] sm:$0xf] %vm3098_vm3, %v2647_v51  ;;  %v1778_v58 = vcombine.high %v1756_v29, %v1756_v29  ;;  %v3350_v3 = vsel %vm3290_vm4, %v3345_v47, %v3349_v30  ;;  %v675_v26 = vadd.f32 %v11737_v59, %v9649_v62  ;;  %v11847_v53 = vld [vmem:[#allocation2 + $0x50] sm:$0xff]  }
 0x1dc   : > { %v2688_v42 = vcombine.low %v2680_v19, %v2687_v14  ;;  %v1777_v41 = vrot.slane %v1749_v54, %v11286_v45  ;;  %v1779_v10 = vcombine.high %v1763_v34, %v1763_v34  ;;  %v1780_v11 = vcombine.high %v1770_v4, %v1770_v4  ;;  %9889 = vmatprep.mubr.msk.bf16.mxu0 %vm3463_vm5, %v3350_v3 }
 0x1dd   : > { %v2671_v61 = vrot.slane %v2664_v12, %v11308_v8  ;;  %v2696_v39 = vcombine.low %v1756_v29, %v1778_v58  ;;  %v729_v1 = vmax.f32 %v675_v26, 0.0  ;;  %v9652_v27 = vadd.f32 %v11647_v63, %v11643_v33  ;;  %13877 = vst [vmem:[#allocation14_spill] sm:$0xff] %v11847_v53 }
 0x1de   : > { %v2695_v37 = vrot.slane %v2688_v42, %v11308_v8  ;;  %v1781_v47 = vcombine.high %v1777_v41, %v1777_v41  ;;  %v2697_v16 = vcombine.low %v1770_v4, %v1780_v11  ;;  %v2720_v62 = vcombine.low %v1763_v34, %v1779_v10 }
 0x1df   : > { %3124 = vst.msk [vmem:[#allocation2 + $0x64] sm:$0xf] %vm3098_vm3, %v2671_v61  ;;  %v2704_v21 = vrot.slane %v2696_v39, %v11308_v8  ;;  %v678_v44 = vadd.f32 %v11737_v59, %v9652_v27  ;;  %v3351_v50 = vshrl.u32 %v11787_v6, 16  ;;  %v3355_v57 = vshll.u32 %v10655_v9, 16  ;;  %v11861_v61 = vld [vmem:[#allocation2 + $0x58] sm:$0xff]  }
 0x1e0   : > { %3125 = vst.msk [vmem:[#allocation2 + $0x68] sm:$0xf] %vm3098_vm3, %v2695_v37  ;;  %v2711_v43 = vrot.slane %v2697_v16, %v11308_v8  ;;  %v2721_v33 = vcombine.low %v1777_v41, %v1781_v47  ;;  %v2728_v63 = vrot.slane %v2720_v62, %v11308_v8  ;;  %v9655_v7 = vadd.f32 %v11668_v55, %v11661_v52 }
 0x1e1   : > { %v730_v20 = vmax.f32 %v678_v44, 0.0  ;;  %v3353_v5 = vor.u32 %v3351_v50, %v3349_v30  ;;  %v3357_v17 = vrot.slane %v3355_v57, 1  ;;  %v9658_v48 = vadd.f32 %v11676_v15, %v11673_v24 }
 0x1e2   : > { %v2712_v2 = vcombine.low %v2704_v21, %v2711_v43  ;;  %v2735_v6 = vrot.slane %v2721_v33, %v11308_v8  ;;  %v683_v35 = vadd.f32 %v11737_v59, %v9655_v7  ;;  %v3359_v51 = vshrl.u32 %v10655_v9, 16 }
 0x1e3   : > { %v749_v14 = vpack.c.bf16 %v730_v20, %v729_v1  ;;  %v3358_v29 = vsel %vm3290_vm4, %v3353_v5, %v3357_v17  ;;  %v686_v19 = vadd.f32 %v11737_v59, %v9658_v48  ;;  %v3363_v52 = vshll.u32 %v10656_v22, 16 }
 0x1e4   : > { %v2719_v55 = vrot.slane %v2712_v2, %v11308_v8  ;;  %v2736_v30 = vcombine.low %v2728_v63, %v2735_v6  ;;  %9890 = vmatmul.mubr.msk.bf16.gmra.mrb[76].mxu0 %vm3463_vm5, %v3358_v29  ;;  %v731_v24 = vmax.f32 %v683_v35, 0.0  ;;  %v3361_v15 = vor.u32 %v3359_v51, %v3357_v17 }
 0x1e5   : > { %v845_v54 = vshrl.u32 %v749_v14, 16  ;;  %v848_v34 = vshll.u32 %v749_v14, 16  ;;  %v732_v4 = vmax.f32 %v686_v19, 0.0  ;;  %v3365_v12 = vrot.slane %v3363_v52, 1 }
 0x1e6   : > { %v2743_v58 = vrot.slane %v2736_v30, %v11308_v8  ;;  %3126 = vst.msk [vmem:[#allocation2 + $0x6c] sm:$0xf] %vm3098_vm3, %v2719_v55  ;;  %v9661_v3 = vadd.f32 %v11717_v18, %v11711_v31  ;;  %v3367_v26 = vshrl.u32 %v10656_v22, 16  ;;  %v3371_v9 = vshll.u32 %v11847_v53, 16 }
 0x1e7   : > { %v847_v42 = vrot.slane %v845_v54, 7  ;;  %v750_v41 = vpack.c.bf16 %v732_v4, %v731_v24  ;;  %v3366_v10 = vsel %vm3290_vm4, %v3361_v15, %v3365_v12  ;;  %v9664_v11 = vadd.f32 %v11730_v0, %v11725_v32 }
 0x1e8   : > { %v1795_v39 = vrot.slane %v11816_v49, %v11286_v45  ;;  %3127 = vst.msk [vmem:[#allocation2 + $0x70] sm:$0xf] %vm3098_vm3, %v2743_v58  ;;  %9893 = vmatprep.mubr.msk.bf16.mxu0 %vm3463_vm5, %v3366_v10  ;;  %v691_v31 = vadd.f32 %v11737_v59, %v9661_v3  ;;  %v3369_v18 = vor.u32 %v3367_v26, %v3365_v12  ;;  %v11868_v1 = vrot.slane %v3371_v9, 1 }
 0x1e9   : > { %v850_v27 = vor.u32 %v848_v34, %v847_v42  ;;  %v939_v37 = vsel %vm11275_vm2, %v847_v42, 0  ;;  %v852_v47 = vshrl.u32 %v750_v41, 16  ;;  %v13851_v32 = vrot.slane %v11847_v53, 1 }
 0x1ea   : > { %v1851_v0 = vrot.slane %v939_v37, %v11286_v45  ;;  %v855_v16 = vshll.u32 %v750_v41, 16  ;;  %v3374_v49 = vsel %vm3290_vm4, %v3369_v18, %v11868_v1  ;;  %v694_v62 = vadd.f32 %v11737_v59, %v9664_v11 }
 0x1eb   : > { %v922_v21 = vsel %vm11275_vm2, 0, %v850_v27  ;;  %v854_v44 = vrot.slane %v852_v47, 7  ;;  %v3967_v50 = vrot.slane %v11861_v61, 1  ;;  %v9667_v57 = vadd.f32 %v11765_v28, %v11758_v46 }
 0x1ec   : > { %v1796_v22 = vcombine.high %v922_v21, %v922_v21  ;;  %v1803_v43 = vrot.slane %v922_v21, %v11286_v45  ;;  %v733_v33 = vmax.f32 %v691_v31, 0.0  ;;  %9894 = vmatmul.mubr.msk.bf16.gmra.mrb[80].mxu0 %vm3463_vm5, %v3374_v49  ;;  %v734_v63 = vmax.f32 %v694_v62, 0.0 }
 0x1ed   : > { %v857_v7 = vor.u32 %v855_v16, %v854_v44  ;;  %v940_v20 = vsel %vm11275_vm2, %v854_v44, 0  ;;  %v3968_v5 = vsel %vm3945_vm6, %v13851_v32, %v3967_v50  ;;  %v11892_v17 = vadd.f32 %v11737_v59, %v9667_v57 }
 0x1ee   : > { %v1810_v46 = vrot.slane %v1796_v22, %v11286_v45  ;;  %v1811_v28 = vcombine.high %v1803_v43, %v1803_v43  ;;  %v1819_v48 = vrot.slane %v1803_v43, %v11286_v45  ;;  %v1858_v2 = vrot.slane %v1851_v0, %v11286_v45  ;;  %9985 = vmatprep.mubr.msk.bf16.mxu1 %vm3463_vm5, %v3968_v5 }
 0x1ef   : > { %v923_v6 = vsel %vm11275_vm2, 0, %v857_v7  ;;  %v1914_v35 = vrot.slane %v940_v20, %v11286_v45  ;;  %v751_v51 = vpack.c.bf16 %v734_v63, %v733_v33  ;;  %v735_v14 = vmax.f32 %v11892_v17, 0.0 }
 0x1f0   : > { %v1812_v29 = vcombine.high %v1810_v46, %v1810_v46  ;;  %v1826_v19 = vrot.slane %v1810_v46, %v11286_v45  ;;  %v1833_v52 = vrot.slane %v1811_v28, %v11286_v45  ;;  %v1841_v55 = vcombine.high %v1819_v48, %v1819_v48  ;;  %v11922_v28 = vld [vmem:[#allocation2 + $0x60] sm:$0xff]  }
 0x1f1   : > { %v1859_v30 = vcombine.high %v923_v6, %v923_v6  ;;  %v1866_v24 = vrot.slane %v923_v6, %v11286_v45  ;;  %v859_v15 = vshrl.u32 %v751_v51, 16  ;;  %v3375_v54 = vshrl.u32 %v11847_v53, 16 }
 0x1f2   : > { %v1840_v34 = vrot.slane %v1812_v29, %v11286_v45  ;;  %v1842_v4 = vcombine.high %v1826_v19, %v1826_v19  ;;  %v1843_v12 = vcombine.high %v1833_v52, %v1833_v52  ;;  %v2744_v58 = vcombine.low %v1795_v39, %v1833_v52 }
 0x1f3   : > { %v2745_v3 = vcombine.low %v1819_v48, %v1841_v55  ;;  %v1873_v26 = vrot.slane %v1859_v30, %v11286_v45  ;;  %v1874_v9 = vcombine.high %v1866_v24, %v1866_v24  ;;  %v1882_v42 = vrot.slane %v1866_v24, %v11286_v45 }
 0x1f4   : > { %v2752_v41 = vrot.slane %v2744_v58, %v11308_v8  ;;  %v2768_v10 = vcombine.low %v1843_v12, %v1840_v34  ;;  %v2769_v11 = vcombine.low %v1826_v19, %v1842_v4  ;;  %v1844_v31 = vcombine.high %v1840_v34, %v1840_v34  ;;  %v11938_v34 = vld [vmem:[#allocation2 + $0x68] sm:$0xff]  }
 0x1f5   : > { %v2759_v18 = vrot.slane %v2745_v3, %v11308_v8  ;;  %v1875_v27 = vcombine.high %v1873_v26, %v1873_v26  ;;  %v1889_v37 = vrot.slane %v1873_v26, %v11286_v45  ;;  %v1896_v47 = vrot.slane %v1874_v9, %v11286_v45 }
 0x1f6   : > { %v2776_v39 = vrot.slane %v2768_v10, %v11308_v8  ;;  %v2783_v0 = vrot.slane %v2769_v11, %v11308_v8  ;;  %v1904_v16 = vcombine.high %v1882_v42, %v1882_v42  ;;  %v2792_v49 = vcombine.low %v1844_v31, %v1882_v42 }
 0x1f7   : > { %v2760_v62 = vcombine.low %v2752_v41, %v2759_v18  ;;  %v11916_v21 = vrot.slane %v1875_v27, %v11286_v45  ;;  %v1905_v44 = vcombine.high %v1889_v37, %v1889_v37  ;;  %v1906_v57 = vcombine.high %v1896_v47, %v1896_v47  ;;  %v10668_v27 = vld [vmem:[#allocation6 + $0x68] sm:$0xff]  }
 0x1f8   : > { %v2784_v22 = vcombine.low %v2776_v39, %v2783_v0  ;;  %v1921_v43 = vrot.slane %v1914_v35, %v11286_v45  ;;  %v2793_v33 = vcombine.low %v1858_v2, %v1896_v47  ;;  %v2816_v63 = vcombine.low %v1904_v16, %v1889_v37 }
 0x1f9   : > { %v2767_v7 = vrot.slane %v2760_v62, %v11308_v8  ;;  %v2800_v20 = vrot.slane %v2792_v49, %v11308_v8  ;;  %v2817_v5 = vcombine.low %v1906_v57, %v11916_v21  ;;  %v861_v46 = vrot.slane %v859_v15, 7  ;;  %v10753_v49 = vld [vmem:[#allocation6 + $0x60] sm:$0xff]   ;;  %v10670_v62 = vld [vmem:[#allocation6 + $0x70] sm:$0xff]  }
 0x1fa   : > { %v2791_v48 = vrot.slane %v2784_v22, %v11308_v8  ;;  %v2807_v6 = vrot.slane %v2793_v33, %v11308_v8  ;;  %v11926_v29 = vcombine.low %v1905_v44, %v1921_v43  ;;  %v862_v19 = vshll.u32 %v751_v51, 16 }
 0x1fb   : > { %3128 = vst.msk [vmem:[#allocation2 + $0x74] sm:$0xf] %vm3098_vm3, %v2767_v7  ;;  %v2824_v2 = vrot.slane %v2816_v63, %v11308_v8  ;;  %v2831_v35 = vrot.slane %v2817_v5, %v11308_v8  ;;  %v941_v52 = vsel %vm11275_vm2, %v861_v46, 0  ;;  %v1907_v55 = vcombine.high %v11916_v21, %v11916_v21 }
 0x1fc   : > { %3129 = vst.msk [vmem:[#allocation2 + $0x78] sm:$0xf] %vm3098_vm3, %v2791_v48  ;;  %v2808_v30 = vcombine.low %v2800_v20, %v2807_v6  ;;  %v864_v24 = vor.u32 %v862_v19, %v861_v46  ;;  %v1977_v15 = vrot.slane %v941_v52, %v11286_v45  ;;  %v3377_v51 = vor.u32 %v3375_v54, %v11868_v1 }
 0x1fd   : > { %v2832_v4 = vcombine.low %v2824_v2, %v2831_v35  ;;  %v3379_v12 = vshll.u32 %v11861_v61, 16  ;;  %v9670_v58 = vadd.f32 %v11774_v25, %v11770_v23  ;;  %v3969_v3 = vrot.slane %v11922_v28, 1 }
 0x1fe   : > { %v2815_v26 = vrot.slane %v2808_v30, %v11308_v8  ;;  %v924_v9 = vsel %vm11275_vm2, 0, %v864_v24  ;;  %v1984_v42 = vrot.slane %v1977_v15, %v11286_v45  ;;  %v3383_v41 = vshrl.u32 %v11861_v61, 16  ;;  %v10674_v24 = vld [vmem:[#allocation6 + $0x78] sm:$0xff]  }
 0x1ff   : > { %v2839_v1 = vrot.slane %v2832_v4, %v11308_v8  ;;  %v1922_v54 = vcombine.high %v924_v9, %v924_v9  ;;  %v1929_v10 = vrot.slane %v924_v9, %v11286_v45  ;;  %v3381_v11 = vrot.slane %v3379_v12, 1 }
 0x200   : > { %3130 = vst.msk [vmem:[#allocation2 + $0x7c] sm:$0xf] %vm3098_vm3, %v2815_v26  ;;  %v702_v23 = vadd.f32 %v11737_v59, %v9670_v58  ;;  %v3970_v25 = vsel %vm3945_vm6, %v3967_v50, %v3969_v3  ;;  %v3387_v31 = vshll.u32 %v11922_v28, 16  ;;  %v3971_v18 = vrot.slane %v11938_v34, 1 }
 0x201   : > { %3131 = vst.msk [vmem:[#allocation2 + $0x80] sm:$0xf] %vm3098_vm3, %v2839_v1  ;;  %v1936_v37 = vrot.slane %v1922_v54, %v11286_v45  ;;  %v1937_v47 = vcombine.high %v1929_v10, %v1929_v10  ;;  %v1945_v39 = vrot.slane %v1929_v10, %v11286_v45  ;;  %v3382_v0 = vsel %vm3290_vm4, %v3377_v51, %v3381_v11 }
 0x202   : > { %9986 = vmatmul.mubr.msk.bf16.vlgmr.msra.gmra.mrb[0].mxu1 %vm3463_vm5, %v3970_v25  ;;  %9897 = vmatprep.mubr.msk.bf16.mxu0 %vm3463_vm5, %v3382_v0  ;;  %v736_v59 = vmax.f32 %v702_v23, 0.0  ;;  %v3385_v61 = vor.u32 %v3383_v41, %v3381_v11  ;;  %v3389_v50 = vrot.slane %v3387_v31, 1  ;;  %v3972_v16 = vsel %vm3945_vm6, %v3969_v3, %v3971_v18  ;;  %v11972_v20 = vld [vmem:[#allocation2 + $0x70] sm:$0xff]  }
 0x203   : > { %10002 = vmatpush3.bf16.msra.mxu1 %v10753_v49  ;;  %v1938_v21 = vcombine.high %v1936_v37, %v1936_v37  ;;  %v1952_v44 = vrot.slane %v1936_v37, %v11286_v45  ;;  %v1959_v57 = vrot.slane %v1937_v47, %v11286_v45  ;;  %v1967_v22 = vcombine.high %v1945_v39, %v1945_v39  ;;  %v11992_v31 = vld [vmem:[#allocation6 + $0x80] sm:$0xff]  }
 0x204   : > { %9989 = vmatprep.mubr.msk.bf16.mxu1 %vm3463_vm5, %v3972_v16  ;;  %v2841_v43 = vcombine.low %v1907_v55, %v1945_v39  ;;  %v752_v33 = vpack.c.bf16 %v736_v59, %v735_v14  ;;  %v3390_v63 = vsel %vm3290_vm4, %v3385_v61, %v3389_v50  ;;  %v3391_v7 = vshrl.u32 %v11922_v28, 16  ;;  %10003 = vmatprep.subr.bf16.mxu1 %v10668_v27 }
 0x205   : > { %v1966_v5 = vrot.slane %v1938_v21, %v11286_v45  ;;  %v1968_v46 = vcombine.high %v1952_v44, %v1952_v44  ;;  %v1969_v48 = vcombine.high %v1959_v57, %v1959_v57  ;;  %v2865_v6 = vcombine.low %v1967_v22, %v1952_v44  ;;  %9898 = vmatmul.mubr.msk.bf16.gmra.mrb[84].mxu0 %vm3463_vm5, %v3390_v63 }
 0x206   : > { %v2848_v19 = vrot.slane %v11926_v29, %v11308_v8  ;;  %v2855_v17 = vrot.slane %v2841_v43, %v11308_v8  ;;  %v866_v14 = vshrl.u32 %v752_v33, 16  ;;  %v869_v2 = vshll.u32 %v752_v33, 16 }
 0x207   : > { %10004 = vmatpush3.bf16.msra.mxu1 %v10668_v27  ;;  %v1970_v35 = vcombine.high %v1966_v5, %v1966_v5  ;;  %v2864_v52 = vcombine.low %v1959_v57, %v1969_v48  ;;  %v2889_v55 = vcombine.low %v1968_v46, %v1984_v42  ;;  %v3393_v30 = vor.u32 %v3391_v7, %v3389_v50  ;;  %v11987_v54 = vld [vmem:[#allocation2 + $0x78] sm:$0xff]  }
 0x208   : > { %10005 = vmatprep.subr.bf16.mxu1 %v10670_v62  ;;  %v2856_v15 = vcombine.low %v2848_v19, %v2855_v17  ;;  %v868_v51 = vrot.slane %v866_v14, 7  ;;  %v3395_v4 = vshll.u32 %v11938_v34, 16  ;;  %v3973_v12 = vrot.slane %v11972_v20, 1 }
 0x209   : > { %v2872_v58 = vrot.slane %v2864_v52, %v11308_v8  ;;  %v2879_v29 = vrot.slane %v2865_v6, %v11308_v8  ;;  %v2888_v3 = vcombine.low %v1966_v5, %v1970_v35  ;;  %v2903_v26 = vrot.slane %v2889_v55, %v11308_v8 }
 0x20a   : > { %v2863_v9 = vrot.slane %v2856_v15, %v11308_v8  ;;  %v871_v41 = vor.u32 %v869_v2, %v868_v51  ;;  %v942_v42 = vsel %vm11275_vm2, %v868_v51, 0  ;;  %v3397_v1 = vrot.slane %v3395_v4, 1 }
 0x20b   : > { %10006 = vmatpush3.bf16.msra.mxu1 %v10670_v62  ;;  %v2880_v10 = vcombine.low %v2872_v58, %v2879_v29  ;;  %v2896_v11 = vrot.slane %v2888_v3, %v11308_v8  ;;  %v2040_v23 = vrot.slane %v942_v42, %v11286_v45  ;;  %v3974_v25 = vsel %vm3945_vm6, %v3971_v18, %v3973_v12 }
 0x20c   : > { %10007 = vmatprep.subr.bf16.mxu1 %v10674_v24  ;;  %3132 = vst.msk [vmem:[#allocation2 + $0x84] sm:$0xf] %vm3098_vm3, %v2863_v9  ;;  %v925_v27 = vsel %vm11275_vm2, 0, %v871_v41  ;;  %v3398_v37 = vsel %vm3290_vm4, %v3393_v30, %v3397_v1  ;;  %9990 = vmatmul.mubr.msk.bf16.gmra.mrb[4].mxu1 %vm3463_vm5, %v3974_v25  ;;  %v3399_v47 = vshrl.u32 %v11938_v34, 16  ;;  %v3403_v39 = vshll.u32 %v11972_v20, 16 }
 0x20d   : > { %v2887_v0 = vrot.slane %v2880_v10, %v11308_v8  ;;  %v2904_v59 = vcombine.low %v2896_v11, %v2903_v26  ;;  %v1985_v18 = vcombine.high %v925_v27, %v925_v27  ;;  %v1992_v61 = vrot.slane %v925_v27, %v11286_v45  ;;  %9901 = vmatprep.mubr.msk.bf16.mxu0 %vm3463_vm5, %v3398_v37 }
 0x20e   : > { %v2047_v50 = vrot.slane %v2040_v23, %v11286_v45  ;;  %v3401_v38 = vor.u32 %v3399_v47, %v3397_v1  ;;  %v3405_v16 = vrot.slane %v3403_v39, 1  ;;  %v3975_v49 = vrot.slane %v11987_v54, 1 }
 0x20f   : > { %10008 = vmatpush3.bf16.msra.mxu1 %v10674_v24  ;;  %v2911_v62 = vrot.slane %v2904_v59, %v11308_v8  ;;  %3133 = vst.msk [vmem:[#allocation2 + $0x88] sm:$0xf] %vm3098_vm3, %v2887_v0  ;;  %v1999_v34 = vrot.slane %v1985_v18, %v11286_v45  ;;  %v2000_v21 = vcombine.high %v1992_v61, %v1992_v61  ;;  %v3411_v48 = vshll.u32 %v11987_v54, 16 }
 0x210   : > { %v2008_v44 = vrot.slane %v1992_v61, %v11286_v45  ;;  %10045 = vmatprep.subr.bf16.mxu1 %v11992_v31  ;;  %v2960_v57 = vcombine.low %v2047_v50, %v11295_v56  ;;  %v3406_v22 = vsel %vm3290_vm4, %v3401_v38, %v3405_v16  ;;  %v3976_v43 = vsel %vm3945_vm6, %v3973_v12, %v3975_v49  ;;  %v12051_v38 = vld [vmem:[#allocation2 + $0xc] sm:$0xf] }
 0x211   : > { %3134 = vst.msk [vmem:[#allocation2 + $0x8c] sm:$0xf] %vm3098_vm3, %v2911_v62  ;;  %v2001_v33 = vcombine.high %v1999_v34, %v1999_v34  ;;  %v2015_v63 = vrot.slane %v1999_v34, %v11286_v45  ;;  %v2022_v7 = vrot.slane %v2000_v21, %v11286_v45  ;;  %9902 = vmatmul.mubr.msk.bf16.gmra.mrb[88].mxu0 %vm3463_vm5, %v3406_v22  ;;  %v3407_v56 = vshrl.u32 %v11972_v20, 16  ;;  %v12057_v34 = vld [vmem:[#allocation2 + $0x10] sm:$0xff]   ;;  %v12059_v21 = vld [vmem:[#allocation2 + $0x18] sm:$0xff]  }
 0x212   : > { %v2030_v5 = vcombine.high %v2008_v44, %v2008_v44  ;;  %v2967_v46 = vrot.slane %v2960_v57, %v11308_v8  ;;  %9993 = vmatprep.mubr.msk.bf16.mxu1 %vm3463_vm5, %v3976_v43  ;;  %v3413_v55 = vrot.slane %v3411_v48, 1  ;;  %v3415_v58 = vshrl.u32 %v11987_v54, 16 }
 0x213   : > { %v2029_v6 = vrot.slane %v2001_v33, %v11286_v45  ;;  %v2031_v19 = vcombine.high %v2015_v63, %v2015_v63  ;;  %v2032_v17 = vcombine.high %v2022_v7, %v2022_v7  ;;  %v12023_v2 = vld [vmem:[#allocation2 + $0x80] sm:$0xff]   ;;  %v3409_v52 = vor.u32 %v3407_v56, %v3405_v16  ;;  %v12238_v45 = vld [vmem:[#allocation2 + $0x30] sm:$0xff]  }
 0x214   : > { %v2912_v14 = vcombine.low %v2008_v44, %v2030_v5  ;;  %v2968_v35 = vcombine.low %v2967_v46, %v11311_v13  ;;  %v3977_v12 = vrot.slane %v12023_v2, 1  ;;  %v3419_v13 = vshll.u32 %v12023_v2, 16 }
 0x215   : > { %v2033_v30 = vcombine.high %v2029_v6, %v2029_v6  ;;  %v2913_v24 = vcombine.low %v2022_v7, %v2032_v17  ;;  %v2936_v15 = vcombine.low %v2015_v63, %v2031_v19  ;;  %v3414_v4 = vsel %vm3290_vm4, %v3409_v52, %v3413_v55 }
 0x216   : > { %v2975_v51 = vrot.slane %v2968_v35, %v11308_v8  ;;  %v2920_v29 = vrot.slane %v2912_v14, %v11308_v8  ;;  %9905 = vmatprep.mubr.msk.bf16.mxu0 %vm3463_vm5, %v3414_v4  ;;  %v3978_v9 = vsel %vm3945_vm6, %v3975_v49, %v3977_v12  ;;  %v3417_v41 = vor.u32 %v3415_v58, %v3413_v55  ;;  %v4274_v49 = vld [vmem:[#allocation2 + $0x8] sm:$0xe] }
 0x217   : > { %v2927_v3 = vrot.slane %v2913_v24, %v11308_v8  ;;  %v2937_v26 = vcombine.low %v2029_v6, %v2033_v30  ;;  %v2944_v10 = vrot.slane %v2936_v15, %v11308_v8  ;;  %9994 = vmatmul.mubr.msk.bf16.gmra.mrb[8].mxu1 %vm3463_vm5, %v3978_v9  ;;  %v3421_v23 = vrot.slane %v3419_v13, 1  ;;  %v12070_v30 = vld [vmem:[#allocation2 + $0x28] sm:$0xff]  }
 0x218   : > { %3137 = vst.msk [vmem:[#allocation2 + $0x98] sm:$0xf] %vm3098_vm3, %v2975_v51  ;;  %v12036_v42 = vld [vmem:[#allocation2 + $0x88] sm:$0xff]   ;;  %v3423_v27 = vshrl.u32 %v12023_v2, 16  ;;  %v9319_v62 = vcombine.low %v4274_v49, %v12051_v38  ;;  %v4414_v22 = vrot.slane %v12057_v34, 1  ;;  %v4416_v43 = vrot.slane %v12059_v21, 1 }
 0x219   : > { %v2928_v1 = vcombine.low %v2920_v29, %v2927_v3  ;;  %v2951_v11 = vrot.slane %v2937_v26, %v11308_v8  ;;  %v3979_v25 = vrot.slane %v12036_v42, 1  ;;  %v3427_v37 = vshll.u32 %v12036_v42, 16  ;;  %v12079_v29 = vld [vmem:[#allocation2 + $0x30] sm:$0xff]   ;;  %v12081_v3 = vld [vmem:[#allocation2 + $0x38] sm:$0xff]  }
 0x21a   : > { %v3422_v0 = vsel %vm3290_vm4, %v3417_v41, %v3421_v23  ;;  %v3425_v18 = vor.u32 %v3423_v27, %v3421_v23  ;;  %v4756_v57 = vshrl.u32 %v9319_v62, 16  ;;  %v4759_v33 = vshll.u32 %v9319_v62, 16  ;;  %v12089_v23 = vld [vmem:[#allocation2 + $0x40] sm:$0xff]  }
 0x21b   : > { %v2935_v47 = vrot.slane %v2928_v1, %v11308_v8  ;;  %v2952_v39 = vcombine.low %v2944_v10, %v2951_v11  ;;  %9906 = vmatmul.mubr.msk.bf16.gmra.mrb[92].mxu0 %vm3463_vm5, %v3422_v0  ;;  %v3980_v59 = vsel %vm3945_vm6, %v3977_v12, %v3979_v25  ;;  %v3429_v61 = vrot.slane %v3427_v37, 1 }
 0x21c   : > { %9997 = vmatprep.mubr.msk.bf16.mxu1 %vm3463_vm5, %v3980_v59  ;;  %v4764_v63 = vshrl.u32 %v12057_v34, 16  ;;  %v3431_v5 = vshrl.u32 %v12036_v42, 16  ;;  %v4758_v56 = vrot.slane %v4756_v57, 1  ;;  %v4413_v48 = vrot.slane %v9319_v62, 1 }
 0x21d   : > { %v2959_v50 = vrot.slane %v2952_v39, %v11308_v8  ;;  %3135 = vst.msk [vmem:[#allocation2 + $0x90] sm:$0xf] %vm3098_vm3, %v2935_v47  ;;  %v3430_v16 = vsel %vm3290_vm4, %v3425_v18, %v3429_v61  ;;  %v12061_v8 = vld [vmem:[#allocation2 + $0x20] sm:$0xff]   ;;  %v4761_v6 = vrot.slane %v4759_v33, 2  ;;  %v4767_v17 = vshll.u32 %v12057_v34, 16  ;;  %v12099_v18 = vld [vmem:[#allocation2 + $0x48] sm:$0xff]  }
 0x21e   : > { %9909 = vmatprep.mubr.msk.bf16.mxu0 %vm3463_vm5, %v3430_v16  ;;  %v4766_v19 = vrot.slane %v4764_v63, 1  ;;  %v3433_v35 = vor.u32 %v3431_v5, %v3429_v61  ;;  %v4418_v55 = vrot.slane %v12061_v8, 1  ;;  %v4415_v24 = vsel %vm3945_vm6, %v4413_v48, %v4414_v22  ;;  %v10687_v16 = vld [vmem:[#allocation6 + $0x88] sm:$0xff]  }
 0x21f   : > { %3136 = vst.msk [vmem:[#allocation2 + $0x94] sm:$0xf] %vm3098_vm3, %v2959_v50  ;;  %v4769_v15 = vrot.slane %v4767_v17, 2  ;;  %v4773_v51 = vshrl.u32 %v12059_v21, 16  ;;  %v4776_v4 = vshll.u32 %v12059_v21, 16  ;;  %v4417_v58 = vsel %vm3945_vm6, %v4414_v22, %v4416_v43  ;;  %v12117_v17 = vld [vmem:[#allocation2 + $0x58] sm:$0xff]  }
 0x220   : > { %v4762_v26 = vor.u32 %v4761_v6, %v4758_v56  ;;  %v4782_v1 = vshrl.u32 %v12061_v8, 16  ;;  %v4419_v10 = vsel %vm3945_vm6, %v4416_v43, %v4418_v55  ;;  %v4420_v11 = vrot.slane %v12070_v30, 1 }
 0x221   : > { %v4770_v13 = vor.u32 %v4769_v15, %v4766_v19  ;;  %v4775_v9 = vrot.slane %v4773_v51, 1  ;;  %v4778_v41 = vrot.slane %v4776_v4, 2  ;;  %v4791_v27 = vshrl.u32 %v12070_v30, 16  ;;  %v12115_v19 = vld [vmem:[#allocation2 + $0x50] sm:$0xff]  }
 0x222   : > { %v4784_v39 = vrot.slane %v4782_v1, 1  ;;  %v4794_v0 = vshll.u32 %v12070_v30, 16  ;;  %v4422_v59 = vrot.slane %v12079_v29, 1  ;;  %v4803_v57 = vshll.u32 %v12079_v29, 16  ;;  %v12130_v4 = vld [vmem:[#allocation2 + $0x10] sm:$0xff]  }
 0x223   : > { %v12094_v37 = vsel %vm4754_vm7, %v4762_v26, %v4770_v13  ;;  %v4779_v47 = vor.u32 %v4778_v41, %v4775_v9  ;;  %v4793_v50 = vrot.slane %v4791_v27, 1  ;;  %v4421_v22 = vsel %vm3945_vm6, %v4418_v55, %v4420_v11  ;;  %v12140_v26 = vld [vmem:[#allocation2 + $0x60] sm:$0xff]   ;;  %v10757_v1 = vld [vmem:[#allocation6 + $0x48] sm:$0xff]  }
 0x224   : > { %v10675_v44 = vld [vmem:[#allocation2 + $0x90] ss:$0 sps:$4 sm:$0x11]   ;;  %v4796_v62 = vrot.slane %v4794_v0, 2  ;;  %v4426_v43 = vrot.slane %v12089_v23, 1  ;;  %v4809_v63 = vshrl.u32 %v12081_v3, 16  ;;  %v4423_v48 = vsel %vm3945_vm6, %v4420_v11, %v4422_v59 }
 0x225   : > { %v3981_v7 = vrot.slane %v10675_v44, 1  ;;  %v3435_v46 = vshll.u32 %v10675_v44, 16  ;;  %v12102_v49 = vsel %vm4754_vm7, %v4770_v13, %v4779_v47  ;;  %v4800_v44 = vshrl.u32 %v12079_v29, 16  ;;  %v10756_v13 = vld [vmem:[#allocation6 + $0x40] sm:$0xff]  }
 0x226   : > { %v4812_v56 = vshll.u32 %v12081_v3, 16  ;;  %v4428_v6 = vrot.slane %v12099_v18, 1  ;;  %v4818_v51 = vshrl.u32 %v12089_v23, 16  ;;  %v4821_v9 = vshll.u32 %v12089_v23, 16 }
 0x227   : > { %v3982_v14 = vsel %vm3945_vm6, %v3979_v25, %v3981_v7  ;;  %v3437_v52 = vrot.slane %v3435_v46, 1  ;;  %v4785_v25 = vshll.u32 %v12061_v8, 16  ;;  %v4797_v7 = vor.u32 %v4796_v62, %v4793_v50 }
 0x228   : > { %9998 = vmatmul.mubr.msk.bf16.gmra.mrb[12].mxu1 %vm3463_vm5, %v3982_v14  ;;  %v4802_v5 = vrot.slane %v4800_v44, 1  ;;  %v4805_v46 = vrot.slane %v4803_v57, 2  ;;  %v4814_v15 = vrot.slane %v4812_v56, 2  ;;  %v4827_v41 = vshrl.u32 %v12099_v18, 16 }
 0x229   : > { %10009 = vmatprep.mubr.msk.bf16.mxu1 %vm3463_vm5, %v4415_v24  ;;  %v3438_v12 = vsel %vm3290_vm4, %v3433_v35, %v3437_v52  ;;  %v4787_v61 = vrot.slane %v4785_v25, 2  ;;  %v4811_v35 = vrot.slane %v4809_v63, 1  ;;  %v12122_v52 = vld [vmem:[#allocation2 + $0x8] sm:$0xff]   ;;  %v4820_v25 = vrot.slane %v4818_v51, 1 }
 0x22a   : > { %9910 = vmatmul.mubr.msk.bf16.gmra.mrb[96].mxu0 %vm3463_vm5, %v3438_v12  ;;  %v4806_v24 = vor.u32 %v4805_v46, %v4802_v5  ;;  %v4830_v27 = vshll.u32 %v12099_v18, 16  ;;  %v4823_v0 = vrot.slane %v4821_v9, 2  ;;  %v4836_v62 = vshrl.u32 %v12115_v19, 16  ;;  %v12163_v5 = vld [vmem:[#allocation2 + $0x70] sm:$0xff]   ;;  %v10758_v46 = vld [vmem:[#allocation6 + $0x50] sm:$0xff]  }
 0x22b   : > { %9921 = vmatprep.mubr.msk.bf16.mxu0 %vm3463_vm5, %v11343_v60  ;;  %v4424_v60 = vrot.slane %v12081_v3, 1  ;;  %v4788_v33 = vor.u32 %v4787_v61, %v4784_v39  ;;  %v4815_v11 = vor.u32 %v4814_v15, %v4811_v35  ;;  %v13852_v39 = vrot.slane %v12117_v17, 1  ;;  %v12178_v9 = vld [vmem:[#allocation2 + $0x18] sm:$0xff]  }
 0x22c   : > { %v4832_v50 = vrot.slane %v4830_v27, 2  ;;  %v4839_v44 = vshll.u32 %v12115_v19, 16  ;;  %v12156_v57 = vsel %vm3945_vm6, %v4426_v43, %v4428_v6  ;;  %v4824_v63 = vor.u32 %v4823_v0, %v4820_v25  ;;  %v12192_v27 = vld [vmem:[#allocation2 + $0x20] sm:$0xff]  }
 0x22d   : > { %v12120_v14 = vsel %vm4754_vm7, %v4779_v47, %v4788_v33  ;;  %v12127_v55 = vsel %vm4754_vm7, %v4788_v33, %v4797_v7  ;;  %v12135_v12 = vsel %vm3945_vm6, %v4422_v59, %v4424_v60  ;;  %v4430_v47 = vrot.slane %v12115_v19, 1  ;;  %v12159_v33 = vld [vmem:[#allocation2 + $0x68] sm:$0xff]  }
 0x22e   : > { %v4829_v59 = vrot.slane %v4827_v41, 1  ;;  %v12151_v61 = vsel %vm4754_vm7, %v4806_v24, %v4815_v11  ;;  %v4838_v35 = vrot.slane %v4836_v62, 1  ;;  %v12182_v41 = vld [vmem:[#allocation2 + $0x78] sm:$0xff]   ;;  %v4857_v0 = vshll.u32 %v12140_v26, 16 }
 0x22f   : > { %v12168_v15 = vsel %vm3945_vm6, %v4428_v6, %v4430_v47  ;;  %v12173_v51 = vsel %vm3945_vm6, %v4430_v47, %v13852_v39  ;;  %v12196_v47 = vld [vmem:[#allocation2 + $0x80] sm:$0xff]   ;;  %v4875_v39 = vshll.u32 %v12163_v5, 16 }
 0x230   : > { %10010 = vmatmul.mubr.msk.bf16.vlgmr.msra.gmra.mrb[16].mxu1 %vm3463_vm5, %v4417_v58  ;;  %v12138_v58 = vsel %vm3945_vm6, %v4424_v60, %v4426_v43  ;;  %v10697_v60 = vld [vmem:[#allocation6 + $0x98] sm:$0xff]   ;;  %v4833_v56 = vor.u32 %v4832_v50, %v4829_v59  ;;  %v4848_v43 = vshll.u32 %v12117_v17, 16  ;;  %v4863_v59 = vshrl.u32 %v12159_v33, 16 }
 0x231   : > { %10046 = vmatpush3.bf16.msra.mxu1 %v11992_v31  ;;  %10013 = vmatprep.mubr.msk.bf16.mxu1 %vm3463_vm5, %v4419_v10  ;;  %v10692_v31 = vld [vmem:[#allocation6 + $0x90] sm:$0xff]   ;;  %v12145_v10 = vsel %vm4754_vm7, %v4797_v7, %v4806_v24  ;;  %v4845_v7 = vshrl.u32 %v12117_v17, 16  ;;  %v4841_v24 = vrot.slane %v4839_v44, 2  ;;  %v4866_v50 = vshll.u32 %v12159_v33, 16  ;;  %v12203_v44 = vld [vmem:[#allocation2 + $0x88] sm:$0xff]  }
 0x232   : > { %9922 = vmatmul.mubr.msk.bf16.vlgmr.msra.gmra.mrb[64].mxu0 %vm3463_vm5, %v12122_v52  ;;  %10047 = vmatprep.subr.bf16.mxu1 %v10687_v16  ;;  %v12187_v6 = vsel %vm4754_vm7, %v4824_v63, %v4833_v56  ;;  %v4850_v25 = vrot.slane %v4848_v43, 2  ;;  %v4859_v43 = vrot.slane %v4857_v0, 2  ;;  %v4865_v36 = vrot.slane %v4863_v59, 1  ;;  %v12219_v59 = vld [vmem:[#allocation2 + $0x98] ss:$0 sps:$4 sm:$0x33]  }
 0x233   : > { %9925 = vmatprep.mubr.msk.bf16.mxu0 %vm3463_vm5, %v12130_v4  ;;  %9958 = vmatpush3.bf16.msra.mxu0 %v10756_v13  ;;  %v4847_v13 = vrot.slane %v4845_v7, 1  ;;  %v4868_v32 = vrot.slane %v4866_v50, 2  ;;  %v4890_v0 = vshrl.u32 %v12196_v47, 16  ;;  %v4899_v40 = vshrl.u32 %v12203_v44, 16 }
 0x234   : > { %9959 = vmatprep.subr.bf16.mxu0 %v10757_v1 }
 0x235   : > { %10048 = vmatpush3.bf16.msra.mxu1 %v10687_v16  ;;  %v4881_v16 = vshrl.u32 %v12182_v41, 16 }
 0x236   : > { %10049 = vmatprep.subr.bf16.mxu1 %v10692_v31 }
 0x237   : > { %9960 = vmatpush3.bf16.msra.mxu0 %v10757_v1  ;;  %v4842_v1 = vor.u32 %v4841_v24, %v4838_v35  ;;  %v4851_v35 = vor.u32 %v4850_v25, %v4847_v13  ;;  %v12216_v13 = vld [vmem:[#allocation2 + $0x90] sm:$0xff]  }
 0x238   : > { %10014 = vmatmul.mubr.msk.bf16.gmra.mrb[20].mxu1 %vm3463_vm5, %v4421_v22  ;;  %9961 = vmatprep.subr.bf16.mxu0 %v10758_v46  ;;  %v12176_v22 = vsel %vm4754_vm7, %v4815_v11, %v4824_v63  ;;  %v12190_v11 = vld [vmem:[#allocation2 + $0x8] sm:$0xc] }
 0x239   : > { %10017 = vmatprep.mubr.msk.bf16.mxu1 %vm3463_vm5, %v4423_v48  ;;  %10050 = vmatpush3.bf16.msra.mxu1 %v10692_v31  ;;  %v12184_v48 = vld [vmem:[#allocation6 + $0xa0] sm:$0xff]   ;;  %v4854_v31 = vshrl.u32 %v12140_v26, 16  ;;  %v9383_v62 = vcombine.low %v12190_v11, %v12051_v38  ;;  %v10761_v63 = vld [vmem:[#allocation6 + $0x58] sm:$0xff]   ;;  %v12206_v7 = vsel %vm4754_vm7, %v4833_v56, %v4842_v1  ;;  %v12212_v38 = vsel %vm4754_vm7, %v4842_v1, %v4851_v35 }
 0x23a   : > { %9926 = vmatmul.mubr.msk.bf16.gmra.mrb[68].mxu0 %vm3463_vm5, %v12178_v9  ;;  %10051 = vmatprep.subr.bf16.mxu1 %v10697_v60  ;;  %13878 = vst [vmem:[#allocation15_spill] sm:$0xff] %v12206_v7  ;;  %13879 = vst [vmem:[#allocation16_spill] sm:$0xff] %v12212_v38  ;;  %v4884_v56 = vshll.u32 %v12182_v41, 16  ;;  %v4883_v1 = vrot.slane %v4881_v16, 1  ;;  %v5231_v7 = vrot.slane %v12057_v34, 2 }
 0x23b   : > { %9929 = vmatprep.mubr.msk.bf16.mxu0 %vm3463_vm5, %v12192_v27  ;;  %9962 = vmatpush3.bf16.msra.mxu0 %v10758_v46  ;;  %v4856_v24 = vrot.slane %v4854_v31, 1  ;;  %v4872_v46 = vshrl.u32 %v12163_v5, 16  ;;  %v4877_v31 = vrot.slane %v4875_v39, 2  ;;  %v4892_v39 = vrot.slane %v4890_v0, 1 }
 0x23c   : > { %9963 = vmatprep.subr.bf16.mxu0 %v10761_v63  ;;  %v4886_v50 = vrot.slane %v4884_v56, 2  ;;  %v4902_v56 = vshll.u32 %v12203_v44, 16 }
 0x23d   : > { %10052 = vmatpush3.bf16.msra.mxu1 %v10697_v60  ;;  %v4874_v11 = vrot.slane %v4872_v46, 1  ;;  %v4860_v25 = vor.u32 %v4859_v43, %v4856_v24  ;;  %v4869_v60 = vor.u32 %v4868_v32, %v4865_v36  ;;  %v4893_v46 = vshll.u32 %v12196_v47, 16  ;;  %v12233_v24 = vld [vmem:[#allocation2 + $0x28] sm:$0xff]  }
 0x23e   : > { %10089 = vmatprep.subr.bf16.mxu1 %v12184_v48  ;;  %v4901_v43 = vrot.slane %v4899_v40, 1  ;;  %v4904_v0 = vrot.slane %v4902_v56, 2 }
 0x23f   : > { %9964 = vmatpush3.bf16.msra.mxu0 %v10761_v63  ;;  %v12228_v63 = vsel %vm4754_vm7, %v4851_v35, %v4860_v25  ;;  %v12231_v36 = vsel %vm4754_vm7, %v4860_v25, %v4869_v60  ;;  %v4878_v32 = vor.u32 %v4877_v31, %v4874_v11  ;;  %v4895_v16 = vrot.slane %v4893_v46, 2 }
 0x240   : > { %10018 = vmatmul.mubr.msk.bf16.gmra.mrb[24].mxu1 %vm3463_vm5, %v12135_v12  ;;  %13880 = vst [vmem:[#allocation17_spill] sm:$0xff] %v12228_v63  ;;  %13881 = vst [vmem:[#allocation18_spill] sm:$0xff] %v12231_v36  ;;  %v4887_v12 = vor.u32 %v4886_v50, %v4883_v1  ;;  %v4908_v35 = vshrl.u32 %v12216_v13, 16  ;;  %v4911_v11 = vshll.u32 %v12216_v13, 16  ;;  %v4917_v25 = vshrl.u32 %v12219_v59, 16 }
 0x241   : > { %10021 = vmatprep.mubr.msk.bf16.mxu1 %vm3463_vm5, %v12138_v58  ;;  %v12243_v58 = vsel %vm4754_vm7, %v4869_v60, %v4878_v32  ;;  %v4896_v40 = vor.u32 %v4895_v16, %v4892_v39  ;;  %v4920_v1 = vshll.u32 %v12219_v59, 16  ;;  %v5230_v63 = vrot.slane %v9383_v62, 2 }
 0x242   : > { %9930 = vmatmul.mubr.msk.bf16.gmra.mrb[72].mxu0 %vm3463_vm5, %v12233_v24  ;;  %13882 = vst [vmem:[#allocation19_spill] sm:$0xff] %v12243_v58  ;;  %v12249_v31 = vsel %vm4754_vm7, %v4878_v32, %v4887_v12  ;;  %v4910_v50 = vrot.slane %v4908_v35, 1  ;;  %v4913_v46 = vrot.slane %v4911_v11, 2  ;;  %v4919_v36 = vrot.slane %v4917_v25, 1 }
 0x243   : > { %9933 = vmatprep.mubr.msk.bf16.mxu0 %vm3463_vm5, %v12238_v45  ;;  %v12253_v60 = vsel %vm4754_vm7, %v4887_v12, %v4896_v40  ;;  %v4905_v58 = vor.u32 %v4904_v0, %v4901_v43  ;;  %v4922_v53 = vrot.slane %v4920_v1, 2  ;;  %v5233_v32 = vrot.slane %v12059_v21, 2 }
 0x244   : > { %v4914_v38 = vor.u32 %v4913_v46, %v4910_v50  ;;  %v5235_v39 = vrot.slane %v12061_v8, 2  ;;  %v5237_v12 = vrot.slane %v12070_v30, 2  ;;  %v5239_v43 = vrot.slane %v12079_v29, 2 }
 0x245   : > { %v12261_v16 = vsel %vm4754_vm7, %v4896_v40, %v4905_v58  ;;  %v4923_v56 = vor.u32 %v4922_v53, %v4919_v36  ;;  %v12271_v21 = vsel %vm5229_vm8, %v5230_v63, %v5231_v7  ;;  %v12274_v8 = vsel %vm5229_vm8, %v5231_v7, %v5233_v32  ;;  %v12279_v53 = vld [vmem:[#allocation2 + $0x38] sm:$0xff]   ;;  %v12293_v7 = vld [vmem:[#allocation2 + $0x40] sm:$0xff]  }
 0x246   : > { %13883 = vst [vmem:[#allocation20_spill] sm:$0xff] %v12261_v16  ;;  %v12268_v34 = vsel %vm4754_vm7, %v4905_v58, %v4914_v38  ;;  %13885 = vst [vmem:[#allocation22_spill] sm:$0xff] %v12271_v21  ;;  %v12287_v29 = vsel %vm5229_vm8, %v5235_v39, %v5237_v12  ;;  %v5241_v62 = vrot.slane %v12081_v3, 2  ;;  %v5243_v63 = vrot.slane %v12089_v23, 2  ;;  %v3932_v40 = vld [vmem:[#allocation2] sm:$0xe] }
 0x247   : > { %13884 = vst [vmem:[#allocation21_spill] sm:$0xff] %v12268_v34  ;;  %13886 = vst [vmem:[#allocation23_spill] sm:$0xff] %v12274_v8  ;;  %v12284_v30 = vsel %vm4754_vm7, %v4914_v38, %v4923_v56  ;;  %v5245_v36 = vrot.slane %v12099_v18, 2  ;;  %v5247_v38 = vrot.slane %v12115_v19, 2  ;;  %v5249_v58 = vrot.slane %v12117_v17, 2  ;;  %v12438_v8 = vld [vmem:[#allocation2 + $0x50] sm:$0xff]  }
 0x248   : > { %10022 = vmatmul.mubr.msk.bf16.gmra.mrb[28].mxu1 %vm3463_vm5, %v12156_v57  ;;  %v12277_v57 = vsel %vm5229_vm8, %v5233_v32, %v5235_v39  ;;  %13888 = vst [vmem:[#allocation25_spill] sm:$0xff] %v12284_v30  ;;  %13889 = vst [vmem:[#allocation26_spill] sm:$0xff] %v12287_v29  ;;  %v12302_v35 = vsel %vm5229_vm8, %v5239_v43, %v5241_v62  ;;  %v5251_v11 = vrot.slane %v12140_v26, 2  ;;  %v5253_v3 = vrot.slane %v12159_v33, 2 }
 0x249   : > { %10025 = vmatprep.mubr.msk.bf16.mxu1 %vm3463_vm5, %v12168_v15  ;;  %13887 = vst [vmem:[#allocation24_spill] sm:$0xff] %v12277_v57  ;;  %v12290_v15 = vsel %vm5229_vm8, %v5237_v12, %v5239_v43  ;;  %13891 = vst [vmem:[#allocation28_spill] sm:$0xff] %v12302_v35  ;;  %v5255_v25 = vrot.slane %v12163_v5, 2  ;;  %v12308_v0 = vsel %vm5229_vm8, %v5241_v62, %v5243_v63  ;;  %v5257_v32 = vrot.slane %v12182_v41, 2  ;;  %v12433_v35 = vld [vmem:[#allocation2 + $0x48] sm:$0xff]  }
 0x24a   : > { %9934 = vmatmul.mubr.msk.bf16.gmra.mrb[76].mxu0 %vm3463_vm5, %v12279_v53  ;;  %13890 = vst [vmem:[#allocation27_spill] sm:$0xff] %v12290_v15  ;;  %13892 = vst [vmem:[#allocation29_spill] sm:$0xff] %v12308_v0  ;;  %v12311_v23 = vsel %vm5229_vm8, %v5243_v63, %v5245_v36  ;;  %v12314_v18 = vsel %vm5229_vm8, %v5245_v36, %v5247_v38  ;;  %v12317_v19 = vsel %vm5229_vm8, %v5247_v38, %v5249_v58  ;;  %v10766_v38 = vld [vmem:[#allocation2 + $0x4] sm:$0xf] }
 0x24b   : > { %9937 = vmatprep.mubr.msk.bf16.mxu0 %vm3463_vm5, %v12293_v7  ;;  %13893 = vst [vmem:[#allocation30_spill] sm:$0xff] %v12311_v23  ;;  %13894 = vst [vmem:[#allocation31_spill] sm:$0xff] %v12314_v18  ;;  %v12320_v1 = vsel %vm5229_vm8, %v5249_v58, %v5251_v11  ;;  %v12323_v50 = vsel %vm5229_vm8, %v5251_v11, %v5253_v3  ;;  %v12326_v46 = vsel %vm5229_vm8, %v5253_v3, %v5255_v25 }
 0x24c   : > { %13895 = vst [vmem:[#allocation32_spill] sm:$0xff] %v12317_v19  ;;  %13896 = vst [vmem:[#allocation33_spill] sm:$0xff] %v12320_v1  ;;  %v5259_v39 = vrot.slane %v12196_v47, 2  ;;  %v5261_v56 = vrot.slane %v12203_v44, 2  ;;  %v5263_v12 = vrot.slane %v12216_v13, 2  ;;  %v5265_v43 = vrot.slane %v12219_v59, 2 }
 0x24d   : > { %13897 = vst [vmem:[#allocation34_spill] sm:$0xff] %v12323_v50  ;;  %13898 = vst [vmem:[#allocation35_spill] sm:$0xff] %v12326_v46  ;;  %v13899_v62 = vrot.slane %v12140_v26, 1  ;;  %v13900_v63 = vrot.slane %v12117_v17, 1  ;;  %v9296_v58 = vcombine.low %v3932_v40, %v10766_v38  ;;  %v12341_v11 = vsel %vm5229_vm8, %v5255_v25, %v5257_v32  ;;  %v12360_v25 = vld [vmem:[#allocation2 + $0x14] sm:$0xf] }
 0x24e   : > { %13901 = vst [vmem:[#allocation36_spill] sm:$0xff] %v12341_v11  ;;  %v12345_v3 = vsel %vm5229_vm8, %v5257_v32, %v5259_v39  ;;  %v12348_v59 = vsel %vm5229_vm8, %v5259_v39, %v5261_v56  ;;  %v12354_v17 = vsel %vm5229_vm8, %v5263_v12, %v5265_v43  ;;  %v10768_v40 = vld [vmem:[#allocation2 + $0x50] sm:$0xff]   ;;  %v4436_v32 = vrot.slane %v12159_v33, 1  ;;  %v12430_v46 = vld [vmem:[#allocation2 + $0x40] sm:$0xff]  }
 0x24f   : > { %v4435_v36 = vsel %vm3945_vm6, %v13900_v63, %v13899_v62  ;;  %13902 = vst [vmem:[#allocation37_spill] sm:$0xff] %v12345_v3  ;;  %13903 = vst [vmem:[#allocation38_spill] sm:$0xff] %v12348_v59  ;;  %v12356_v62 = vld [vmem:[#allocation2 + $0x48] sm:$0xff]   ;;  %v4438_v39 = vrot.slane %v12163_v5, 1  ;;  %v4444_v43 = vrot.slane %v12203_v44, 1  ;;  %v3946_v38 = vrot.slane %v9296_v58, 1 }
 0x250   : > { %10026 = vmatmul.mubr.msk.bf16.gmra.mrb[32].mxu1 %vm3463_vm5, %v12173_v51  ;;  %v12351_v51 = vsel %vm5229_vm8, %v5261_v56, %v5263_v12  ;;  %13905 = vst [vmem:[#allocation40_spill] sm:$0xff] %v12354_v17  ;;  %v4440_v56 = vrot.slane %v12182_v41, 1  ;;  %v10700_v63 = vld [vmem:[#allocation2 + $0x98] ss:$0 sps:$4 sm:$0x11]   ;;  %v4442_v12 = vrot.slane %v12196_v47, 1 }
 0x251   : > { %10029 = vmatprep.mubr.msk.bf16.mxu1 %vm3463_vm5, %v4435_v36  ;;  %13904 = vst [vmem:[#allocation39_spill] sm:$0xff] %v12351_v51  ;;  %v4446_v36 = vrot.slane %v12216_v13, 1  ;;  %v3947_v17 = vrot.slane %v12122_v52, 1  ;;  %v3949_v51 = vrot.slane %v12130_v4, 1  ;;  %v5558_v59 = vld [vmem:[#allocation2 + $0x10] sm:$0xc]  ;;  %v4439_v47 = vsel %vm3945_vm6, %v4436_v32, %v4438_v39 }
 0x252   : > { %9938 = vmatmul.mubr.msk.bf16.gmra.mrb[80].mxu0 %vm3463_vm5, %v12356_v62  ;;  %v12373_v33 = vcombine.low %v5558_v59, %v12360_v25  ;;  %v13907_v5 = vrot.slane %v12140_v26, 1  ;;  %v4441_v44 = vsel %vm3945_vm6, %v4438_v39, %v4440_v56  ;;  %v4448_v13 = vrot.slane %v10700_v63, 1  ;;  %v12380_v58 = vld [vmem:[#allocation2 + $0x18] sm:$0xff]   ;;  %v12382_v52 = vld [vmem:[#allocation2 + $0x20] sm:$0xff]   ;;  %v12384_v4 = vld [vmem:[#allocation2 + $0x10] sm:$0x8] }
 0x253   : > { %9941 = vmatprep.mubr.msk.bf16.mxu0 %vm3463_vm5, %v10768_v40  ;;  %v4443_v59 = vsel %vm3945_vm6, %v4440_v56, %v4442_v12  ;;  %v12389_v40 = vsel %vm3945_vm6, %v4442_v12, %v4444_v43  ;;  %v12392_v26 = vsel %vm3945_vm6, %v4444_v43, %v4446_v36  ;;  %v12406_v56 = vsel %vm3945_vm6, %v3947_v17, %v3949_v51 }
 0x254   : > { %13906 = vst [vmem:[#allocation41_spill] sm:$0xff] %v12373_v33  ;;  %v4437_v41 = vsel %vm3945_vm6, %v13907_v5, %v4436_v32  ;;  %v12394_v32 = vld [vmem:[#allocation2 + $0x28] sm:$0xff]   ;;  %v12400_v63 = vsel %vm3945_vm6, %v4446_v36, %v4448_v13  ;;  %v12403_v5 = vsel %vm3945_vm6, %v3946_v38, %v3947_v17  ;;  %v13908_v12 = vrot.slane %v12178_v9, 1  ;;  %v12416_v36 = vld [vmem:[#allocation2 + $0x30] sm:$0xff]   ;;  %v12421_v17 = vld [vmem:[#allocation2 + $0x38] sm:$0xff]  }
 0x255   : > { %v6040_v38 = vshrl.u32 %v12373_v33, 16  ;;  %v6048_v13 = vshrl.u32 %v12380_v58, 16  ;;  %v6066_v3 = vshrl.u32 %v12394_v32, 16  ;;  %v6069_v11 = vshll.u32 %v12394_v32, 16 }
 0x256   : > { %v12411_v43 = vsel %vm3945_vm6, %v3949_v51, %v13908_v12  ;;  %v6043_v51 = vshll.u32 %v12373_v33, 16  ;;  %v6051_v12 = vshll.u32 %v12380_v58, 16  ;;  %v6075_v0 = vshrl.u32 %v12416_v36, 16 }
 0x257   : > { %v6042_v39 = vrot.slane %v6040_v38, 2  ;;  %v6050_v50 = vrot.slane %v6048_v13, 2  ;;  %v6068_v18 = vrot.slane %v6066_v3, 2  ;;  %v6071_v23 = vrot.slane %v6069_v11, 3  ;;  %v12442_v11 = vld [vmem:[#allocation2 + $0x58] sm:$0xff]  }
 0x258   : > { %10030 = vmatmul.mubr.msk.bf16.gmra.mrb[0].mxu1 %vm3463_vm5, %v4437_v41  ;;  %v10769_v41 = vld [vmem:[#allocation2 + $0x58] sm:$0xff]   ;;  %v6053_v1 = vrot.slane %v6051_v12, 3  ;;  %v6078_v29 = vshll.u32 %v12416_v36, 16  ;;  %v6084_v57 = vshrl.u32 %v12421_v17, 16  ;;  %v6077_v12 = vrot.slane %v6075_v0, 2 }
 0x259   : > { %10033 = vmatprep.mubr.msk.bf16.mxu1 %vm3463_vm5, %v4439_v47  ;;  %v6060_v47 = vshll.u32 %v12382_v52, 16  ;;  %v6072_v13 = vor.u32 %v6071_v23, %v6068_v18  ;;  %v6087_v3 = vshll.u32 %v12421_v17, 16  ;;  %v6096_v18 = vshll.u32 %v12430_v46, 16 }
 0x25a   : > { %9942 = vmatmul.mubr.msk.bf16.gmra.mrb[84].mxu0 %vm3463_vm5, %v10769_v41  ;;  %v6057_v41 = vshrl.u32 %v12382_v52, 16  ;;  %v6054_v15 = vor.u32 %v6053_v1, %v6050_v50  ;;  %v6080_v1 = vrot.slane %v6078_v29, 3  ;;  %v6086_v50 = vrot.slane %v6084_v57, 2 }
 0x25b   : > { %9945 = vmatprep.mubr.msk.bf16.mxu0 %vm3463_vm5, %v11922_v28  ;;  %v6045_v28 = vrot.slane %v6043_v51, 3  ;;  %v6062_v33 = vrot.slane %v6060_v47, 3  ;;  %v6093_v47 = vshrl.u32 %v12430_v46, 16  ;;  %v6089_v23 = vrot.slane %v6087_v3, 3 }
 0x25c   : > { %v6059_v19 = vrot.slane %v6057_v41, 2  ;;  %v10770_v41 = vld [vmem:[#allocation2 + $0x68] sm:$0xff]   ;;  %v6081_v57 = vor.u32 %v6080_v1, %v6077_v12  ;;  %v6114_v3 = vshll.u32 %v12438_v8, 16  ;;  %v6120_v12 = vshrl.u32 %v12442_v11, 16  ;;  %v12470_v1 = vld [vmem:[#allocation2 + $0x70] sm:$0xff]  }
 0x25d   : > { %v6046_v38 = vor.u32 %v6045_v28, %v6042_v39  ;;  %v6095_v29 = vrot.slane %v6093_v47, 2  ;;  %v12462_v28 = vld [vmem:[#allocation2 + $0x68] sm:$0xff]   ;;  %v6123_v30 = vshll.u32 %v12442_v11, 16 }
 0x25e   : > { %v6063_v51 = vor.u32 %v6062_v33, %v6059_v19  ;;  %v12458_v33 = vld [vmem:[#allocation2 + $0x60] sm:$0xff]   ;;  %v6122_v21 = vrot.slane %v6120_v12, 2  ;;  %v6147_v12 = vshrl.u32 %v12470_v1, 16 }
 0x25f   : > { %v12445_v39 = vsel %vm6038_vm9, %v6046_v38, %v6054_v15  ;;  %v6098_v38 = vrot.slane %v6096_v18, 3 }
 0x260   : > { %10034 = vmatmul.mubr.msk.bf16.gmra.mrb[4].mxu1 %vm3463_vm5, %v4441_v44  ;;  %13909 = vst [vmem:[#allocation42_spill] sm:$0xff] %v12445_v39  ;;  %v12450_v19 = vsel %vm6038_vm9, %v6054_v15, %v6063_v51  ;;  %v12453_v0 = vsel %vm6038_vm9, %v6063_v51, %v6072_v13  ;;  %v6102_v44 = vshrl.u32 %v12433_v35, 16  ;;  %v6090_v15 = vor.u32 %v6089_v23, %v6086_v50  ;;  %v12475_v23 = vld [vmem:[#allocation2 + $0x78] sm:$0xff]  }
 0x261   : > { %10037 = vmatprep.mubr.msk.bf16.mxu1 %vm3463_vm5, %v4443_v59  ;;  %13910 = vst [vmem:[#allocation43_spill] sm:$0xff] %v12450_v19  ;;  %13911 = vst [vmem:[#allocation44_spill] sm:$0xff] %v12453_v0  ;;  %v6105_v59 = vshll.u32 %v12433_v35, 16  ;;  %v6111_v51 = vshrl.u32 %v12438_v8, 16  ;;  %v6099_v19 = vor.u32 %v6098_v38, %v6095_v29  ;;  %v6116_v50 = vrot.slane %v6114_v3, 3 }
 0x262   : > { %9946 = vmatmul.mubr.msk.bf16.gmra.mrb[88].mxu0 %vm3463_vm5, %v10770_v41  ;;  %v12467_v41 = vsel %vm6038_vm9, %v6072_v13, %v6081_v57  ;;  %v12473_v47 = vsel %vm6038_vm9, %v6081_v57, %v6090_v15  ;;  %v6129_v13 = vshrl.u32 %v12458_v33, 16  ;;  %v6132_v29 = vshll.u32 %v12458_v33, 16 }
 0x263   : > { %9949 = vmatprep.mubr.msk.bf16.mxu0 %vm3463_vm5, %v11972_v20  ;;  %13912 = vst [vmem:[#allocation45_spill] sm:$0xff] %v12467_v41  ;;  %v6104_v20 = vrot.slane %v6102_v44, 2  ;;  %v6107_v0 = vrot.slane %v6105_v59, 3  ;;  %13913 = vst [vmem:[#allocation46_spill] sm:$0xff] %v12473_v47  ;;  %v6113_v39 = vrot.slane %v6111_v51, 2  ;;  %v12481_v44 = vld [vmem:[#allocation2 + $0x80] sm:$0xff]   ;;  %v12484_v59 = vsel %vm6038_vm9, %v6090_v15, %v6099_v19 }
 0x264   : > { %13914 = vst [vmem:[#allocation47_spill] sm:$0xff] %v12484_v59  ;;  %v6138_v38 = vshrl.u32 %v12462_v28, 16  ;;  %v6125_v51 = vrot.slane %v6123_v30, 3  ;;  %v6131_v3 = vrot.slane %v6129_v13, 2  ;;  %v6156_v13 = vshrl.u32 %v12475_v23, 16 }
 0x265   : > { %v6108_v18 = vor.u32 %v6107_v0, %v6104_v20  ;;  %v6117_v57 = vor.u32 %v6116_v50, %v6113_v39  ;;  %v6134_v39 = vrot.slane %v6132_v29, 3  ;;  %v6150_v50 = vshll.u32 %v12470_v1, 16 }
 0x266   : > { %v6140_v20 = vrot.slane %v6138_v38, 2  ;;  %v6159_v29 = vshll.u32 %v12475_v23, 16  ;;  %v6165_v38 = vshrl.u32 %v12481_v44, 16 }
 0x267   : > { %v12491_v0 = vsel %vm6038_vm9, %v6099_v19, %v6108_v18  ;;  %v12497_v15 = vsel %vm6038_vm9, %v6108_v18, %v6117_v57  ;;  %v6126_v19 = vor.u32 %v6125_v51, %v6122_v21  ;;  %v6149_v18 = vrot.slane %v6147_v12, 2 }
 0x268   : > { %10038 = vmatmul.mubr.msk.bf16.gmra.mrb[8].mxu1 %vm3463_vm5, %v12389_v40  ;;  %13915 = vst [vmem:[#allocation48_spill] sm:$0xff] %v12491_v0  ;;  %v6141_v40 = vshll.u32 %v12462_v28, 16  ;;  %13916 = vst [vmem:[#allocation49_spill] sm:$0xff] %v12497_v15  ;;  %v12506_v0 = vld [vmem:[#allocation2 + $0x90] sm:$0xff]   ;;  %v12510_v15 = vld [vmem:[#allocation2 + $0x98] sm:$0xff]   ;;  %v6152_v21 = vrot.slane %v6150_v50, 3 }
 0x269   : > { %10041 = vmatprep.mubr.msk.bf16.mxu1 %vm3463_vm5, %v12392_v26  ;;  %v12502_v26 = vld [vmem:[#allocation2 + $0x88] sm:$0xff]   ;;  %v6158_v51 = vrot.slane %v6156_v13, 2  ;;  %v6161_v47 = vrot.slane %v6159_v29, 3  ;;  %v6167_v41 = vrot.slane %v6165_v38, 2  ;;  %v6186_v50 = vshll.u32 %v12506_v0, 16 }
 0x26a   : > { %9950 = vmatmul.mubr.msk.bf16.gmra.mrb[92].mxu0 %vm3463_vm5, %v11987_v54  ;;  %v6143_v30 = vrot.slane %v6141_v40, 3  ;;  %v6135_v54 = vor.u32 %v6134_v39, %v6131_v3  ;;  %v6168_v3 = vshll.u32 %v12481_v44, 16  ;;  %v6153_v12 = vor.u32 %v6152_v21, %v6149_v18 }
 0x26b   : > { %9953 = vmatprep.mubr.msk.bf16.mxu0 %vm3463_vm5, %v12023_v2  ;;  %v12513_v2 = vsel %vm6038_vm9, %v6117_v57, %v6126_v19  ;;  %v6174_v34 = vshrl.u32 %v12502_v26, 16  ;;  %v6177_v16 = vshll.u32 %v12502_v26, 16  ;;  %v12524_v57 = vld [vmem:[#allocation2 + $0xa0] ss:$0 sps:$4 sm:$0x77]   ;;  %v6192_v29 = vshrl.u32 %v12510_v15, 16 }
 0x26c   : > { %v6144_v59 = vor.u32 %v6143_v30, %v6140_v20  ;;  %v12516_v40 = vsel %vm6038_vm9, %v6126_v19, %v6135_v54  ;;  %v6162_v20 = vor.u32 %v6161_v47, %v6158_v51  ;;  %v6170_v19 = vrot.slane %v6168_v3, 3 }
 0x26d   : > { %v6183_v30 = vshrl.u32 %v12506_v0, 16  ;;  %v6179_v18 = vrot.slane %v6177_v16, 3  ;;  %v6188_v21 = vrot.slane %v6186_v50, 3  ;;  %v6194_v51 = vrot.slane %v6192_v29, 2  ;;  %v10702_v50 = vld [vmem:[#allocation6 + $0xa8] sm:$0xff]  }
 0x26e   : > { %v12520_v39 = vsel %vm6038_vm9, %v6135_v54, %v6144_v59  ;;  %v12533_v13 = vsel %vm6038_vm9, %v6144_v59, %v6153_v12  ;;  %v6176_v54 = vrot.slane %v6174_v34, 2  ;;  %v6171_v47 = vor.u32 %v6170_v19, %v6167_v41 }
 0x26f   : > { %v6185_v38 = vrot.slane %v6183_v30, 2  ;;  %v6195_v59 = vshll.u32 %v12510_v15, 16  ;;  %v6201_v16 = vshrl.u32 %v12524_v57, 16  ;;  %v6517_v29 = vrot.slane %v12382_v52, 3 }
 0x270   : > { %10042 = vmatmul.mubr.msk.bf16.gmra.mrb[12].mxu1 %vm3463_vm5, %v12400_v63  ;;  %v12539_v63 = vsel %vm6038_vm9, %v6153_v12, %v6162_v20  ;;  %v12546_v34 = vsel %vm6038_vm9, %v6162_v20, %v6171_v47  ;;  %v6515_v20 = vrot.slane %v12380_v58, 3 }
 0x271   : > { %10053 = vmatprep.mubr.msk.bf16.mxu1 %vm3463_vm5, %v12094_v37  ;;  %v6180_v37 = vor.u32 %v6179_v18, %v6176_v54  ;;  %v6189_v3 = vor.u32 %v6188_v21, %v6185_v38  ;;  %v6197_v12 = vrot.slane %v6195_v59, 3  ;;  %v6203_v19 = vrot.slane %v6201_v16, 2 }
 0x272   : > { %9954 = vmatmul.mubr.msk.bf16.gmra.mrb[96].mxu0 %vm3463_vm5, %v12036_v42  ;;  %v6204_v42 = vshll.u32 %v12524_v57, 16  ;;  %v6519_v21 = vrot.slane %v12394_v32, 3  ;;  %v6523_v59 = vrot.slane %v12421_v17, 3  ;;  %v6525_v16 = vrot.slane %v12430_v46, 3 }
 0x273   : > { %9965 = vmatprep.mubr.msk.bf16.mxu0 %vm3463_vm5, %v12403_v5  ;;  %v12550_v41 = vsel %vm6038_vm9, %v6171_v47, %v6180_v37  ;;  %v13917_v5 = vcombine.low %v12384_v4, %v12360_v25  ;;  %v12556_v54 = vsel %vm6038_vm9, %v6180_v37, %v6189_v3  ;;  %v6198_v38 = vor.u32 %v6197_v12, %v6194_v51 }
 0x274   : > { %v6206_v18 = vrot.slane %v6204_v42, 3  ;;  %v6521_v47 = vrot.slane %v12416_v36, 3  ;;  %v12569_v37 = vsel %vm6513_vm10, %v6515_v20, %v6517_v29  ;;  %v12579_v42 = vsel %vm6513_vm10, %v6517_v29, %v6519_v21 }
 0x275   : > { %v6514_v30 = vrot.slane %v13917_v5, 3  ;;  %v12576_v51 = vsel %vm6038_vm9, %v6189_v3, %v6198_v38  ;;  %v6527_v12 = vrot.slane %v12433_v35, 3  ;;  %v12594_v3 = vsel %vm6513_vm10, %v6523_v59, %v6525_v16 }
 0x276   : > { %v6207_v25 = vor.u32 %v6206_v18, %v6203_v19  ;;  %v10703_v19 = vld [vmem:[#allocation6 + $0xb0] sm:$0xff]   ;;  %v6529_v5 = vrot.slane %v12438_v8, 3  ;;  %v6533_v18 = vrot.slane %v12458_v33, 3 }
 0x277   : > { %v12566_v4 = vsel %vm6513_vm10, %v6514_v30, %v6515_v20  ;;  %v12600_v30 = vsel %vm6513_vm10, %v6525_v16, %v6527_v12  ;;  %v6535_v20 = vrot.slane %v12462_v28, 3  ;;  %v6543_v16 = vrot.slane %v12502_v26, 3 }
 0x278   : > { %10054 = vmatmul.mubr.msk.bf16.vlgmr.msra.gmra.mrb[16].mxu1 %vm3463_vm5, %v12102_v49  ;;  %v12582_v49 = vsel %vm6513_vm10, %v6519_v21, %v6521_v47  ;;  %13918 = vst [vmem:[#allocation50_spill] sm:$0xff] %v12600_v30  ;;  %v12606_v29 = vsel %vm6513_vm10, %v6527_v12, %v6529_v5  ;;  %v6539_v21 = vrot.slane %v12475_v23, 3  ;;  %v10704_v12 = vld [vmem:[#allocation6 + $0xb8] sm:$0xff]  }
 0x279   : > { %10090 = vmatpush3.bf16.msra.mxu1 %v12184_v48  ;;  %10057 = vmatprep.mubr.msk.bf16.mxu1 %vm3463_vm5, %v12120_v14  ;;  %v12588_v48 = vsel %vm6038_vm9, %v6198_v38, %v6207_v25  ;;  %v12591_v14 = vsel %vm6513_vm10, %v6521_v47, %v6523_v59  ;;  %13919 = vst [vmem:[#allocation51_spill] sm:$0xff] %v12606_v29  ;;  %v6537_v38 = vrot.slane %v12470_v1, 3  ;;  %v6541_v47 = vrot.slane %v12481_v44, 3 }
 0x27a   : > { %9966 = vmatmul.mubr.msk.bf16.vlgmr.msra.gmra.mrb[64].mxu0 %vm3463_vm5, %v12406_v56  ;;  %10091 = vmatprep.subr.bf16.mxu1 %v10702_v50  ;;  %v6531_v56 = vrot.slane %v12442_v11, 3  ;;  %v12618_v25 = vsel %vm6513_vm10, %v6533_v18, %v6535_v20 }
 0x27b   : > { %9969 = vmatprep.mubr.msk.bf16.mxu0 %vm3463_vm5, %v12411_v43  ;;  %13920 = vst [vmem:[#allocation52_spill] sm:$0xff] %v12618_v25  ;;  %v12622_v29 = vsel %vm6513_vm10, %v6535_v20, %v6537_v38  ;;  %v12625_v30 = vsel %vm6513_vm10, %v6537_v38, %v6539_v21  ;;  %v6549_v25 = vrot.slane %v12524_v57, 3  ;;  %v13923_v38 = vrot.slane %v12192_v27, 1 }
 0x27c   : > { %v12612_v43 = vsel %vm6513_vm10, %v6529_v5, %v6531_v56  ;;  %v12615_v59 = vsel %vm6513_vm10, %v6531_v56, %v6533_v18  ;;  %v6545_v5 = vrot.slane %v12506_v0, 3  ;;  %v12632_v56 = vsel %vm6513_vm10, %v6541_v47, %v6543_v16 }
 0x27d   : > { %10092 = vmatpush3.bf16.msra.mxu1 %v10702_v50  ;;  %v12628_v50 = vsel %vm6513_vm10, %v6539_v21, %v6541_v47  ;;  %13921 = vst [vmem:[#allocation53_spill] sm:$0xff] %v12632_v56  ;;  %v6547_v18 = vrot.slane %v12510_v15, 3  ;;  %v13924_v21 = vrot.slane %v12178_v9, 1  ;;  %v3957_v9 = vrot.slane %v12238_v45, 1 }
 0x27e   : > { %10093 = vmatprep.subr.bf16.mxu1 %v10703_v19  ;;  %v12639_v20 = vsel %vm6513_vm10, %v6543_v16, %v6545_v5  ;;  %v13926_v16 = vmov %v13923_v38  ;;  %v3961_v45 = vrot.slane %v12293_v7, 1  ;;  %v13930_v7 = vld [vmem:[#allocation17_spill] sm:$0xff] }
 0x27f   : > { %13922 = vst [vmem:[#allocation54_spill] sm:$0xff] %v12639_v20  ;;  %v3954_v47 = vsel %vm3945_vm6, %v13924_v21, %v13923_v38  ;;  %v12649_v56 = vsel %vm6513_vm10, %v6545_v5, %v6547_v18  ;;  %v12652_v57 = vsel %vm6513_vm10, %v6547_v18, %v6549_v25  ;;  %v10707_v20 = vld [vmem:[#allocation6 + $0xc0] sm:$0xff]   ;;  %v13933_v38 = vmov 0   ;;  %v13934_v21 = vld [vmem:[#allocation18_spill] sm:$0xff] }
 0x280   : > { %10058 = vmatmul.mubr.msk.bf16.gmra.mrb[20].mxu1 %vm3463_vm5, %v12127_v55  ;;  %v13925_v55 = vrot.slane %v12233_v24, 1 }
 0x281   : > { %10061 = vmatprep.mubr.msk.bf16.mxu1 %vm3463_vm5, %v12145_v10  ;;  %10094 = vmatpush3.bf16.msra.mxu1 %v10703_v19  ;;  %v3959_v19 = vrot.slane %v12279_v53, 1  ;;  %v3963_v53 = vrot.slane %v12356_v62, 1  ;;  %v13931_v62 = vld [vmem:[#allocation14_spill] sm:$0xff] }
 0x282   : > { %9970 = vmatmul.mubr.msk.bf16.gmra.mrb[68].mxu0 %vm3463_vm5, %v3954_v47  ;;  %v3956_v10 = vsel %vm3945_vm6, %v13926_v16, %v13925_v55  ;;  %10095 = vmatprep.subr.bf16.mxu1 %v10704_v12  ;;  %v13927_v27 = vmov %v13925_v55  ;;  %v13932_v18 = vrot.slane %v13931_v62, 1  ;;  %v13935_v47 = vld [vmem:[#allocation19_spill] sm:$0xff]  ;;  %v13936_v55 = vld [vmem:[#allocation20_spill] sm:$0xff]  ;;  %v13937_v16 = vld [vmem:[#allocation21_spill] sm:$0xff] }
 0x283   : > { %9973 = vmatprep.mubr.msk.bf16.mxu0 %vm3463_vm5, %v3956_v10  ;;  %v3958_v25 = vsel %vm3945_vm6, %v13927_v27, %v3957_v9  ;;  %v3960_v5 = vsel %vm3945_vm6, %v3957_v9, %v3959_v19  ;;  %v3964_v24 = vsel %vm3945_vm6, %v3961_v45, %v3963_v53  ;;  %v13938_v10 = vld [vmem:[#allocation25_spill] sm:$0xff]  ;;  %v13939_v9 = vld [vmem:[#allocation22_spill] sm:$0xff]  ;;  %v13940_v27 = vld [vmem:[#allocation23_spill] sm:$0xff] }
 0x284   : > { %v13950_v62 = vld [vmem:[#allocation34_spill] sm:$0xff] }
 0x285   : > { %10096 = vmatpush3.bf16.msra.mxu1 %v10704_v12  ;;  %v13929_v12 = vld [vmem:[#allocation16_spill] sm:$0xff] }
 0x286   : > { %10133 = vmatprep.subr.bf16.mxu1 %v10707_v20 }
 0x288   : > { %10062 = vmatmul.mubr.msk.bf16.gmra.mrb[24].mxu1 %vm3463_vm5, %v12151_v61  ;;  %v13928_v61 = vld [vmem:[#allocation15_spill] sm:$0xff] }
 0x289   : > { %10065 = vmatprep.mubr.msk.bf16.mxu1 %vm3463_vm5, %v12176_v22  ;;  %v3962_v22 = vsel %vm3945_vm6, %v3959_v19, %v3961_v45  ;;  %v10708_v19 = vld [vmem:[#allocation6 + $0xc8] sm:$0xff]   ;;  %v13943_v45 = vld [vmem:[#allocation27_spill] sm:$0xff] }
 0x28a   : > { %9974 = vmatmul.mubr.msk.bf16.gmra.mrb[72].mxu0 %vm3463_vm5, %v3958_v25  ;;  %v10710_v25 = vld [vmem:[#allocation6 + $0xd8] sm:$0xff]  }
 0x28b   : > { %9977 = vmatprep.mubr.msk.bf16.mxu0 %vm3463_vm5, %v3960_v5  ;;  %v13942_v5 = vld [vmem:[#allocation26_spill] sm:$0xff] }
 0x290   : > { %10066 = vmatmul.mubr.msk.bf16.gmra.mrb[28].mxu1 %vm3463_vm5, %v12187_v6  ;;  %v3966_v6 = vsel %vm3945_vm6, %v3963_v53, %v13932_v18  ;;  %v10713_v53 = vld [vmem:[#allocation6 + $0xe0] sm:$0xff]   ;;  %v13951_v18 = vld [vmem:[#allocation35_spill] sm:$0xff] }
 0x291   : > { %10069 = vmatprep.mubr.msk.bf16.mxu1 %vm3463_vm5, %v13928_v61  ;;  %v13945_v61 = vld [vmem:[#allocation29_spill] sm:$0xff] }
 0x292   : > { %9978 = vmatmul.mubr.msk.bf16.gmra.mrb[76].mxu0 %vm3463_vm5, %v3962_v22  ;;  %v13946_v22 = vld [vmem:[#allocation30_spill] sm:$0xff] }
 0x293   : > { %9981 = vmatprep.mubr.msk.bf16.mxu0 %vm3463_vm5, %v3964_v24  ;;  %v13947_v24 = vld [vmem:[#allocation31_spill] sm:$0xff] }
 0x298   : > { %10070 = vmatmul.mubr.msk.bf16.gmra.mrb[32].mxu1 %vm3463_vm5, %v13929_v12  ;;  %v13948_v12 = vld [vmem:[#allocation32_spill] sm:$0xff] }
 0x299   : > { %10073 = vmatprep.mubr.msk.bf16.mxu1 %vm3463_vm5, %v13930_v7  ;;  %v13949_v7 = vld [vmem:[#allocation33_spill] sm:$0xff] }
 0x29a   : > { %9982 = vmatmul.mubr.msk.bf16.gmra.mrb[80].mxu0 %vm3463_vm5, %v3966_v6  ;;  %v13952_v6 = vld [vmem:[#allocation36_spill] sm:$0xff] }
 0x29b   : > { %8755 = vmatprep.mubr.bf16.mxu0 %v13933_v38 }
 0x2a0   : > { %10074 = vmatmul.mubr.msk.bf16.gmra.mrb[0].mxu1 %vm3463_vm5, %v13934_v21  ;;  %v13953_v21 = vld [vmem:[#allocation37_spill] sm:$0xff] }
 0x2a1   : > { %10077 = vmatprep.mubr.msk.bf16.mxu1 %vm3463_vm5, %v13935_v47  ;;  %v13954_v47 = vld [vmem:[#allocation38_spill] sm:$0xff] }
 0x2a8   : > { %10078 = vmatmul.mubr.msk.bf16.gmra.mrb[4].mxu1 %vm3463_vm5, %v12249_v31  ;;  %v13941_v31 = vld [vmem:[#allocation24_spill] sm:$0xff] }
 0x2a9   : > { %10081 = vmatprep.mubr.msk.bf16.mxu1 %vm3463_vm5, %v12253_v60  ;;  %v10709_v60 = vld [vmem:[#allocation6 + $0xd0] sm:$0xff]  }
 0x2b0   : > { %10082 = vmatmul.mubr.msk.bf16.gmra.mrb[8].mxu1 %vm3463_vm5, %v13936_v55  ;;  %v13955_v55 = vld [vmem:[#allocation39_spill] sm:$0xff] }
 0x2b1   : > { %10085 = vmatprep.mubr.msk.bf16.mxu1 %vm3463_vm5, %v13937_v16  ;;  %v5698_v16 = vrot.slane %v12380_v58, 2 }
 0x2b8   : > { %10086 = vmatmul.mubr.msk.bf16.gmra.mrb[12].mxu1 %vm3463_vm5, %v13938_v10  ;;  %v13956_v10 = vld [vmem:[#allocation41_spill] sm:$0xff] }
 0x2b9   : > { %10097 = vmatprep.mubr.msk.bf16.mxu1 %vm3463_vm5, %v13939_v9  ;;  %v5697_v9 = vrot.slane %v13956_v10, 2 }
 0x2c0   : > { %10098 = vmatmul.mubr.msk.bf16.vlgmr.msra.gmra.mrb[16].mxu1 %vm3463_vm5, %v13940_v27  ;;  %v5699_v27 = vsel %vm5229_vm8, %v5697_v9, %v5698_v16 }
 0x2c1   : > { %10134 = vmatpush3.bf16.msra.mxu1 %v10707_v20  ;;  %10101 = vmatprep.mubr.msk.bf16.mxu1 %vm3463_vm5, %v13941_v31  ;;  %v13944_v20 = vld [vmem:[#allocation28_spill] sm:$0xff]  ;;  %v5700_v31 = vrot.slane %v12382_v52, 2  ;;  %v10730_v52 = vld [vmem:[#allocation6 + $0xf8] sm:$0xff]  }
 0x2c2   : > { %10135 = vmatprep.subr.bf16.mxu1 %v10708_v19 }
 0x2c5   : > { %10136 = vmatpush3.bf16.msra.mxu1 %v10708_v19  ;;  %v13957_v19 = vld [vmem:[#allocation40_spill] sm:$0xff] }
 0x2c6   : > { %10137 = vmatprep.subr.bf16.mxu1 %v10709_v60 }
 0x2c8   : > { %10102 = vmatmul.mubr.msk.bf16.gmra.mrb[20].mxu1 %vm3463_vm5, %v13942_v5  ;;  %v5701_v5 = vsel %vm5229_vm8, %v5698_v16, %v5700_v31 }
 0x2c9   : > { %10105 = vmatprep.mubr.msk.bf16.mxu1 %vm3463_vm5, %v13943_v45  ;;  %10138 = vmatpush3.bf16.msra.mxu1 %v10709_v60  ;;  %v5702_v60 = vrot.slane %v12394_v32, 2  ;;  %v10725_v45 = vld [vmem:[#allocation6 + $0xf0] sm:$0xff]  }
 0x2ca   : > { %10139 = vmatprep.subr.bf16.mxu1 %v10710_v25 }
 0x2cb   : > { %v5703_v58 = vsel %vm5229_vm8, %v5700_v31, %v5702_v60 }
 0x2cd   : > { %10140 = vmatpush3.bf16.msra.mxu1 %v10710_v25  ;;  %v10720_v25 = vld [vmem:[#allocation6 + $0xe8] sm:$0xff]  }
 0x2ce   : > { %10177 = vmatprep.subr.bf16.mxu1 %v10713_v53 }
 0x2d0   : > { %10106 = vmatmul.mubr.msk.bf16.gmra.mrb[24].mxu1 %vm3463_vm5, %v13944_v20  ;;  %v5704_v20 = vrot.slane %v12416_v36, 2  ;;  %v5710_v36 = vrot.slane %v12433_v35, 2 }
 0x2d1   : > { %10109 = vmatprep.mubr.msk.bf16.mxu1 %vm3463_vm5, %v13945_v61  ;;  %v5706_v61 = vrot.slane %v12421_v17, 2 }
 0x2d2   : > { %v5705_v32 = vsel %vm5229_vm8, %v5702_v60, %v5704_v20 }
 0x2d8   : > { %10110 = vmatmul.mubr.msk.bf16.gmra.mrb[28].mxu1 %vm3463_vm5, %v13946_v22  ;;  %v5707_v22 = vsel %vm5229_vm8, %v5704_v20, %v5706_v61 }
 0x2d9   : > { %10113 = vmatprep.mubr.msk.bf16.mxu1 %vm3463_vm5, %v13947_v24  ;;  %v5708_v24 = vrot.slane %v12430_v46, 2  ;;  %v5716_v46 = vrot.slane %v12458_v33, 2 }
 0x2db   : > { %v5709_v17 = vsel %vm5229_vm8, %v5706_v61, %v5708_v24 }
 0x2e0   : > { %10114 = vmatmul.mubr.msk.bf16.gmra.mrb[32].mxu1 %vm3463_vm5, %v13948_v12  ;;  %v5711_v12 = vsel %vm5229_vm8, %v5708_v24, %v5710_v36 }
 0x2e1   : > { %10117 = vmatprep.mubr.msk.bf16.mxu1 %vm3463_vm5, %v13949_v7  ;;  %v5712_v7 = vrot.slane %v12438_v8, 2 }
 0x2e8   : > { %10118 = vmatmul.mubr.msk.bf16.gmra.mrb[0].mxu1 %vm3463_vm5, %v13950_v62  ;;  %v5714_v62 = vrot.slane %v12442_v11, 2  ;;  %v5720_v11 = vrot.slane %v12470_v1, 2  ;;  %v5724_v1 = vrot.slane %v12481_v44, 2  ;;  %v5728_v44 = vrot.slane %v12506_v0, 2 }
 0x2e9   : > { %10121 = vmatprep.mubr.msk.bf16.mxu1 %vm3463_vm5, %v13951_v18  ;;  %v5713_v18 = vsel %vm5229_vm8, %v5710_v36, %v5712_v7 }
 0x2ea   : > { %v5715_v35 = vsel %vm5229_vm8, %v5712_v7, %v5714_v62  ;;  %v13961_v7 = vld [vmem:[#allocation42_spill] sm:$0xff] }
 0x2f0   : > { %10122 = vmatmul.mubr.msk.bf16.gmra.mrb[4].mxu1 %vm3463_vm5, %v13952_v6  ;;  %v5718_v6 = vrot.slane %v12462_v28, 2 }
 0x2f1   : > { %10125 = vmatprep.mubr.msk.bf16.mxu1 %vm3463_vm5, %v13953_v21  ;;  %v5717_v21 = vsel %vm5229_vm8, %v5714_v62, %v5716_v46 }
 0x2f2   : > { %v5719_v8 = vsel %vm5229_vm8, %v5716_v46, %v5718_v6  ;;  %v5721_v33 = vsel %vm5229_vm8, %v5718_v6, %v5720_v11 }
 0x2f8   : > { %10126 = vmatmul.mubr.msk.bf16.gmra.mrb[8].mxu1 %vm3463_vm5, %v13954_v47  ;;  %v5722_v47 = vrot.slane %v12475_v23, 2  ;;  %v5726_v23 = vrot.slane %v12502_v26, 2 }
 0x2f9   : > { %10129 = vmatprep.mubr.msk.bf16.mxu1 %vm3463_vm5, %v13955_v55 }
 0x2fa   : > { %v5723_v9 = vsel %vm5229_vm8, %v5720_v11, %v5722_v47  ;;  %v5725_v60 = vsel %vm5229_vm8, %v5722_v47, %v5724_v1  ;;  %v5729_v61 = vsel %vm5229_vm8, %v5726_v23, %v5728_v44  ;;  %v10736_v11 = vld [vmem:[#allocation6 + $0x110] sm:$0xff]  }
 0x300   : > { %10130 = vmatmul.mubr.msk.bf16.gmra.mrb[12].mxu1 %vm3463_vm5, %v13957_v19 }
 0x301   : > { %10141 = vmatprep.mubr.msk.bf16.mxu1 %vm3463_vm5, %v5699_v27 }
 0x308   : > { %10142 = vmatmul.mubr.msk.bf16.vlgmr.msra.gmra.mrb[16].mxu1 %vm3463_vm5, %v5701_v5  ;;  %v5727_v5 = vsel %vm5229_vm8, %v5724_v1, %v5726_v23 }
 0x309   : > { %10178 = vmatpush3.bf16.msra.mxu1 %v10713_v53  ;;  %10145 = vmatprep.mubr.msk.bf16.mxu1 %vm3463_vm5, %v5703_v58  ;;  %v12758_v53 = vld [vmem:[#allocation6 + $0x100] sm:$0xff]  }
 0x30a   : > { %10179 = vmatprep.subr.bf16.mxu1 %v10720_v25 }
 0x30d   : > { %10180 = vmatpush3.bf16.msra.mxu1 %v10720_v25 }
 0x30e   : > { %10181 = vmatprep.subr.bf16.mxu1 %v10725_v45 }
 0x310   : > { %10146 = vmatmul.mubr.msk.bf16.gmra.mrb[20].mxu1 %vm3463_vm5, %v5705_v32 }
 0x311   : > { %10149 = vmatprep.mubr.msk.bf16.mxu1 %vm3463_vm5, %v5707_v22  ;;  %10182 = vmatpush3.bf16.msra.mxu1 %v10725_v45  ;;  %v5730_v45 = vrot.slane %v12510_v15, 2 }
 0x312   : > { %10183 = vmatprep.subr.bf16.mxu1 %v10730_v52 }
 0x313   : > { %v5731_v22 = vsel %vm5229_vm8, %v5728_v44, %v5730_v45  ;;  %v13965_v44 = vld [vmem:[#allocation46_spill] sm:$0xff] }
 0x315   : > { %10184 = vmatpush3.bf16.msra.mxu1 %v10730_v52  ;;  %v10733_v52 = vld [vmem:[#allocation2 + $0xa0] ss:$0 sps:$4 sm:$0x33]  }
 0x316   : > { %10221 = vmatprep.subr.bf16.mxu1 %v12758_v53  ;;  %v5732_v0 = vrot.slane %v10733_v52, 2 }
 0x318   : > { %10150 = vmatmul.mubr.msk.bf16.gmra.mrb[24].mxu1 %vm3463_vm5, %v5709_v17  ;;  %v5733_v15 = vsel %vm5229_vm8, %v5730_v45, %v5732_v0  ;;  %v10745_v45 = vld [vmem:[%s13841_s3 + $0x14] ss:$8 sps:$4 sm:$0xff]  }
 0x319   : > { %10153 = vmatprep.mubr.msk.bf16.mxu1 %vm3463_vm5, %v5711_v12 }
 0x320   : > { %10154 = vmatmul.mubr.msk.bf16.gmra.mrb[28].mxu1 %vm3463_vm5, %v5713_v18 }
 0x321   : > { %10157 = vmatprep.mubr.msk.bf16.mxu1 %vm3463_vm5, %v5715_v35  ;;  %v10735_v35 = vld [vmem:[#allocation6 + $0x108] sm:$0xff]  }
 0x328   : > { %10158 = vmatmul.mubr.msk.bf16.gmra.mrb[32].mxu1 %vm3463_vm5, %v5717_v21  ;;  %v13962_v21 = vld [vmem:[#allocation43_spill] sm:$0xff] }
 0x329   : > { %10161 = vmatprep.mubr.msk.bf16.mxu1 %vm3463_vm5, %v5719_v8  ;;  %v13963_v8 = vld [vmem:[#allocation44_spill] sm:$0xff] }
 0x32d   : > { %v12781_v55 = vpop.f32.mrb[84].mxu0 }
 0x32e   : > { %v12783_v16 = vpop.f32.mrb[85].mxu0 }
 0x32f   : > { %v12785_v10 = vpop.f32.mrb[86].mxu0 }
 0x330   : > { %v12788_v28 = vpop.f32.mrb[87].mxu0  ;;  %10162 = vmatmul.mubr.msk.bf16.gmra.mrb[0].mxu1 %vm3463_vm5, %v5721_v33 }
 0x331   : > { %10165 = vmatprep.mubr.msk.bf16.mxu1 %vm3463_vm5, %v5723_v9  ;;  %v10737_v9 = vld [vmem:[#allocation6 + $0x118] sm:$0xff]  }
 0x335   : > { %v12795_v19 = vpop.f32.mrb[88].mxu0 }
 0x336   : > { %v12797_v27 = vpop.f32.mrb[89].mxu0 }
 0x337   : > { %v12799_v31 = vpop.f32.mrb[90].mxu0 }
 0x338   : > { %v12802_v25 = vpop.f32.mrb[91].mxu0  ;;  %10166 = vmatmul.mubr.msk.bf16.gmra.mrb[4].mxu1 %vm3463_vm5, %v5725_v60  ;;  %v13964_v60 = vld [vmem:[#allocation45_spill] sm:$0xff] }
 0x339   : > { %10169 = vmatprep.mubr.msk.bf16.mxu1 %vm3463_vm5, %v5727_v5  ;;  %v10742_v5 = vld [vmem:[%s13841_s3 + $0x4] ss:$8 sps:$4 sm:$0xff]  }
 0x33a   : > { %8723 = vmatprep.subr.bf16.mxu0 %v10742_v5 }
 0x33d   : > { %v12808_v58 = vpop.f32.mrb[92].mxu0 }
 0x33e   : > { %v12810_v26 = vpop.f32.mrb[93].mxu0 }
 0x33f   : > { %v12813_v20 = vpop.f32.mrb[94].mxu0 }
 0x340   : > { %v12816_v32 = vpop.f32.mrb[95].mxu0  ;;  %10170 = vmatmul.mubr.msk.bf16.gmra.mrb[8].mxu1 %vm3463_vm5, %v5729_v61  ;;  %v10743_v61 = vld [vmem:[%s13841_s3 + $0x10] ss:$8 sps:$4 sm:$0xff]  }
 0x341   : > { %10173 = vmatprep.mubr.msk.bf16.mxu1 %vm3463_vm5, %v5731_v22 }
 0x345   : > { %v12821_v24 = vpop.f32.mrb[96].mxu0 }
 0x346   : > { %v12823_v36 = vpop.f32.mrb[97].mxu0 }
 0x347   : > { %13958 = vst [vmem:[#allocation15_spill] sm:$0xff] %v12823_v36  ;;  %v12825_v17 = vpop.f32.mrb[98].mxu0 }
 0x348   : > { %13959 = vst [vmem:[#allocation16_spill] sm:$0xff] %v12825_v17  ;;  %v12828_v12 = vpop.f32.mrb[99].mxu0  ;;  %10174 = vmatmul.mubr.msk.bf16.gmra.mrb[12].mxu1 %vm3463_vm5, %v5733_v15 }
 0x349   : > { %13960 = vst [vmem:[#allocation17_spill] sm:$0xff] %v12828_v12  ;;  %10185 = vmatprep.mubr.msk.bf16.mxu1 %vm3463_vm5, %v13961_v7  ;;  %v13966_v7 = vld [vmem:[#allocation47_spill] sm:$0xff] }
 0x34d   : > { %v12833_v62 = vpop.f32.mrb[64].mxu0 }
 0x34e   : > { %v12835_v18 = vpop.f32.mrb[65].mxu0 }
 0x34f   : > { %v12837_v46 = vpop.f32.mrb[66].mxu0 }
 0x350   : > { %v12839_v6 = vpop.f32.mrb[67].mxu0  ;;  %10186 = vmatmul.mubr.msk.bf16.vlgmr.msra.gmra.mrb[16].mxu1 %vm3463_vm5, %v13962_v21 }
 0x351   : > { %10222 = vmatpush3.bf16.msra.mxu1 %v12758_v53  ;;  %10189 = vmatprep.mubr.msk.bf16.mxu1 %vm3463_vm5, %v13963_v8  ;;  %v10740_v53 = vld [vmem:[%s13841_s3] ss:$8 sps:$4 sm:$0xff]  }
 0x352   : > { %10223 = vmatprep.subr.bf16.mxu1 %v10735_v35  ;;  %8724 = vmatpush1.bf16.msra.mxu0 %v10740_v53 }
 0x353   : > { %8725 = vmatprep.subr.bf16.mxu0 %v10745_v45 }
 0x355   : > { %v12846_v47 = vpop.f32.mrb[68].mxu0  ;;  %10224 = vmatpush3.bf16.msra.mxu1 %v10735_v35  ;;  %v13967_v35 = vld [vmem:[#allocation48_spill] sm:$0xff] }
 0x356   : > { %v12848_v33 = vpop.f32.mrb[69].mxu0  ;;  %10225 = vmatprep.subr.bf16.mxu1 %v10736_v11  ;;  %8726 = vmatpush1.bf16.msra.mxu0 %v10743_v61 }
 0x357   : > { %v12850_v1 = vpop.f32.mrb[70].mxu0 }
 0x358   : > { %v12852_v23 = vpop.f32.mrb[71].mxu0  ;;  %10190 = vmatmul.mubr.msk.bf16.gmra.mrb[20].mxu1 %vm3463_vm5, %v13964_v60  ;;  %v13968_v60 = vld [vmem:[#allocation49_spill] sm:$0xff] }
 0x359   : > { %10193 = vmatprep.mubr.msk.bf16.mxu1 %vm3463_vm5, %v13965_v44  ;;  %10226 = vmatpush3.bf16.msra.mxu1 %v10736_v11 }
 0x35a   : > { %10227 = vmatprep.subr.bf16.mxu1 %v10737_v9 }
 0x35d   : > { %v12870_v52 = vpop.f32.mrb[72].mxu0  ;;  %10228 = vmatpush3.bf16.msra.mxu1 %v10737_v9 }
 0x35e   : > { %v12872_v22 = vpop.f32.mrb[73].mxu0 }
 0x35f   : > { %v12874_v0 = vpop.f32.mrb[74].mxu0 }
 0x360   : > { %v12876_v15 = vpop.f32.mrb[75].mxu0  ;;  %10194 = vmatmul.mubr.msk.bf16.gmra.mrb[24].mxu1 %vm3463_vm5, %v13966_v7 }
 0x361   : > { %10197 = vmatprep.mubr.msk.bf16.mxu1 %vm3463_vm5, %v13967_v35 }
 0x365   : > { %v12882_v21 = vpop.f32.mrb[76].mxu0 }
 0x366   : > { %v12884_v8 = vpop.f32.mrb[77].mxu0 }
 0x367   : > { %v12886_v11 = vpop.f32.mrb[78].mxu0 }
 0x368   : > { %v12888_v9 = vpop.f32.mrb[79].mxu0  ;;  %10198 = vmatmul.mubr.msk.bf16.gmra.mrb[28].mxu1 %vm3463_vm5, %v13968_v60 }
 0x369   : > { %10201 = vmatprep.mubr.msk.bf16.mxu1 %vm3463_vm5, %v12513_v2  ;;  %v13969_v2 = vld [vmem:[#allocation50_spill] sm:$0xff] }
 0x36d   : > { %v12894_v53 = vpop.f32.mrb[80].mxu0 }
 0x36e   : > { %v12896_v5 = vpop.f32.mrb[81].mxu0 }
 0x36f   : > { %v12898_v44 = vpop.f32.mrb[82].mxu0 }
 0x370   : > { %v12900_v45 = vpop.f32.mrb[83].mxu0  ;;  %10202 = vmatmul.mubr.msk.bf16.gmra.mrb[32].mxu1 %vm3463_vm5, %v12516_v40  ;;  %v13970_v40 = vld [vmem:[#allocation51_spill] sm:$0xff] }
 0x371   : > { %10205 = vmatprep.mubr.msk.bf16.mxu1 %vm3463_vm5, %v12520_v39  ;;  %v13971_v39 = vld [vmem:[#allocation52_spill] sm:$0xff] }
 0x378   : > { %10206 = vmatmul.mubr.msk.bf16.gmra.mrb[0].mxu1 %vm3463_vm5, %v12533_v13  ;;  %v13972_v13 = vld [vmem:[#allocation53_spill] sm:$0xff] }
 0x379   : > { %10209 = vmatprep.mubr.msk.bf16.mxu1 %vm3463_vm5, %v12539_v63  ;;  %v13973_v63 = vld [vmem:[#allocation54_spill] sm:$0xff] }
 0x380   : > { %10210 = vmatmul.mubr.msk.bf16.gmra.mrb[4].mxu1 %vm3463_vm5, %v12546_v34  ;;  %v10746_v34 = vld [vmem:[%s13841_s3 + $0x20] ss:$8 sps:$4 sm:$0xff]  }
 0x381   : > { %10213 = vmatprep.mubr.msk.bf16.mxu1 %vm3463_vm5, %v12550_v41  ;;  %v10748_v41 = vld [vmem:[%s13841_s3 + $0x24] ss:$8 sps:$4 sm:$0xff]  }
 0x382   : > { %8727 = vmatprep.subr.bf16.mxu0 %v10748_v41 }
 0x383   : > { %8728 = vmatpush1.bf16.msra.mxu0 %v10746_v34 }
 0x388   : > { %10214 = vmatmul.mubr.msk.bf16.gmra.mrb[8].mxu1 %vm3463_vm5, %v12556_v54  ;;  %v10749_v54 = vld [vmem:[%s13841_s3 + $0x30] ss:$8 sps:$4 sm:$0xff]  }
 0x389   : > { %10217 = vmatprep.mubr.msk.bf16.mxu1 %vm3463_vm5, %v12576_v51  ;;  %v12971_v51 = vld [vmem:[%s13843_s5] ss:$0 sm:$0xff] }
 0x390   : > { %10218 = vmatmul.mubr.msk.bf16.gmra.mrb[12].mxu1 %vm3463_vm5, %v12588_v48 }
 0x391   : > { %10229 = vmatprep.mubr.msk.bf16.mxu1 %vm3463_vm5, %v12566_v4  ;;  %v10751_v4 = vld [vmem:[%s13841_s3 + $0x34] ss:$8 sps:$4 sm:$0xff]  }
 0x392   : > { %8729 = vmatprep.subr.bf16.mxu0 %v10751_v4 }
 0x393   : > { %8730 = vmatpush1.bf16.msra.mxu0 %v10749_v54 }
 0x398   : > { %10230 = vmatmul.mubr.msk.bf16.vlgmr.msra.gmra.mrb[16].mxu1 %vm3463_vm5, %v12569_v37 }
 0x399   : > { %10233 = vmatprep.mubr.msk.bf16.mxu1 %vm3463_vm5, %v12579_v42 }
 0x3a0   : > { %10234 = vmatmul.mubr.msk.bf16.gmra.mrb[20].mxu1 %vm3463_vm5, %v12582_v49 }
 0x3a1   : > { %10237 = vmatprep.mubr.msk.bf16.mxu1 %vm3463_vm5, %v12591_v14 }
 0x3a8   : > { %10238 = vmatmul.mubr.msk.bf16.gmra.mrb[24].mxu1 %vm3463_vm5, %v12594_v3 }
 0x3a9   : > { %10241 = vmatprep.mubr.msk.bf16.mxu1 %vm3463_vm5, %v13969_v2 }
 0x3b0   : > { %10242 = vmatmul.mubr.msk.bf16.gmra.mrb[28].mxu1 %vm3463_vm5, %v13970_v40 }
 0x3b1   : > { %10245 = vmatprep.mubr.msk.bf16.mxu1 %vm3463_vm5, %v12612_v43 }
 0x3b8   : > { %10246 = vmatmul.mubr.msk.bf16.gmra.mrb[32].mxu1 %vm3463_vm5, %v12615_v59 }
 0x3b9   : > { %10249 = vmatprep.mubr.msk.bf16.mxu1 %vm3463_vm5, %v13971_v39 }
 0x3c0   : > { %10250 = vmatmul.mubr.msk.bf16.gmra.mrb[0].mxu1 %vm3463_vm5, %v12622_v29 }
 0x3c1   : > { %10253 = vmatprep.mubr.msk.bf16.mxu1 %vm3463_vm5, %v12625_v30 }
 0x3c8   : > { %10254 = vmatmul.mubr.msk.bf16.gmra.mrb[4].mxu1 %vm3463_vm5, %v12628_v50 }
 0x3c9   : > { %10257 = vmatprep.mubr.msk.bf16.mxu1 %vm3463_vm5, %v13972_v13 }
 0x3d0   : > { %10258 = vmatmul.mubr.msk.bf16.gmra.mrb[8].mxu1 %vm3463_vm5, %v13973_v63 }
 0x3d1   : > { %10261 = vmatprep.mubr.msk.bf16.mxu1 %vm3463_vm5, %v12649_v56 }
 0x3d8   : > { %10262 = vmatmul.mubr.msk.bf16.gmra.mrb[12].mxu1 %vm3463_vm5, %v12652_v57 }
 0x46b   : > { %v10231_v37 = vpop.f32.mrb[16].mxu1 }
 0x46c   : > { %v10273_v42 = vadd.f32 %v10231_v37, %v12833_v62  ;;  %v6663_v49 = vpop.f32.mrb[17].mxu1 }
 0x46d   : > { %v10274_v48 = vadd.f32 %v6663_v49, %v12835_v18  ;;  %v10232_v14 = vpop.f32.mrb[18].mxu1 }
 0x46e   : > { %v6851_v3 = vadd.f32 %v10273_v42, %v12971_v51  ;;  %v10275_v30 = vadd.f32 %v10232_v14, %v12837_v46  ;;  %v6666_v29 = vpop.f32.mrb[19].mxu1 }
 0x46f   : > { %v6849_v43 = vadd.f32 %v10274_v48, %v12971_v51  ;;  %v10276_v59 = vadd.f32 %v6666_v29, %v12839_v6  ;;  %v13974_v6 = vld [vmem:[#allocation13_spill] sm:$0xff] }
 0x470   : > { %v6852_v50 = vadd.f32 %v10275_v30, %v12971_v51  ;;  %v6887_v57 = vmax.f32 %v6851_v3, 0.0 }
 0x471   : > { %v6850_v56 = vadd.f32 %v10276_v59, %v12971_v51  ;;  %v6885_v62 = vmax.f32 %v6849_v43, 0.0 }
 0x472   : > { %v6888_v61 = vmax.f32 %v6852_v50, 0.0 }
 0x473   : > { %v6886_v7 = vmax.f32 %v6850_v56, 0.0  ;;  %v10235_v35 = vpop.f32.mrb[20].mxu1 }
 0x474   : > { %v6922_v18 = vpack.c.bf16 %v6888_v61, %v6887_v57  ;;  %v9495_v60 = vpack.c.bf16 %v6888_v61, %v6888_v61  ;;  %v10277_v2 = vadd.f32 %v10235_v35, %v12846_v47  ;;  %v6679_v40 = vpop.f32.mrb[21].mxu1 }
 0x475   : > { %v6921_v46 = vpack.c.bf16 %v6886_v7, %v6885_v62  ;;  %v9494_v39 = vpack.c.bf16 %v6886_v7, %v6886_v7  ;;  %v10278_v13 = vadd.f32 %v6679_v40, %v12848_v33  ;;  %v10236_v63 = vpop.f32.mrb[22].mxu1 }
 0x476   : > { %v7013_v34 = vrot.slane %v6922_v18, %v13974_v6  ;;  %v7020_v41 = vrot.slane %v9495_v60, %v13974_v6  ;;  %v6855_v54 = vadd.f32 %v10277_v2, %v12971_v51  ;;  %v10279_v4 = vadd.f32 %v10236_v63, %v12850_v1  ;;  %v6682_v37 = vpop.f32.mrb[23].mxu1 }
 0x477   : > { %v6964_v42 = vrot.slane %v6921_v46, %v13974_v6  ;;  %v6971_v49 = vrot.slane %v9494_v39, %v13974_v6  ;;  %v6853_v47 = vadd.f32 %v10278_v13, %v12971_v51  ;;  %v10280_v48 = vadd.f32 %v6682_v37, %v12852_v23 }
 0x478   : > { %v7021_v14 = vcombine.high %v7013_v34, %v7013_v34  ;;  %v7022_v33 = vcombine.high %v7020_v41, %v7020_v41  ;;  %v7029_v3 = vrot.slane %v7013_v34, %v13974_v6  ;;  %v7036_v30 = vrot.slane %v7020_v41, %v13974_v6 }
 0x479   : > { %v6972_v29 = vcombine.high %v6964_v42, %v6964_v42  ;;  %v6973_v43 = vcombine.high %v6971_v49, %v6971_v49  ;;  %v6980_v59 = vrot.slane %v6964_v42, %v13974_v6  ;;  %v6987_v1 = vrot.slane %v6971_v49, %v13974_v6 }
 0x47a   : > { %v7043_v50 = vrot.slane %v7021_v14, %v13974_v6  ;;  %v12997_v56 = vrot.slane %v7022_v33, %v13974_v6  ;;  %v7051_v57 = vcombine.high %v7029_v3, %v7029_v3  ;;  %v7052_v61 = vcombine.high %v7036_v30, %v7036_v30 }
 0x47b   : > { %v6994_v23 = vrot.slane %v6972_v29, %v13974_v6  ;;  %v7001_v62 = vrot.slane %v6973_v43, %v13974_v6  ;;  %v6891_v7 = vmax.f32 %v6855_v54, 0.0  ;;  %v6889_v35 = vmax.f32 %v6853_v47, 0.0  ;;  %v10239_v18 = vpop.f32.mrb[24].mxu1 }
 0x47c   : > { %v7053_v60 = vcombine.high %v7043_v50, %v7043_v50  ;;  %v13001_v2 = vcombine.low %v7043_v50, %v7051_v57  ;;  %v13004_v40 = vcombine.low %v12997_v56, %v7052_v61  ;;  %v6856_v46 = vadd.f32 %v10279_v4, %v12971_v51  ;;  %v6695_v39 = vpop.f32.mrb[25].mxu1 }
 0x47d   : > { %v7851_v13 = vcombine.low %v6980_v59, %v6994_v23  ;;  %v9512_v63 = vcombine.high %v6980_v59, %v6994_v23  ;;  %v7853_v34 = vcombine.low %v6987_v1, %v7001_v62  ;;  %v9513_v41 = vcombine.high %v6987_v1, %v7001_v62  ;;  %v10240_v37 = vpop.f32.mrb[26].mxu1 }
 0x47e   : > { %v13007_v42 = vcombine.low %v7053_v60, %v7036_v30  ;;  %v6892_v49 = vmax.f32 %v6856_v46, 0.0  ;;  %v6854_v54 = vadd.f32 %v10280_v48, %v12971_v51  ;;  %v7054_v47 = vcombine.high %v12997_v56, %v12997_v56  ;;  %v6698_v14 = vpop.f32.mrb[27].mxu1 }
 0x47f   : > { %v7861_v33 = vrot.slane %v7851_v13, %v13974_v6  ;;  %v7868_v3 = vrot.slane %v9512_v63, %v13974_v6  ;;  %v7875_v4 = vrot.slane %v7853_v34, %v13974_v6  ;;  %v7882_v29 = vrot.slane %v9513_v41, %v13974_v6 }
 0x480   : > { %v6924_v30 = vpack.c.bf16 %v6892_v49, %v6891_v7  ;;  %v9497_v59 = vpack.c.bf16 %v6892_v49, %v6892_v49  ;;  %v6890_v1 = vmax.f32 %v6854_v54, 0.0  ;;  %v10281_v57 = vadd.f32 %v10239_v18, %v12870_v52 }
 0x481   : > { %v7883_v50 = vcombine.low %v7861_v33, %v7868_v3  ;;  %v7884_v48 = vcombine.low %v7875_v4, %v7882_v29  ;;  %v10282_v56 = vadd.f32 %v6695_v39, %v12872_v22 }
 0x482   : > { %v7111_v61 = vrot.slane %v6924_v30, %v13974_v6  ;;  %v7118_v23 = vrot.slane %v9497_v59, %v13974_v6  ;;  %v6923_v62 = vpack.c.bf16 %v6890_v1, %v6889_v35  ;;  %v9496_v60 = vpack.c.bf16 %v6890_v1, %v6890_v1 }
 0x483   : > { %v13023_v46 = vrot.slane %v7883_v50, %v13974_v6  ;;  %v13026_v13 = vrot.slane %v7884_v48, %v13974_v6  ;;  %v6859_v7 = vadd.f32 %v10281_v57, %v12971_v51  ;;  %v6857_v63 = vadd.f32 %v10282_v56, %v12971_v51  ;;  %v10243_v34 = vpop.f32.mrb[28].mxu1 }
 0x484   : > { %v7119_v52 = vcombine.high %v7111_v61, %v7111_v61  ;;  %v7120_v18 = vcombine.high %v7118_v23, %v7118_v23  ;;  %v7127_v22 = vrot.slane %v7111_v61, %v13974_v6  ;;  %v7134_v39 = vrot.slane %v7118_v23, %v13974_v6  ;;  %v6711_v41 = vpop.f32.mrb[29].mxu1 }
 0x485   : > { %v7062_v35 = vrot.slane %v6923_v62, %v13974_v6  ;;  %v7069_v49 = vrot.slane %v9496_v60, %v13974_v6  ;;  %v6895_v54 = vmax.f32 %v6859_v7, 0.0  ;;  %v6893_v33 = vmax.f32 %v6857_v63, 0.0  ;;  %v10244_v3 = vpop.f32.mrb[30].mxu1 }
 0x486   : > { %v7141_v4 = vrot.slane %v7119_v52, %v13974_v6  ;;  %v13036_v29 = vrot.slane %v7120_v18, %v13974_v6  ;;  %v7149_v30 = vcombine.high %v7134_v39, %v7134_v39  ;;  %v10283_v59 = vadd.f32 %v10240_v37, %v12874_v0  ;;  %v6714_v1 = vpop.f32.mrb[31].mxu1 }
 0x487   : > { %v7070_v50 = vcombine.high %v7062_v35, %v7062_v35  ;;  %v7071_v48 = vcombine.high %v7069_v49, %v7069_v49  ;;  %v7078_v57 = vrot.slane %v7062_v35, %v13974_v6  ;;  %v7085_v56 = vrot.slane %v7069_v49, %v13974_v6 }
 0x488   : > { %v7150_v61 = vcombine.high %v7141_v4, %v7141_v4  ;;  %v13041_v23 = vcombine.low %v7127_v22, %v7141_v4  ;;  %v13044_v62 = vcombine.low %v13036_v29, %v7149_v30  ;;  %v6860_v60 = vadd.f32 %v10283_v59, %v12971_v51 }
 0x489   : > { %v7092_v7 = vrot.slane %v7070_v50, %v13974_v6  ;;  %v7099_v63 = vrot.slane %v7071_v48, %v13974_v6  ;;  %v13049_v0 = vcombine.low %v7054_v47, %v7078_v57  ;;  %v10284_v37 = vadd.f32 %v6698_v14, %v12876_v15 }
 0x48a   : > { %v13054_v18 = vcombine.low %v7150_v61, %v7134_v39  ;;  %v6896_v22 = vmax.f32 %v6860_v60, 0.0  ;;  %v7151_v35 = vcombine.high %v13036_v29, %v13036_v29 }
 0x48b   : > { %v9514_v4 = vcombine.high %v7078_v57, %v7092_v7  ;;  %v7950_v30 = vcombine.low %v7085_v56, %v7099_v63  ;;  %v9515_v59 = vcombine.high %v7085_v56, %v7099_v63  ;;  %v13060_v50 = vpop.f32.mrb[32].mxu1  ;;  %v6858_v39 = vadd.f32 %v10284_v37, %v12971_v51 }
 0x48c   : > { %v6926_v47 = vpack.c.bf16 %v6896_v22, %v6895_v54  ;;  %v9499_v14 = vpack.c.bf16 %v6896_v22, %v6896_v22  ;;  %v13065_v48 = vpop.f32.mrb[33].mxu1  ;;  %v10285_v56 = vadd.f32 %v10243_v34, %v12882_v21  ;;  %v10286_v37 = vadd.f32 %v6711_v41, %v12884_v8 }
 0x48d   : > { %v13068_v61 = vrot.slane %v9514_v4, %v13974_v6  ;;  %v13071_v29 = vrot.slane %v7950_v30, %v13974_v6  ;;  %v13074_v57 = vrot.slane %v9515_v59, %v13974_v6  ;;  %v13077_v60 = vpop.f32.mrb[34].mxu1  ;;  %v6894_v63 = vmax.f32 %v6858_v39, 0.0 }
 0x48e   : > { %v7207_v54 = vrot.slane %v6926_v47, %v13974_v6  ;;  %v7214_v7 = vrot.slane %v9499_v14, %v13974_v6  ;;  %v13082_v22 = vpop.f32.mrb[35].mxu1  ;;  %v6863_v4 = vadd.f32 %v10285_v56, %v12971_v51  ;;  %v10287_v30 = vadd.f32 %v10244_v3, %v12886_v11 }
 0x48f   : > { %v10288_v59 = vadd.f32 %v6714_v1, %v12888_v9  ;;  %v7899_v21 = vcombine.low %v13023_v46, %v13026_v13  ;;  %v6925_v39 = vpack.c.bf16 %v6894_v63, %v6893_v33  ;;  %v9498_v52 = vpack.c.bf16 %v6894_v63, %v6894_v63 }
 0x490   : > { %v7215_v34 = vcombine.high %v7207_v54, %v7207_v54  ;;  %v7216_v15 = vcombine.high %v7214_v7, %v7214_v7  ;;  %v7223_v47 = vrot.slane %v7207_v54, %v13974_v6  ;;  %v7230_v14 = vrot.slane %v7214_v7, %v13974_v6 }
 0x491   : > { %v6899_v8 = vmax.f32 %v6863_v4, 0.0  ;;  %v6861_v41 = vadd.f32 %v10286_v37, %v12971_v51  ;;  %9536 = vmatmul.mubr.msk.bf16.vlgmr.msra.gmra.mrb[100].mxu0 %vm3463_vm5, %v7899_v21  ;;  %v6864_v46 = vadd.f32 %v10287_v30, %v12971_v51  ;;  %v7159_v13 = vrot.slane %v6925_v39, %v13974_v6 }
 0x492   : > { %v7237_v11 = vrot.slane %v7215_v34, %v13974_v6  ;;  %v13095_v9 = vrot.slane %v7216_v15, %v13974_v6  ;;  %v7246_v3 = vcombine.high %v7230_v14, %v7230_v14  ;;  %8765 = vmatprep.mubr.bf16.mxu0 %v13933_v38  ;;  %v7166_v33 = vrot.slane %v9498_v52, %v13974_v6 }
 0x493   : > { %v6897_v1 = vmax.f32 %v6861_v41, 0.0  ;;  %v6862_v56 = vadd.f32 %v10288_v59, %v12971_v51  ;;  %v13102_v54 = vpop.f32.mrb[0].mxu1  ;;  %v6900_v15 = vmax.f32 %v6864_v46, 0.0  ;;  %v7167_v30 = vcombine.high %v7159_v13, %v7159_v13 }
 0x494   : > { %v8049_v7 = vcombine.low %v7223_v47, %v7237_v11  ;;  %v9517_v63 = vcombine.high %v7223_v47, %v7237_v11  ;;  %v13105_v37 = vcombine.low %v13095_v9, %v7246_v3  ;;  %v13107_v4 = vpop.f32.mrb[1].mxu1  ;;  %v7168_v21 = vcombine.high %v7166_v33, %v7166_v33 }
 0x495   : > { %v7175_v34 = vrot.slane %v7159_v13, %v13974_v6  ;;  %v7182_v14 = vrot.slane %v7166_v33, %v13974_v6  ;;  %v13111_v52 = vpop.f32.mrb[2].mxu1  ;;  %v6928_v47 = vpack.c.bf16 %v6900_v15, %v6899_v8  ;;  %v9501_v41 = vpack.c.bf16 %v6900_v15, %v6900_v15 }
 0x496   : > { %13975 = vst [vmem:[#allocation14_spill] sm:$0xff] %v13105_v37  ;;  %v13114_v59 = vrot.slane %v8049_v7, %v13974_v6  ;;  %v13117_v39 = vrot.slane %v9517_v63, %v13974_v6  ;;  %v13119_v11 = vpop.f32.mrb[3].mxu1  ;;  %v7189_v3 = vrot.slane %v7167_v30, %v13974_v6  ;;  %v7196_v46 = vrot.slane %v7168_v21, %v13974_v6 }
 0x497   : > { %v7197_v49 = vcombine.high %v7175_v34, %v7175_v34  ;;  %v13123_v13 = vcombine.low %v7151_v35, %v7175_v34  ;;  %v7305_v33 = vrot.slane %v6928_v47, %v13974_v6  ;;  %v7312_v43 = vrot.slane %v9501_v41, %v13974_v6 }
 0x498   : > { %v6898_v7 = vmax.f32 %v6862_v56, 0.0  ;;  %v7248_v63 = vcombine.high %v13095_v9, %v13095_v9  ;;  %v8047_v15 = vcombine.low %v7182_v14, %v7196_v46  ;;  %v9516_v30 = vcombine.high %v7182_v14, %v7196_v46 }
 0x499   : > { %v13129_v37 = vcombine.low %v7189_v3, %v7197_v49  ;;  %v7313_v12 = vcombine.high %v7305_v33, %v7305_v33  ;;  %v7314_v21 = vcombine.high %v7312_v43, %v7312_v43  ;;  %v7321_v35 = vrot.slane %v7305_v33, %v13974_v6 }
 0x49a   : > { %v7328_v34 = vrot.slane %v7312_v43, %v13974_v6  ;;  %v13136_v47 = vrot.slane %v8047_v15, %v13974_v6  ;;  %v13139_v56 = vrot.slane %v9516_v30, %v13974_v6  ;;  %v6927_v9 = vpack.c.bf16 %v6898_v7, %v6897_v1 }
 0x49b   : > { %v9500_v49 = vpack.c.bf16 %v6898_v7, %v6898_v7  ;;  %v13141_v41 = vpop.f32.mrb[4].mxu1  ;;  %v7335_v3 = vrot.slane %v7313_v12, %v13974_v6  ;;  %v13145_v14 = vrot.slane %v7314_v21, %v13974_v6  ;;  %v10289_v46 = vadd.f32 %v13060_v50, %v12894_v53 }
 0x49c   : > { %v10290_v43 = vadd.f32 %v13065_v48, %v12896_v5  ;;  %v13151_v33 = vpop.f32.mrb[5].mxu1  ;;  %v7256_v15 = vrot.slane %v6927_v9, %v13974_v6  ;;  %v10291_v7 = vadd.f32 %v13077_v60, %v12898_v44  ;;  %v10292_v12 = vadd.f32 %v13082_v22, %v12900_v45 }
 0x49d   : > { %v7263_v1 = vrot.slane %v9500_v49, %v13974_v6  ;;  %v13159_v30 = vpop.f32.mrb[6].mxu1  ;;  %v8146_v21 = vcombine.low %v7321_v35, %v7335_v3  ;;  %v9519_v8 = vcombine.high %v7321_v35, %v7335_v3  ;;  %v13162_v53 = vcombine.low %v7328_v34, %v13145_v14 }
 0x49e   : > { %v6867_v5 = vadd.f32 %v10289_v46, %v12971_v51  ;;  %v13165_v50 = vpop.f32.mrb[7].mxu1  ;;  %v7264_v48 = vcombine.high %v7256_v15, %v7256_v15  ;;  %v7272_v49 = vrot.slane %v7256_v15, %v13974_v6  ;;  %v6865_v15 = vadd.f32 %v10290_v43, %v12971_v51 }
 0x49f   : > { %13976 = vst [vmem:[#allocation18_spill] sm:$0xff] %v13162_v53  ;;  %v7265_v9 = vcombine.high %v7263_v1, %v7263_v1  ;;  %v7279_v44 = vrot.slane %v7263_v1, %v13974_v6  ;;  %v13170_v60 = vrot.slane %v8146_v21, %v13974_v6  ;;  %v13173_v45 = vrot.slane %v9519_v8, %v13974_v6 }
 0x4a0   : > { %v6903_v35 = vmax.f32 %v6867_v5, 0.0  ;;  %v7286_v34 = vrot.slane %v7264_v48, %v13974_v6  ;;  %v7294_v46 = vcombine.high %v7272_v49, %v7272_v49  ;;  %v13179_v17 = vcombine.low %v7248_v63, %v7272_v49 }
 0x4a1   : > { %13977 = vst [vmem:[#allocation19_spill] sm:$0xff] %v13170_v60  ;;  %13978 = vst [vmem:[#allocation20_spill] sm:$0xff] %v13173_v45  ;;  %v7293_v3 = vrot.slane %v7265_v9, %v13974_v6  ;;  %v6868_v1 = vadd.f32 %v10291_v7, %v12971_v51  ;;  %v6866_v21 = vadd.f32 %v10292_v12, %v12971_v51  ;;  %v6901_v63 = vmax.f32 %v6865_v15, 0.0 }
 0x4a2   : > { %13979 = vst [vmem:[#allocation21_spill] sm:$0xff] %v13179_v17  ;;  %v7345_v8 = vcombine.high %v13145_v14, %v13145_v14  ;;  %v7296_v45 = vcombine.high %v7286_v34, %v7286_v34  ;;  %v13186_v60 = vcombine.low %v7286_v34, %v7294_v46  ;;  %v7910_v43 = vrot.slane %v13001_v2, %v13974_v6 }
 0x4a3   : > { %v9518_v48 = vcombine.high %v7279_v44, %v7293_v3  ;;  %v13190_v9 = vpop.f32.mrb[8].mxu1  ;;  %v6904_v49 = vmax.f32 %v6868_v1, 0.0  ;;  %v6902_v22 = vmax.f32 %v6866_v21, 0.0  ;;  %v7924_v34 = vrot.slane %v13004_v40, %v13974_v6 }
 0x4a4   : > { %13980 = vst [vmem:[#allocation25_spill] sm:$0xff] %v13186_v60  ;;  %v13194_v7 = vpop.f32.mrb[9].mxu1  ;;  %v13196_v12 = vcombine.low %v7296_v45, %v7279_v44  ;;  %v10293_v3 = vadd.f32 %v13102_v54, %v12781_v55  ;;  %v13983_v45 = vrot.slane %v13007_v42, %v13974_v6  ;;  %v13984_v40 = vrot.slane %v13049_v0, %v13974_v6 }
 0x4a5   : > { %v13199_v14 = vrot.slane %v9518_v48, %v13974_v6  ;;  %v13205_v46 = vpop.f32.mrb[10].mxu1  ;;  %v6930_v15 = vpack.c.bf16 %v6904_v49, %v6903_v35  ;;  %v9503_v1 = vpack.c.bf16 %v6904_v49, %v6904_v49  ;;  %v6929_v21 = vpack.c.bf16 %v6902_v22, %v6901_v63 }
 0x4a6   : > { %13981 = vst [vmem:[#allocation22_spill] sm:$0xff] %v13196_v12  ;;  %v9502_v5 = vpack.c.bf16 %v6902_v22, %v6902_v22  ;;  %v13207_v2 = vpop.f32.mrb[11].mxu1  ;;  %v7932_v48 = vcombine.low %v7910_v43, %v13983_v45  ;;  %v7933_v53 = vcombine.low %v7924_v34, %v13984_v40  ;;  %v13218_v55 = vadd.f32 %v10293_v3, %v12971_v51 }
 0x4a7   : > { %13982 = vst [vmem:[#allocation23_spill] sm:$0xff] %v13199_v14  ;;  %v7401_v54 = vrot.slane %v6930_v15, %v13974_v6  ;;  %v7408_v22 = vrot.slane %v9503_v1, %v13974_v6  ;;  %v7353_v35 = vrot.slane %v6929_v21, %v13974_v6  ;;  %v10294_v0 = vadd.f32 %v13107_v4, %v12783_v16 }
 0x4a8   : > { %v7360_v63 = vrot.slane %v9502_v5, %v13974_v6  ;;  %v7940_v49 = vrot.slane %v7932_v48, %v13974_v6  ;;  %v7947_v42 = vrot.slane %v7933_v53, %v13974_v6  ;;  %v6907_v43 = vmax.f32 %v13218_v55, 0.0 }
 0x4a9   : > { %v7409_v34 = vcombine.high %v7401_v54, %v7401_v54  ;;  %v7410_v3 = vcombine.high %v7408_v22, %v7408_v22  ;;  %v7417_v45 = vrot.slane %v7401_v54, %v13974_v6  ;;  %v7424_v15 = vrot.slane %v7408_v22, %v13974_v6 }
 0x4aa   : > { %v7361_v1 = vcombine.high %v7353_v35, %v7353_v35  ;;  %v7362_v40 = vcombine.high %v7360_v63, %v7360_v63  ;;  %v7369_v21 = vrot.slane %v7353_v35, %v13974_v6  ;;  %v7376_v5 = vrot.slane %v7360_v63, %v13974_v6 }
 0x4ab   : > { %v13233_v48 = vpop.f32.mrb[12].mxu1  ;;  %v7431_v53 = vrot.slane %v7409_v34, %v13974_v6  ;;  %v7438_v55 = vrot.slane %v7410_v3, %v13974_v6  ;;  %v7948_v44 = vcombine.low %v7940_v49, %v7947_v42  ;;  %v6869_v16 = vadd.f32 %v10294_v0, %v12971_v51 }
 0x4ac   : > { %v13238_v4 = vpop.f32.mrb[13].mxu1  ;;  %v7383_v54 = vrot.slane %v7361_v1, %v13974_v6  ;;  %v7390_v22 = vrot.slane %v7362_v40, %v13974_v6  ;;  %v7391_v12 = vcombine.high %v7369_v21, %v7369_v21  ;;  %v7392_v17 = vcombine.high %v7376_v5, %v7376_v5 }
 0x4ad   : > { %v13242_v35 = vpop.f32.mrb[14].mxu1  ;;  %v8243_v63 = vcombine.low %v7417_v45, %v7431_v53  ;;  %v9520_v14 = vcombine.high %v7417_v45, %v7431_v53  ;;  %v8245_v60 = vcombine.low %v7424_v15, %v7438_v55  ;;  %v9521_v36 = vcombine.high %v7424_v15, %v7438_v55  ;;  %9537 = vmatmul.mubr.msk.bf16.gmra.mrb[104].mxu0 %vm3463_vm5, %v7948_v44 }
 0x4ae   : > { %v13245_v34 = vpop.f32.mrb[15].mxu1  ;;  %v7393_v49 = vcombine.high %v7383_v54, %v7383_v54  ;;  %v13247_v42 = vcombine.low %v7345_v8, %v7369_v21  ;;  %v13249_v0 = vcombine.low %v7383_v54, %v7391_v12  ;;  %v13251_v3 = vcombine.low %v7390_v22, %v7392_v17  ;;  %8775 = vmatprep.mubr.bf16.mxu0 %v13933_v38 }
 0x4af   : > { %v13255_v1 = vrot.slane %v8243_v63, %v13974_v6  ;;  %v13258_v45 = vrot.slane %v9520_v14, %v13974_v6  ;;  %v13261_v15 = vrot.slane %v8245_v60, %v13974_v6  ;;  %v13264_v44 = vrot.slane %v9521_v36, %v13974_v6 }
 0x4b0   : > { %v13266_v8 = vcombine.low %v7393_v49, %v7376_v5  ;;  %v8204_v17 = vrot.slane %v13247_v42, %v13974_v6  ;;  %v6905_v12 = vmax.f32 %v6869_v16, 0.0  ;;  %v10295_v40 = vadd.f32 %v13111_v52, %v12785_v10 }
 0x4b1   : > { %v10296_v21 = vadd.f32 %v13119_v11, %v12788_v28  ;;  %v7981_v14 = vcombine.low %v13068_v61, %v13071_v29  ;;  %v13985_v60 = vrot.slane %v13041_v23, %v13974_v6  ;;  %v10297_v5 = vadd.f32 %v13141_v41, %v12795_v19 }
 0x4b2   : > { %v8218_v53 = vrot.slane %v13266_v8, %v13974_v6  ;;  %v6872_v55 = vadd.f32 %v10295_v40, %v12971_v51  ;;  %v10298_v10 = vadd.f32 %v13151_v33, %v12797_v27  ;;  %v10299_v28 = vadd.f32 %v13159_v30, %v12799_v31 }
 0x4b3   : > { %v7982_v36 = vcombine.low %v13074_v57, %v13985_v60  ;;  %v6870_v61 = vadd.f32 %v10296_v21, %v12971_v51  ;;  %v7989_v23 = vrot.slane %v7981_v14, %v13974_v6  ;;  %v6875_v57 = vadd.f32 %v10297_v5, %v12971_v51 }
 0x4b4   : > { %v6908_v19 = vmax.f32 %v6872_v55, 0.0  ;;  %v6873_v52 = vadd.f32 %v10298_v10, %v12971_v51  ;;  %v6876_v11 = vadd.f32 %v10299_v28, %v12971_v51  ;;  %v10300_v41 = vadd.f32 %v13165_v50, %v12802_v25 }
 0x4b5   : > { %v7996_v29 = vrot.slane %v7982_v36, %v13974_v6  ;;  %v6906_v27 = vmax.f32 %v6870_v61, 0.0  ;;  %v6911_v16 = vmax.f32 %v6875_v57, 0.0  ;;  %v8015_v31 = vrot.slane %v13044_v62, %v13974_v6 }
 0x4b6   : > { %v6932_v30 = vpack.c.bf16 %v6908_v19, %v6907_v43  ;;  %v9505_v54 = vpack.c.bf16 %v6908_v19, %v6908_v19  ;;  %v6909_v22 = vmax.f32 %v6873_v52, 0.0  ;;  %v6912_v63 = vmax.f32 %v6876_v11, 0.0 }
 0x4b7   : > { %v7997_v33 = vcombine.low %v7989_v23, %v7996_v29  ;;  %v6931_v49 = vpack.c.bf16 %v6906_v27, %v6905_v12  ;;  %v9504_v40 = vpack.c.bf16 %v6906_v27, %v6906_v27  ;;  %v6874_v21 = vadd.f32 %v10300_v41, %v12971_v51 }
 0x4b8   : > { %v8029_v14 = vrot.slane %v13129_v37, %v13974_v6  ;;  %v7499_v25 = vrot.slane %v6932_v30, %v13974_v6  ;;  %v7506_v50 = vrot.slane %v9505_v54, %v13974_v6  ;;  %v6934_v60 = vpack.c.bf16 %v6912_v63, %v6911_v16 }
 0x4b9   : > { %9538 = vmatmul.mubr.msk.bf16.gmra.mrb[108].mxu0 %vm3463_vm5, %v7997_v33  ;;  %v9507_v36 = vpack.c.bf16 %v6912_v63, %v6912_v63  ;;  %v7450_v62 = vrot.slane %v6931_v49, %v13974_v6  ;;  %v7457_v43 = vrot.slane %v9504_v40, %v13974_v6  ;;  %v6910_v12 = vmax.f32 %v6874_v21, 0.0 }
 0x4ba   : > { %8785 = vmatprep.mubr.bf16.mxu0 %v13933_v38  ;;  %v13986_v5 = vrot.slane %v13054_v18, %v13974_v6  ;;  %v7507_v10 = vcombine.high %v7499_v25, %v7499_v25  ;;  %v7508_v28 = vcombine.high %v7506_v50, %v7506_v50  ;;  %v7515_v37 = vrot.slane %v7499_v25, %v13974_v6 }
 0x4bb   : > { %v7522_v61 = vrot.slane %v7506_v50, %v13974_v6  ;;  %v7458_v23 = vcombine.high %v7450_v62, %v7450_v62  ;;  %v7459_v29 = vcombine.high %v7457_v43, %v7457_v43  ;;  %v7466_v57 = vrot.slane %v7450_v62, %v13974_v6 }
 0x4bc   : > { %v8030_v55 = vcombine.low %v13986_v5, %v8015_v31  ;;  %v7473_v19 = vrot.slane %v7457_v43, %v13974_v6  ;;  %v7529_v52 = vrot.slane %v7507_v10, %v13974_v6  ;;  %v7536_v11 = vrot.slane %v7508_v28, %v13974_v6 }
 0x4bd   : > { %v7596_v41 = vrot.slane %v6934_v60, %v13974_v6  ;;  %v7603_v18 = vrot.slane %v9507_v36, %v13974_v6  ;;  %v7480_v27 = vrot.slane %v7458_v23, %v13974_v6  ;;  %v7487_v33 = vrot.slane %v7459_v29, %v13974_v6 }
 0x4be   : > { %v7488_v16 = vcombine.high %v7466_v57, %v7466_v57  ;;  %v7489_v31 = vcombine.high %v7473_v19, %v7473_v19  ;;  %v9522_v30 = vcombine.high %v7515_v37, %v7529_v52  ;;  %v8342_v54 = vcombine.low %v7522_v61, %v7536_v11 }
 0x4bf   : > { %v9523_v63 = vcombine.high %v7522_v61, %v7536_v11  ;;  %v7604_v49 = vcombine.high %v7596_v41, %v7596_v41  ;;  %v7490_v40 = vcombine.high %v7480_v27, %v7480_v27  ;;  %v7491_v21 = vcombine.high %v7487_v33, %v7487_v33 }
 0x4c0   : > { %v13321_v25 = vcombine.low %v7480_v27, %v7488_v16  ;;  %v13323_v50 = vcombine.low %v7487_v33, %v7489_v31  ;;  %v13326_v60 = vrot.slane %v9522_v30, %v13974_v6  ;;  %v13329_v36 = vrot.slane %v8342_v54, %v13974_v6 }
 0x4c1   : > { %v13332_v62 = vrot.slane %v9523_v63, %v13974_v6  ;;  %v7605_v43 = vcombine.high %v7603_v18, %v7603_v18  ;;  %v13334_v5 = vcombine.low %v7490_v40, %v7473_v19  ;;  %v13336_v10 = vcombine.low %v7491_v21, %v7515_v37 }
 0x4c2   : > { %v7612_v28 = vrot.slane %v7596_v41, %v13974_v6  ;;  %v7619_v61 = vrot.slane %v7603_v18, %v13974_v6  ;;  %v7626_v23 = vrot.slane %v7604_v49, %v13974_v6  ;;  %v6933_v57 = vpack.c.bf16 %v6910_v12, %v6909_v22 }
 0x4c3   : > { %v7633_v29 = vrot.slane %v7605_v43, %v13974_v6  ;;  %v9506_v52 = vpack.c.bf16 %v6910_v12, %v6910_v12  ;;  %v8309_v11 = vrot.slane %v13334_v5, %v13974_v6  ;;  %v13987_v19 = vrot.slane %v13123_v13, %v13974_v6 }
 0x4c4   : > { %v7634_v27 = vcombine.high %v7612_v28, %v7612_v28  ;;  %v8038_v37 = vrot.slane %v8030_v55, %v13974_v6  ;;  %v7548_v18 = vrot.slane %v6933_v57, %v13974_v6  ;;  %v10301_v12 = vadd.f32 %v13190_v9, %v12808_v58 }
 0x4c5   : > { %v8031_v33 = vcombine.low %v13987_v19, %v8029_v14  ;;  %v8439_v16 = vcombine.low %v7619_v61, %v7633_v29  ;;  %v9524_v41 = vcombine.high %v7619_v61, %v7633_v29  ;;  %v7555_v31 = vrot.slane %v9506_v52, %v13974_v6 }
 0x4c6   : > { %v13350_v30 = vcombine.low %v7626_v23, %v7634_v27  ;;  %v10302_v54 = vadd.f32 %v13194_v7, %v12810_v26  ;;  %v7556_v55 = vcombine.high %v7548_v18, %v7548_v18  ;;  %v7564_v49 = vrot.slane %v7548_v18, %v13974_v6 }
 0x4c7   : > { %v8045_v22 = vrot.slane %v8031_v33, %v13974_v6  ;;  %v13358_v13 = vrot.slane %v8439_v16, %v13974_v6  ;;  %v13361_v14 = vrot.slane %v9524_v41, %v13974_v6  ;;  %v7557_v63 = vcombine.high %v7555_v31, %v7555_v31 }
 0x4c8   : > { %v7571_v40 = vrot.slane %v7555_v31, %v13974_v6  ;;  %v6879_v43 = vadd.f32 %v10301_v12, %v12971_v51  ;;  %v7578_v58 = vrot.slane %v7556_v55, %v13974_v6  ;;  %v6877_v26 = vadd.f32 %v10302_v54, %v12971_v51  ;;  %v13989_v54 = vld [vmem:[#allocation16_spill] sm:$0xff] }
 0x4c9   : > { %v8046_v21 = vcombine.low %v8038_v37, %v8045_v22  ;;  %v7585_v9 = vrot.slane %v7557_v63, %v13974_v6  ;;  %v10303_v7 = vadd.f32 %v13205_v46, %v12813_v20  ;;  %v10304_v29 = vadd.f32 %v13207_v2, %v12816_v32 }
 0x4ca   : > { %v7586_v61 = vcombine.high %v7571_v40, %v7571_v40  ;;  %v6915_v23 = vmax.f32 %v6879_v43, 0.0  ;;  %v8079_v57 = vcombine.low %v13136_v47, %v13139_v56  ;;  %v7587_v52 = vcombine.high %v7578_v58, %v7578_v58 }
 0x4cb   : > { %9539 = vmatmul.mubr.msk.bf16.gmra.mrb[112].mxu0 %vm3463_vm5, %v8046_v21  ;;  %v7588_v27 = vcombine.high %v7585_v9, %v7585_v9  ;;  %v13376_v19 = vcombine.low %v7564_v49, %v7578_v58  ;;  %v6913_v33 = vmax.f32 %v6877_v26, 0.0  ;;  %v6880_v20 = vadd.f32 %v10303_v7, %v12971_v51 }
 0x4cc   : > { %8795 = vmatprep.mubr.bf16.mxu0 %v13933_v38  ;;  %v13379_v37 = vcombine.low %v7585_v9, %v7586_v61  ;;  %v6878_v46 = vadd.f32 %v10304_v29, %v12971_v51  ;;  %v8080_v16 = vcombine.low %v13114_v59, %v13117_v39  ;;  %v13387_v47 = vcombine.low %v7587_v52, %v7571_v40  ;;  %v13988_v59 = vld [vmem:[#allocation15_spill] sm:$0xff] }
 0x4cd   : > { %v8372_v32 = vrot.slane %v13376_v19, %v13974_v6  ;;  %v13389_v56 = vcombine.low %v7588_v27, %v7612_v28  ;;  %v8087_v2 = vrot.slane %v8079_v57, %v13974_v6  ;;  %v6916_v41 = vmax.f32 %v6880_v20, 0.0  ;;  %v13990_v28 = vld [vmem:[#allocation17_spill] sm:$0xff] }
 0x4ce   : > { %v6914_v18 = vmax.f32 %v6878_v46, 0.0  ;;  %v8094_v31 = vrot.slane %v8080_v16, %v13974_v6  ;;  %v10305_v22 = vadd.f32 %v13233_v48, %v12821_v24  ;;  %v8400_v12 = vrot.slane %v13387_v47, %v13974_v6 }
 0x4cf   : > { %v10306_v39 = vadd.f32 %v13238_v4, %v13988_v59  ;;  %v10307_v55 = vadd.f32 %v13242_v35, %v13989_v54  ;;  %v10308_v63 = vadd.f32 %v13245_v34, %v13990_v28  ;;  %v6936_v49 = vpack.c.bf16 %v6916_v41, %v6915_v23 }
 0x4d0   : > { %v9509_v40 = vpack.c.bf16 %v6916_v41, %v6916_v41  ;;  %v6935_v21 = vpack.c.bf16 %v6914_v18, %v6913_v33  ;;  %v9508_v43 = vpack.c.bf16 %v6914_v18, %v6914_v18  ;;  %v8095_v58 = vcombine.low %v8087_v2, %v8094_v31 }
 0x4d1   : > { %v6883_v9 = vadd.f32 %v10305_v22, %v12971_v51  ;;  %v6881_v24 = vadd.f32 %v10306_v39, %v12971_v51  ;;  %v6884_v48 = vadd.f32 %v10307_v55, %v12971_v51  ;;  %v7693_v26 = vrot.slane %v6936_v49, %v13974_v6 }
 0x4d2   : > { %v7700_v4 = vrot.slane %v9509_v40, %v13974_v6  ;;  %v7644_v35 = vrot.slane %v6935_v21, %v13974_v6  ;;  %v7651_v7 = vrot.slane %v9508_v43, %v13974_v6  ;;  %v6882_v29 = vadd.f32 %v10308_v63, %v12971_v51 }
 0x4d3   : > { %9540 = vmatmul.mubr.msk.bf16.gmra.mrb[116].mxu0 %vm3463_vm5, %v8095_v58  ;;  %v6919_v34 = vmax.f32 %v6883_v9, 0.0  ;;  %v6917_v61 = vmax.f32 %v6881_v24, 0.0  ;;  %v6920_v23 = vmax.f32 %v6884_v48, 0.0  ;;  %v7701_v57 = vcombine.high %v7693_v26, %v7693_v26 }
 0x4d4   : > { %v7702_v52 = vcombine.high %v7700_v4, %v7700_v4  ;;  %v7709_v27 = vrot.slane %v7693_v26, %v13974_v6  ;;  %v7716_v33 = vrot.slane %v7700_v4, %v13974_v6  ;;  %8805 = vmatprep.mubr.bf16.mxu0 %v13933_v38  ;;  %v7652_v20 = vcombine.high %v7644_v35, %v7644_v35 }
 0x4d5   : > { %v7653_v46 = vcombine.high %v7651_v7, %v7651_v7  ;;  %v7660_v16 = vrot.slane %v7644_v35, %v13974_v6  ;;  %v7667_v2 = vrot.slane %v7651_v7, %v13974_v6  ;;  %v7723_v41 = vrot.slane %v7701_v57, %v13974_v6 }
 0x4d6   : > { %v7730_v18 = vrot.slane %v7702_v52, %v13974_v6  ;;  %v7731_v31 = vcombine.high %v7709_v27, %v7709_v27  ;;  %v6938_v51 = vpack.c.bf16 %v6920_v23, %v6919_v34  ;;  %v7674_v22 = vrot.slane %v7652_v20, %v13974_v6 }
 0x4d7   : > { %v7681_v59 = vrot.slane %v7653_v46, %v13974_v6  ;;  %v7683_v39 = vcombine.high %v7667_v2, %v7667_v2  ;;  %v9511_v54 = vpack.c.bf16 %v6920_v23, %v6920_v23  ;;  %v7733_v55 = vcombine.high %v7723_v41, %v7723_v41 }
 0x4d8   : > { %v13421_v28 = vcombine.low %v7723_v41, %v7731_v31  ;;  %v9526_v63 = vcombine.high %v7716_v33, %v7730_v18  ;;  %v7790_v49 = vrot.slane %v6938_v51, %v13974_v6  ;;  %v8441_v21 = vcombine.low %v7660_v16, %v7674_v22  ;;  %v13992_v41 = vld [vmem:[#allocation25_spill] sm:$0xff] }
 0x4d9   : > { %v7685_v40 = vcombine.high %v7681_v59, %v7681_v59  ;;  %v9525_v43 = vcombine.high %v7660_v16, %v7674_v22  ;;  %v13424_v58 = vcombine.low %v7681_v59, %v7683_v39  ;;  %v13426_v9 = vcombine.low %v7733_v55, %v7716_v33  ;;  %v13991_v16 = vld [vmem:[#allocation14_spill] sm:$0xff]  ;;  %v13993_v22 = vld [vmem:[#allocation19_spill] sm:$0xff] }
 0x4da   : > { %v13429_v24 = vrot.slane %v9526_v63, %v13974_v6  ;;  %v7797_v48 = vrot.slane %v9511_v54, %v13974_v6  ;;  %v7798_v26 = vcombine.high %v7790_v49, %v7790_v49  ;;  %v13433_v4 = vrot.slane %v8441_v21, %v13974_v6  ;;  %v13994_v59 = vld [vmem:[#allocation23_spill] sm:$0xff] }
 0x4db   : > { %v13436_v35 = vrot.slane %v9525_v43, %v13974_v6  ;;  %v13438_v7 = vcombine.low %v7685_v40, %v7709_v27  ;;  %v7806_v34 = vrot.slane %v7790_v49, %v13974_v6  ;;  %v8519_v23 = vrot.slane %v13426_v9, %v13974_v6  ;;  %v13995_v49 = vld [vmem:[#allocation21_spill] sm:$0xff] }
 0x4dc   : > { %v7799_v57 = vcombine.high %v7797_v48, %v7797_v48  ;;  %v7813_v52 = vrot.slane %v7797_v48, %v13974_v6  ;;  %v7820_v33 = vrot.slane %v7798_v26, %v13974_v6  ;;  %v6918_v46 = vmax.f32 %v6882_v29, 0.0  ;;  %v13997_v48 = vld [vmem:[#allocation22_spill] sm:$0xff] }
 0x4dd   : > { %v7828_v20 = vcombine.high %v7806_v34, %v7806_v34  ;;  %v8106_v2 = vrot.slane %v13991_v16, %v13974_v6  ;;  %v8120_v18 = vrot.slane %v13992_v41, %v13974_v6  ;;  %v8177_v39 = vcombine.low %v13994_v59, %v13993_v22  ;;  %v13999_v16 = vld [vmem:[#allocation18_spill] sm:$0xff]  ;;  %v14001_v22 = vld [vmem:[#allocation20_spill] sm:$0xff] }
 0x4de   : > { %v7827_v27 = vrot.slane %v7799_v57, %v13974_v6  ;;  %v7829_v31 = vcombine.high %v7813_v52, %v7813_v52  ;;  %v7830_v51 = vcombine.high %v7820_v33, %v7820_v33  ;;  %v6937_v55 = vpack.c.bf16 %v6918_v46, %v6917_v61 }
 0x4df   : > { %v13452_v54 = vcombine.low %v7820_v33, %v7828_v20  ;;  %v9510_v63 = vpack.c.bf16 %v6918_v46, %v6918_v46  ;;  %v13996_v29 = vrot.slane %v13995_v49, %v13974_v6  ;;  %v13998_v26 = vrot.slane %v13997_v48, %v13974_v6 }
 0x4e0   : > { %v13457_v21 = vcombine.low %v7830_v51, %v7813_v52  ;;  %v13459_v43 = vcombine.low %v7827_v27, %v7829_v31  ;;  %v14000_v41 = vrot.slane %v13999_v16, %v13974_v6  ;;  %v7742_v61 = vrot.slane %v6937_v55, %v13974_v6 }
 0x4e1   : > { %v8128_v40 = vcombine.low %v8106_v2, %v13996_v29  ;;  %v8129_v57 = vcombine.low %v8120_v18, %v13998_v26  ;;  %v7749_v20 = vrot.slane %v9510_v63, %v13974_v6  ;;  %v8185_v52 = vrot.slane %v8177_v39, %v13974_v6 }
 0x4e2   : > { %v8178_v33 = vcombine.low %v14001_v22, %v14000_v41  ;;  %v8610_v2 = vrot.slane %v13457_v21, %v13974_v6  ;;  %v8211_v31 = vrot.slane %v13249_v0, %v13974_v6  ;;  %v7750_v51 = vcombine.high %v7742_v61, %v7742_v61 }
 0x4e3   : > { %v8136_v46 = vrot.slane %v8128_v40, %v13974_v6  ;;  %v8143_v27 = vrot.slane %v8129_v57, %v13974_v6  ;;  %v7751_v59 = vcombine.high %v7749_v20, %v7749_v20  ;;  %v7758_v55 = vrot.slane %v7742_v61, %v13974_v6 }
 0x4e4   : > { %v8192_v18 = vrot.slane %v8178_v33, %v13974_v6  ;;  %v7765_v63 = vrot.slane %v7749_v20, %v13974_v6  ;;  %v8225_v39 = vrot.slane %v13251_v3, %v13974_v6  ;;  %v8226_v40 = vcombine.low %v8204_v17, %v8211_v31 }
 0x4e5   : > { %v8144_v49 = vcombine.low %v8136_v46, %v8143_v27  ;;  %v7772_v48 = vrot.slane %v7750_v51, %v13974_v6  ;;  %v7779_v26 = vrot.slane %v7751_v59, %v13974_v6  ;;  %v8275_v0 = vcombine.low %v13255_v1, %v13258_v45 }
 0x4e6   : > { %v8193_v29 = vcombine.low %v8185_v52, %v8192_v18  ;;  %v8276_v57 = vcombine.low %v13261_v15, %v13264_v44  ;;  %v8227_v3 = vcombine.low %v8218_v53, %v8225_v39  ;;  %v8234_v16 = vrot.slane %v8226_v40, %v13974_v6 }
 0x4e7   : > { %9541 = vmatmul.mubr.msk.bf16.gmra.mrb[120].mxu0 %vm3463_vm5, %v8144_v49  ;;  %v8302_v42 = vrot.slane %v13321_v25, %v13974_v6  ;;  %v8316_v17 = vrot.slane %v13323_v50, %v13974_v6  ;;  %v7782_v41 = vcombine.high %v7779_v26, %v7779_v26  ;;  %v8538_v22 = vcombine.low %v7758_v55, %v7772_v48 }
 0x4e8   : > { %v9527_v1 = vcombine.high %v7758_v55, %v7772_v48  ;;  %v8540_v45 = vcombine.low %v7765_v63, %v7779_v26  ;;  %8815 = vmatprep.mubr.bf16.mxu0 %v13933_v38  ;;  %v8241_v15 = vrot.slane %v8227_v3, %v13974_v6  ;;  %v8283_v44 = vrot.slane %v8275_v0, %v13974_v6 }
 0x4e9   : > { %v8290_v8 = vrot.slane %v8276_v57, %v13974_v6  ;;  %v8323_v53 = vrot.slane %v13336_v10, %v13974_v6  ;;  %v8554_v25 = vrot.slane %v8538_v22, %v13974_v6  ;;  %v8586_v61 = vcombine.low %v7782_v41, %v7806_v34 }
 0x4ea   : > { %v8561_v33 = vrot.slane %v9527_v1, %v13974_v6  ;;  %v8568_v50 = vrot.slane %v8540_v45, %v13974_v6  ;;  %v8242_v20 = vcombine.low %v8234_v16, %v8241_v15  ;;  %v8324_v52 = vcombine.low %v8302_v42, %v8309_v11 }
 0x4eb   : > { %v8291_v46 = vcombine.low %v8283_v44, %v8290_v8  ;;  %v8325_v27 = vcombine.low %v8316_v17, %v8323_v53  ;;  %v8373_v18 = vcombine.low %v13326_v60, %v13329_v36  ;;  %v8374_v10 = vcombine.low %v13332_v62, %v8372_v32  ;;  %v10771_v44 = vld [vmem:[%s11162_s11] sm:$0xff] }
 0x4ec   : > { %v8407_v31 = vrot.slane %v13379_v37, %v13974_v6  ;;  %v8414_v34 = vrot.slane %v13389_v56, %v13974_v6  ;;  %v8332_v51 = vrot.slane %v8324_v52, %v13974_v6  ;;  %v8421_v11 = vrot.slane %v13350_v30, %v13974_v6 }
 0x4ed   : > { %v8339_v5 = vrot.slane %v8325_v27, %v13974_v6  ;;  %v8471_v60 = vcombine.low %v13358_v13, %v13361_v14  ;;  %v8381_v36 = vrot.slane %v8373_v18, %v13974_v6  ;;  %v8388_v62 = vrot.slane %v8374_v10, %v13974_v6  ;;  %v10774_v18 = vld [vmem:[%s11162_s11 + $0x18] sm:$0xff] }
 0x4ee   : > { %v8422_v19 = vcombine.low %v8400_v12, %v8407_v31  ;;  %v8472_v37 = vcombine.low %v13433_v4, %v13436_v35  ;;  %v8423_v56 = vcombine.low %v8414_v34, %v8421_v11  ;;  %v8498_v13 = vrot.slane %v13424_v58, %v13974_v6 }
 0x4ef   : > { %9542 = vmatmul.mubr.msk.bf16.gmra.mrb[124].mxu0 %vm3463_vm5, %v8193_v29  ;;  %v8340_v32 = vcombine.low %v8332_v51, %v8339_v5  ;;  %v8479_v30 = vrot.slane %v8471_v60, %v13974_v6  ;;  %v8389_v14 = vcombine.low %v8381_v36, %v8388_v62  ;;  %v8505_v12 = vrot.slane %v13438_v7, %v13974_v6  ;;  %v10775_v62 = vld [vmem:[%s11162_s11 + $0x20] sm:$0xff] }
 0x4f0   : > { %8825 = vmatprep.mubr.bf16.mxu0 %v13933_v38  ;;  %v8430_v59 = vrot.slane %v8422_v19, %v13974_v6  ;;  %v8486_v47 = vrot.slane %v8472_v37, %v13974_v6  ;;  %v8437_v4 = vrot.slane %v8423_v56, %v13974_v6  ;;  %v8512_v35 = vrot.slane %v13421_v28, %v13974_v6  ;;  %v10776_v56 = vld [vmem:[%s11162_s11 + $0x28] sm:$0xff] }
 0x4f1   : > { %v8569_v55 = vcombine.low %v13429_v24, %v8554_v25  ;;  %v8570_v63 = vcombine.low %v8561_v33, %v8568_v50  ;;  %v8520_v58 = vcombine.low %v8498_v13, %v8505_v12  ;;  %v8596_v29 = vrot.slane %v8586_v61, %v13974_v6  ;;  %v10772_v33 = vld [vmem:[%s11162_s11 + $0x8] sm:$0xff] }
 0x4f2   : > { %v8487_v49 = vcombine.low %v8479_v30, %v8486_v47  ;;  %v8603_v39 = vrot.slane %v13452_v54, %v13974_v6  ;;  %v8438_v40 = vcombine.low %v8430_v59, %v8437_v4  ;;  %v8521_v7 = vcombine.low %v8512_v35, %v8519_v23  ;;  %v10777_v59 = vld [vmem:[%s11162_s11 + $0x30] sm:$0xff]  ;;  %v10778_v4 = vld [vmem:[%s11162_s11 + $0x38] sm:$0xff] }
 0x4f3   : > { %v8577_v48 = vrot.slane %v8569_v55, %v13974_v6  ;;  %v8584_v26 = vrot.slane %v8570_v63, %v13974_v6  ;;  %v8528_v28 = vrot.slane %v8520_v58, %v13974_v6  ;;  %v8617_v24 = vrot.slane %v13459_v43, %v13974_v6  ;;  %v7839_v43 = vld [vmem:[%s13844_s6] sm:$0x3] }
 0x4f4   : > { %v8618_v0 = vcombine.low %v8596_v29, %v8603_v39  ;;  %v8535_v57 = vrot.slane %v8521_v7, %v13974_v6  ;;  %v10779_v7 = vld [vmem:[%s11162_s11 + $0x40] sm:$0xff] }
 0x4f5   : > { %v8585_v3 = vcombine.low %v8577_v48, %v8584_v26  ;;  %v8619_v54 = vcombine.low %v8610_v2, %v8617_v24  ;;  %v10780_v24 = vld [vmem:[%s11162_s11 + $0x48] sm:$0xff] }
 0x4f6   : > { %v8626_v9 = vrot.slane %v8618_v0, %v13974_v6  ;;  %v8536_v23 = vcombine.low %v8528_v28, %v8535_v57 }
 0x4f7   : > { %9543 = vmatmul.mubr.msk.bf16.gmra.mrb[128].mxu0 %vm3463_vm5, %v8242_v20  ;;  %v8633_v16 = vrot.slane %v8619_v54, %v13974_v6  ;;  %v14002_v6 = vld [vmem:[#allocation12_spill] sm:$0xff]  ;;  %v10781_v54 = vld [vmem:[%s11162_s11 + $0x50] sm:$0xff] }
 0x4f8   : > { %8835 = vmatprep.mubr.bf16.mxu0 %v13933_v38  ;;  %v7843_v21 = vsub.s32 0, %v14002_v6  ;;  %v7847_v2 = vsub.s32 1, %v14002_v6 }
 0x4f9   : > { %v8634_v42 = vcombine.low %v8626_v9, %v8633_v16  ;;  %v10782_v16 = vld [vmem:[%s11162_s11 + $0x58] sm:$0xff] }
 0x4fa   : > { %v13587_v17 = vrot.slane %v7839_v43, %v7843_v21  ;;  %v13589_v41 = vrot.slane %v7839_v43, %v7847_v2 }
 0x4ff   : > { %9544 = vmatmul.mubr.msk.bf16.gmra.mrb[132].mxu0 %vm3463_vm5, %v8291_v46  ;;  %v10773_v46 = vld [vmem:[%s11162_s11 + $0x10] sm:$0xff] }
 0x500   : > { %8845 = vmatprep.mubr.bf16.mxu0 %v13933_v38 }
 0x507   : > { %9545 = vmatmul.mubr.msk.bf16.gmra.mrb[136].mxu0 %vm3463_vm5, %v8340_v32 }
 0x508   : > { %8855 = vmatprep.mubr.bf16.mxu0 %v13933_v38 }
 0x50f   : > { %9546 = vmatmul.mubr.msk.bf16.gmra.mrb[140].mxu0 %vm3463_vm5, %v8389_v14 }
 0x510   : > { %8865 = vmatprep.mubr.bf16.mxu0 %v13933_v38 }
 0x517   : > { %9547 = vmatmul.mubr.msk.bf16.gmra.mrb[144].mxu0 %vm3463_vm5, %v8438_v40 }
 0x518   : > { %8875 = vmatprep.mubr.bf16.mxu0 %v13933_v38 }
 0x51f   : > { %9548 = vmatmul.mubr.msk.bf16.gmra.mrb[148].mxu0 %vm3463_vm5, %v8487_v49 }
 0x520   : > { %8885 = vmatprep.mubr.bf16.mxu0 %v13933_v38 }
 0x527   : > { %9549 = vmatmul.mubr.msk.bf16.gmra.mrb[152].mxu0 %vm3463_vm5, %v8536_v23 }
 0x528   : > { %8895 = vmatprep.mubr.bf16.mxu0 %v13933_v38 }
 0x52f   : > { %9550 = vmatmul.mubr.msk.bf16.gmra.mrb[156].mxu0 %vm3463_vm5, %v8585_v3 }
 0x530   : > { %8905 = vmatprep.mubr.bf16.mxu0 %v13933_v38 }
 0x537   : > { %9551 = vmatmul.mubr.msk.bf16.gmra.mrb[160].mxu0 %vm3463_vm5, %v8634_v42 }
 0x564   : > { %v8757_v22 = vpop.f32.mrb[100].mxu0 }
 0x565   : > { %v8758_v38 = vadd.f32 %v8757_v22, %v13587_v17  ;;  %v8759_v1 = vpop.f32.mrb[101].mxu0 }
 0x566   : > { %v8760_v45 = vadd.f32 %v8759_v1, %v13589_v41  ;;  %v8761_v15 = vpop.f32.mrb[102].mxu0 }
 0x567   : > { %v8916_v8 = vadd.f32 %v10771_v44, %v8758_v38  ;;  %v8762_v53 = vadd.f32 %v8761_v15, %v13587_v17  ;;  %v8763_v25 = vpop.f32.mrb[103].mxu0 }
 0x568   : > { %v8917_v50 = vadd.f32 %v10772_v33, %v8760_v45  ;;  %v8764_v61 = vadd.f32 %v8763_v25, %v13589_v41  ;;  %v10783_v45 = vld [vmem:[%s11162_s11 + $0x60] sm:$0xff] }
 0x569   : > { %v8980_v20 = vmax.f32 %v8916_v8, 0.0  ;;  %v8918_v52 = vadd.f32 %v10773_v46, %v8762_v53  ;;  %v10784_v53 = vld [vmem:[%s11162_s11 + $0x68] sm:$0xff] }
 0x56a   : > { %v8981_v27 = vmax.f32 %v8917_v50, 0.0  ;;  %v8919_v10 = vadd.f32 %v10774_v18, %v8764_v61  ;;  %v10785_v61 = vld [vmem:[%s11162_s11 + $0x70] sm:$0xff] }
 0x56b   : > { %9044 = vst [vmem:[%s13601_s16] sm:$0xff] %v8980_v20  ;;  %v8982_v31 = vmax.f32 %v8918_v52, 0.0  ;;  %v10786_v52 = vld [vmem:[%s11162_s11 + $0x78] sm:$0xff] }
 0x56c   : > { %9045 = vst [vmem:[%s13601_s16 + $0x8] sm:$0xff] %v8981_v27  ;;  %v8983_v34 = vmax.f32 %v8919_v10, 0.0 }
 0x56d   : > { %9046 = vst [vmem:[%s13601_s16 + $0x10] sm:$0xff] %v8982_v31 }
 0x56e   : > { %9047 = vst [vmem:[%s13601_s16 + $0x18] sm:$0xff] %v8983_v34 }
 0x580   : > { %v8767_v51 = vpop.f32.mrb[104].mxu0 }
 0x581   : > { %v8768_v5 = vadd.f32 %v8767_v51, %v13587_v17  ;;  %v8769_v11 = vpop.f32.mrb[105].mxu0 }
 0x582   : > { %v8770_v60 = vadd.f32 %v8769_v11, %v13589_v41  ;;  %v8771_v36 = vpop.f32.mrb[106].mxu0 }
 0x583   : > { %v8920_v19 = vadd.f32 %v10775_v62, %v8768_v5  ;;  %v8772_v37 = vadd.f32 %v8771_v36, %v13587_v17  ;;  %v8773_v32 = vpop.f32.mrb[107].mxu0 }
 0x584   : > { %v8921_v30 = vadd.f32 %v10776_v56, %v8770_v60  ;;  %v8774_v13 = vadd.f32 %v8773_v32, %v13589_v41  ;;  %v10787_v60 = vld [vmem:[%s11162_s11 + $0x80] sm:$0xff] }
 0x585   : > { %v8984_v14 = vmax.f32 %v8920_v19, 0.0  ;;  %v8922_v47 = vadd.f32 %v10777_v59, %v8772_v37  ;;  %v10788_v37 = vld [vmem:[%s11162_s11 + $0x88] sm:$0xff] }
 0x586   : > { %v8985_v12 = vmax.f32 %v8921_v30, 0.0  ;;  %v8923_v35 = vadd.f32 %v10778_v4, %v8774_v13  ;;  %v10789_v13 = vld [vmem:[%s11162_s11 + $0x90] sm:$0xff] }
 0x587   : > { %9048 = vst [vmem:[%s13601_s16 + $0x20] sm:$0xff] %v8984_v14  ;;  %v8986_v55 = vmax.f32 %v8922_v47, 0.0  ;;  %v10790_v47 = vld [vmem:[%s11162_s11 + $0x98] sm:$0xff] }
 0x588   : > { %9049 = vst [vmem:[%s13601_s16 + $0x28] sm:$0xff] %v8985_v12  ;;  %v8987_v63 = vmax.f32 %v8923_v35, 0.0 }
 0x589   : > { %9050 = vst [vmem:[%s13601_s16 + $0x30] sm:$0xff] %v8986_v55 }
 0x58a   : > { %9051 = vst [vmem:[%s13601_s16 + $0x38] sm:$0xff] %v8987_v63 }
 0x58c   : > { %v8777_v49 = vpop.f32.mrb[108].mxu0 }
 0x58d   : > { %v8778_v58 = vadd.f32 %v8777_v49, %v13587_v17  ;;  %v8779_v29 = vpop.f32.mrb[109].mxu0 }
 0x58e   : > { %v8780_v39 = vadd.f32 %v8779_v29, %v13589_v41  ;;  %v8781_v40 = vpop.f32.mrb[110].mxu0 }
 0x58f   : > { %v8924_v48 = vadd.f32 %v10779_v7, %v8778_v58  ;;  %v8782_v26 = vadd.f32 %v8781_v40, %v13587_v17  ;;  %v8783_v28 = vpop.f32.mrb[111].mxu0 }
 0x590   : > { %v8925_v0 = vadd.f32 %v10780_v24, %v8780_v39  ;;  %v8784_v57 = vadd.f32 %v8783_v28, %v13589_v41  ;;  %v10791_v39 = vld [vmem:[%s11162_s11 + $0xa0] sm:$0xff] }
 0x591   : > { %v8988_v3 = vmax.f32 %v8924_v48, 0.0  ;;  %v8926_v9 = vadd.f32 %v10781_v54, %v8782_v26  ;;  %v10792_v26 = vld [vmem:[%s11162_s11 + $0xa8] sm:$0xff] }
 0x592   : > { %v8989_v23 = vmax.f32 %v8925_v0, 0.0  ;;  %v8927_v42 = vadd.f32 %v10782_v16, %v8784_v57  ;;  %v10793_v57 = vld [vmem:[%s11162_s11 + $0xb0] sm:$0xff] }
 0x593   : > { %9052 = vst [vmem:[%s13601_s16 + $0x40] sm:$0xff] %v8988_v3  ;;  %v8990_v6 = vmax.f32 %v8926_v9, 0.0  ;;  %v10794_v9 = vld [vmem:[%s11162_s11 + $0xb8] sm:$0xff] }
 0x594   : > { %9053 = vst [vmem:[%s13601_s16 + $0x48] sm:$0xff] %v8989_v23  ;;  %v8991_v21 = vmax.f32 %v8927_v42, 0.0 }
 0x595   : > { %9054 = vst [vmem:[%s13601_s16 + $0x50] sm:$0xff] %v8990_v6 }
 0x596   : > { %9055 = vst [vmem:[%s13601_s16 + $0x58] sm:$0xff] %v8991_v21 }
 0x59e   : > { %v8787_v43 = vpop.f32.mrb[112].mxu0 }
 0x59f   : > { %v8788_v2 = vadd.f32 %v8787_v43, %v13587_v17  ;;  %v8789_v22 = vpop.f32.mrb[113].mxu0 }
 0x5a0   : > { %v8790_v38 = vadd.f32 %v8789_v22, %v13589_v41  ;;  %v8791_v1 = vpop.f32.mrb[114].mxu0 }
 0x5a1   : > { %v8928_v15 = vadd.f32 %v10783_v45, %v8788_v2  ;;  %v8792_v44 = vadd.f32 %v8791_v1, %v13587_v17  ;;  %v8793_v8 = vpop.f32.mrb[115].mxu0 }
 0x5a2   : > { %v8929_v25 = vadd.f32 %v10784_v53, %v8790_v38  ;;  %v8794_v33 = vadd.f32 %v8793_v8, %v13589_v41  ;;  %v10795_v38 = vld [vmem:[%s11162_s11 + $0xc0] sm:$0xff] }
 0x5a3   : > { %v8992_v50 = vmax.f32 %v8928_v15, 0.0  ;;  %v8930_v20 = vadd.f32 %v10785_v61, %v8792_v44  ;;  %v10796_v44 = vld [vmem:[%s11162_s11 + $0xc8] sm:$0xff] }
 0x5a4   : > { %v8993_v46 = vmax.f32 %v8929_v25, 0.0  ;;  %v8931_v27 = vadd.f32 %v10786_v52, %v8794_v33  ;;  %v10797_v33 = vld [vmem:[%s11162_s11 + $0xd0] sm:$0xff] }
 0x5a5   : > { %9056 = vst [vmem:[%s13601_s16 + $0x60] sm:$0xff] %v8992_v50  ;;  %v8994_v18 = vmax.f32 %v8930_v20, 0.0  ;;  %v10798_v20 = vld [vmem:[%s11162_s11 + $0xd8] sm:$0xff] }
 0x5a6   : > { %9057 = vst [vmem:[%s13601_s16 + $0x68] sm:$0xff] %v8993_v46  ;;  %v8995_v10 = vmax.f32 %v8931_v27, 0.0  ;;  %v8797_v31 = vpop.f32.mrb[116].mxu0 }
 0x5a7   : > { %9058 = vst [vmem:[%s13601_s16 + $0x70] sm:$0xff] %v8994_v18  ;;  %v8798_v34 = vadd.f32 %v8797_v31, %v13587_v17  ;;  %v8799_v51 = vpop.f32.mrb[117].mxu0 }
 0x5a8   : > { %9059 = vst [vmem:[%s13601_s16 + $0x78] sm:$0xff] %v8995_v10  ;;  %v8800_v5 = vadd.f32 %v8799_v51, %v13589_v41  ;;  %v8801_v11 = vpop.f32.mrb[118].mxu0 }
 0x5a9   : > { %v8932_v36 = vadd.f32 %v10787_v60, %v8798_v34  ;;  %v8802_v62 = vadd.f32 %v8801_v11, %v13587_v17  ;;  %v8803_v19 = vpop.f32.mrb[119].mxu0 }
 0x5aa   : > { %v8933_v32 = vadd.f32 %v10788_v37, %v8800_v5  ;;  %v8804_v56 = vadd.f32 %v8803_v19, %v13589_v41  ;;  %v10799_v5 = vld [vmem:[%s11162_s11 + $0xe0] sm:$0xff] }
 0x5ab   : > { %v8996_v30 = vmax.f32 %v8932_v36, 0.0  ;;  %v8934_v14 = vadd.f32 %v10789_v13, %v8802_v62  ;;  %v10800_v62 = vld [vmem:[%s11162_s11 + $0xe8] sm:$0xff] }
 0x5ac   : > { %v8997_v59 = vmax.f32 %v8933_v32, 0.0  ;;  %v8935_v12 = vadd.f32 %v10790_v47, %v8804_v56  ;;  %v10801_v56 = vld [vmem:[%s11162_s11 + $0xf0] sm:$0xff] }
 0x5ad   : > { %9060 = vst [vmem:[%s13601_s16 + $0x80] sm:$0xff] %v8996_v30  ;;  %v8998_v4 = vmax.f32 %v8934_v14, 0.0  ;;  %v10802_v14 = vld [vmem:[%s11162_s11 + $0xf8] sm:$0xff] }
 0x5ae   : > { %9061 = vst [vmem:[%s13601_s16 + $0x88] sm:$0xff] %v8997_v59  ;;  %v8999_v35 = vmax.f32 %v8935_v12, 0.0 }
 0x5af   : > { %9062 = vst [vmem:[%s13601_s16 + $0x90] sm:$0xff] %v8998_v4 }
 0x5b0   : > { %9063 = vst [vmem:[%s13601_s16 + $0x98] sm:$0xff] %v8999_v35 }
 0x5ba   : > { %v8807_v55 = vpop.f32.mrb[120].mxu0 }
 0x5bb   : > { %v8808_v63 = vadd.f32 %v8807_v55, %v13587_v17  ;;  %v8809_v49 = vpop.f32.mrb[121].mxu0 }
 0x5bc   : > { %v8810_v58 = vadd.f32 %v8809_v49, %v13589_v41  ;;  %v8811_v29 = vpop.f32.mrb[122].mxu0 }
 0x5bd   : > { %v8936_v40 = vadd.f32 %v10791_v39, %v8808_v63  ;;  %v8812_v7 = vadd.f32 %v8811_v29, %v13587_v17  ;;  %v8813_v48 = vpop.f32.mrb[123].mxu0 }
 0x5be   : > { %v8937_v28 = vadd.f32 %v10792_v26, %v8810_v58  ;;  %v8814_v24 = vadd.f32 %v8813_v48, %v13589_v41  ;;  %v10803_v58 = vld [vmem:[%s11162_s11 + $0x100] sm:$0xff] }
 0x5bf   : > { %v9000_v0 = vmax.f32 %v8936_v40, 0.0  ;;  %v8938_v3 = vadd.f32 %v10793_v57, %v8812_v7  ;;  %v10804_v7 = vld [vmem:[%s11162_s11 + $0x108] sm:$0xff] }
 0x5c0   : > { %v9001_v54 = vmax.f32 %v8937_v28, 0.0  ;;  %v8939_v23 = vadd.f32 %v10794_v9, %v8814_v24  ;;  %v10805_v24 = vld [vmem:[%s11162_s11 + $0x110] sm:$0xff] }
 0x5c1   : > { %9064 = vst [vmem:[%s13601_s16 + $0xa0] sm:$0xff] %v9000_v0  ;;  %v9002_v16 = vmax.f32 %v8938_v3, 0.0  ;;  %v10806_v3 = vld [vmem:[%s11162_s11 + $0x118] sm:$0xff] }
 0x5c2   : > { %9065 = vst [vmem:[%s13601_s16 + $0xa8] sm:$0xff] %v9001_v54  ;;  %v9003_v42 = vmax.f32 %v8939_v23, 0.0  ;;  %v8817_v6 = vpop.f32.mrb[124].mxu0 }
 0x5c3   : > { %9066 = vst [vmem:[%s13601_s16 + $0xb0] sm:$0xff] %v9002_v16  ;;  %v8818_v21 = vadd.f32 %v8817_v6, %v13587_v17  ;;  %v8819_v43 = vpop.f32.mrb[125].mxu0 }
 0x5c4   : > { %9067 = vst [vmem:[%s13601_s16 + $0xb8] sm:$0xff] %v9003_v42  ;;  %v8820_v2 = vadd.f32 %v8819_v43, %v13589_v41  ;;  %v8821_v22 = vpop.f32.mrb[126].mxu0 }
 0x5c5   : > { %v8940_v1 = vadd.f32 %v10795_v38, %v8818_v21  ;;  %v8822_v45 = vadd.f32 %v8821_v22, %v13587_v17  ;;  %v8823_v15 = vpop.f32.mrb[127].mxu0 }
 0x5c6   : > { %v8941_v8 = vadd.f32 %v10796_v44, %v8820_v2  ;;  %v8824_v53 = vadd.f32 %v8823_v15, %v13589_v41  ;;  %v10807_v2 = vld [vmem:[%s11162_s11 + $0x120] sm:$0xff] }
 0x5c7   : > { %v9004_v25 = vmax.f32 %v8940_v1, 0.0  ;;  %v8942_v50 = vadd.f32 %v10797_v33, %v8822_v45  ;;  %v10808_v45 = vld [vmem:[%s11162_s11 + $0x128] sm:$0xff] }
 0x5c8   : > { %v9005_v61 = vmax.f32 %v8941_v8, 0.0  ;;  %v8943_v46 = vadd.f32 %v10798_v20, %v8824_v53  ;;  %v10809_v53 = vld [vmem:[%s11162_s11 + $0x130] sm:$0xff] }
 0x5c9   : > { %9068 = vst [vmem:[%s13601_s16 + $0xc0] sm:$0xff] %v9004_v25  ;;  %v9006_v52 = vmax.f32 %v8942_v50, 0.0  ;;  %v10810_v50 = vld [vmem:[%s11162_s11 + $0x138] sm:$0xff] }
 0x5ca   : > { %9069 = vst [vmem:[%s13601_s16 + $0xc8] sm:$0xff] %v9005_v61  ;;  %v9007_v27 = vmax.f32 %v8943_v46, 0.0  ;;  %v8827_v18 = vpop.f32.mrb[128].mxu0 }
 0x5cb   : > { %9070 = vst [vmem:[%s13601_s16 + $0xd0] sm:$0xff] %v9006_v52  ;;  %v8828_v10 = vadd.f32 %v8827_v18, %v13587_v17  ;;  %v8829_v31 = vpop.f32.mrb[129].mxu0 }
 0x5cc   : > { %9071 = vst [vmem:[%s13601_s16 + $0xd8] sm:$0xff] %v9007_v27  ;;  %v8830_v34 = vadd.f32 %v8829_v31, %v13589_v41  ;;  %v8831_v51 = vpop.f32.mrb[130].mxu0 }
 0x5cd   : > { %v8944_v11 = vadd.f32 %v10799_v5, %v8828_v10  ;;  %v8832_v60 = vadd.f32 %v8831_v51, %v13587_v17  ;;  %v8833_v36 = vpop.f32.mrb[131].mxu0 }
 0x5ce   : > { %v8945_v19 = vadd.f32 %v10800_v62, %v8830_v34  ;;  %v8834_v37 = vadd.f32 %v8833_v36, %v13589_v41  ;;  %v10811_v34 = vld [vmem:[%s11162_s11 + $0x140] sm:$0xff] }
 0x5cf   : > { %v9008_v32 = vmax.f32 %v8944_v11, 0.0  ;;  %v8946_v30 = vadd.f32 %v10801_v56, %v8832_v60  ;;  %v10812_v60 = vld [vmem:[%s11162_s11 + $0x148] sm:$0xff] }
 0x5d0   : > { %v9009_v13 = vmax.f32 %v8945_v19, 0.0  ;;  %v8947_v59 = vadd.f32 %v10802_v14, %v8834_v37  ;;  %v10813_v37 = vld [vmem:[%s11162_s11 + $0x150] sm:$0xff] }
 0x5d1   : > { %9072 = vst [vmem:[%s13601_s16 + $0xe0] sm:$0xff] %v9008_v32  ;;  %v9010_v47 = vmax.f32 %v8946_v30, 0.0  ;;  %v10814_v30 = vld [vmem:[%s11162_s11 + $0x158] sm:$0xff] }
 0x5d2   : > { %9073 = vst [vmem:[%s13601_s16 + $0xe8] sm:$0xff] %v9009_v13  ;;  %v9011_v12 = vmax.f32 %v8947_v59, 0.0  ;;  %v8837_v4 = vpop.f32.mrb[132].mxu0 }
 0x5d3   : > { %9074 = vst [vmem:[%s13601_s16 + $0xf0] sm:$0xff] %v9010_v47  ;;  %v8838_v35 = vadd.f32 %v8837_v4, %v13587_v17  ;;  %v8839_v55 = vpop.f32.mrb[133].mxu0 }
 0x5d4   : > { %9075 = vst [vmem:[%s13601_s16 + $0xf8] sm:$0xff] %v9011_v12  ;;  %v8840_v63 = vadd.f32 %v8839_v55, %v13589_v41  ;;  %v8841_v49 = vpop.f32.mrb[134].mxu0 }
 0x5d5   : > { %v8948_v29 = vadd.f32 %v10803_v58, %v8838_v35  ;;  %v8842_v39 = vadd.f32 %v8841_v49, %v13587_v17  ;;  %v8843_v40 = vpop.f32.mrb[135].mxu0 }
 0x5d6   : > { %v8949_v48 = vadd.f32 %v10804_v7, %v8840_v63  ;;  %v8844_v26 = vadd.f32 %v8843_v40, %v13589_v41  ;;  %v10815_v63 = vld [vmem:[%s11162_s11 + $0x160] sm:$0xff] }
 0x5d7   : > { %v9012_v28 = vmax.f32 %v8948_v29, 0.0  ;;  %v8950_v0 = vadd.f32 %v10805_v24, %v8842_v39  ;;  %v10816_v39 = vld [vmem:[%s11162_s11 + $0x168] sm:$0xff] }
 0x5d8   : > { %v9013_v57 = vmax.f32 %v8949_v48, 0.0  ;;  %v8951_v54 = vadd.f32 %v10806_v3, %v8844_v26  ;;  %v10817_v26 = vld [vmem:[%s11162_s11 + $0x170] sm:$0xff] }
 0x5d9   : > { %9076 = vst [vmem:[%s13601_s16 + $0x100] sm:$0xff] %v9012_v28  ;;  %v9014_v9 = vmax.f32 %v8950_v0, 0.0  ;;  %v10818_v0 = vld [vmem:[%s11162_s11 + $0x178] sm:$0xff] }
 0x5da   : > { %9077 = vst [vmem:[%s13601_s16 + $0x108] sm:$0xff] %v9013_v57  ;;  %v9015_v23 = vmax.f32 %v8951_v54, 0.0  ;;  %v8847_v16 = vpop.f32.mrb[136].mxu0 }
 0x5db   : > { %9078 = vst [vmem:[%s13601_s16 + $0x110] sm:$0xff] %v9014_v9  ;;  %v8848_v42 = vadd.f32 %v8847_v16, %v13587_v17  ;;  %v8849_v6 = vpop.f32.mrb[137].mxu0 }
 0x5dc   : > { %9079 = vst [vmem:[%s13601_s16 + $0x118] sm:$0xff] %v9015_v23  ;;  %v8850_v21 = vadd.f32 %v8849_v6, %v13589_v41  ;;  %v8851_v43 = vpop.f32.mrb[138].mxu0 }
 0x5dd   : > { %v8952_v22 = vadd.f32 %v10807_v2, %v8848_v42  ;;  %v8852_v38 = vadd.f32 %v8851_v43, %v13587_v17  ;;  %v8853_v1 = vpop.f32.mrb[139].mxu0 }
 0x5de   : > { %v8953_v15 = vadd.f32 %v10808_v45, %v8850_v21  ;;  %v8854_v44 = vadd.f32 %v8853_v1, %v13589_v41  ;;  %v10819_v21 = vld [vmem:[%s11162_s11 + $0x180] sm:$0xff] }
 0x5df   : > { %v9016_v8 = vmax.f32 %v8952_v22, 0.0  ;;  %v8954_v25 = vadd.f32 %v10809_v53, %v8852_v38  ;;  %v10820_v38 = vld [vmem:[%s11162_s11 + $0x188] sm:$0xff] }
 0x5e0   : > { %v9017_v33 = vmax.f32 %v8953_v15, 0.0  ;;  %v8955_v61 = vadd.f32 %v10810_v50, %v8854_v44  ;;  %v10821_v44 = vld [vmem:[%s11162_s11 + $0x190] sm:$0xff] }
 0x5e1   : > { %9080 = vst [vmem:[%s13601_s16 + $0x120] sm:$0xff] %v9016_v8  ;;  %v9018_v20 = vmax.f32 %v8954_v25, 0.0  ;;  %v10822_v25 = vld [vmem:[%s11162_s11 + $0x198] sm:$0xff] }
 0x5e2   : > { %9081 = vst [vmem:[%s13601_s16 + $0x128] sm:$0xff] %v9017_v33  ;;  %v9019_v46 = vmax.f32 %v8955_v61, 0.0  ;;  %v8857_v52 = vpop.f32.mrb[140].mxu0 }
 0x5e3   : > { %9082 = vst [vmem:[%s13601_s16 + $0x130] sm:$0xff] %v9018_v20  ;;  %v8858_v27 = vadd.f32 %v8857_v52, %v13587_v17  ;;  %v8859_v18 = vpop.f32.mrb[141].mxu0 }
 0x5e4   : > { %9083 = vst [vmem:[%s13601_s16 + $0x138] sm:$0xff] %v9019_v46  ;;  %v8860_v10 = vadd.f32 %v8859_v18, %v13589_v41  ;;  %v8861_v31 = vpop.f32.mrb[142].mxu0 }
 0x5e5   : > { %v8956_v51 = vadd.f32 %v10811_v34, %v8858_v27  ;;  %v8862_v5 = vadd.f32 %v8861_v31, %v13587_v17  ;;  %v8863_v11 = vpop.f32.mrb[143].mxu0 }
 0x5e6   : > { %v8957_v36 = vadd.f32 %v10812_v60, %v8860_v10  ;;  %v8864_v62 = vadd.f32 %v8863_v11, %v13589_v41  ;;  %v10823_v10 = vld [vmem:[%s11162_s11 + $0x1a0] sm:$0xff] }
 0x5e7   : > { %v9020_v19 = vmax.f32 %v8956_v51, 0.0  ;;  %v8958_v32 = vadd.f32 %v10813_v37, %v8862_v5  ;;  %v10824_v5 = vld [vmem:[%s11162_s11 + $0x1a8] sm:$0xff] }
 0x5e8   : > { %v9021_v56 = vmax.f32 %v8957_v36, 0.0  ;;  %v8959_v13 = vadd.f32 %v10814_v30, %v8864_v62  ;;  %v10825_v62 = vld [vmem:[%s11162_s11 + $0x1b0] sm:$0xff] }
 0x5e9   : > { %9084 = vst [vmem:[%s13601_s16 + $0x140] sm:$0xff] %v9020_v19  ;;  %v9022_v14 = vmax.f32 %v8958_v32, 0.0  ;;  %v10826_v32 = vld [vmem:[%s11162_s11 + $0x1b8] sm:$0xff] }
 0x5ea   : > { %9085 = vst [vmem:[%s13601_s16 + $0x148] sm:$0xff] %v9021_v56  ;;  %v9023_v59 = vmax.f32 %v8959_v13, 0.0  ;;  %v8867_v47 = vpop.f32.mrb[144].mxu0 }
 0x5eb   : > { %9086 = vst [vmem:[%s13601_s16 + $0x150] sm:$0xff] %v9022_v14  ;;  %v8868_v12 = vadd.f32 %v8867_v47, %v13587_v17  ;;  %v8869_v4 = vpop.f32.mrb[145].mxu0 }
 0x5ec   : > { %9087 = vst [vmem:[%s13601_s16 + $0x158] sm:$0xff] %v9023_v59  ;;  %v8870_v35 = vadd.f32 %v8869_v4, %v13589_v41  ;;  %v8871_v55 = vpop.f32.mrb[146].mxu0 }
 0x5ed   : > { %v8960_v49 = vadd.f32 %v10815_v63, %v8868_v12  ;;  %v8872_v58 = vadd.f32 %v8871_v55, %v13587_v17  ;;  %v8873_v29 = vpop.f32.mrb[147].mxu0 }
 0x5ee   : > { %v8961_v40 = vadd.f32 %v10816_v39, %v8870_v35  ;;  %v8874_v7 = vadd.f32 %v8873_v29, %v13589_v41  ;;  %v10827_v35 = vld [vmem:[%s11162_s11 + $0x1c0] sm:$0xff] }
 0x5ef   : > { %v9024_v48 = vmax.f32 %v8960_v49, 0.0  ;;  %v8962_v28 = vadd.f32 %v10817_v26, %v8872_v58  ;;  %v10828_v58 = vld [vmem:[%s11162_s11 + $0x1c8] sm:$0xff] }
 0x5f0   : > { %v9025_v24 = vmax.f32 %v8961_v40, 0.0  ;;  %v8963_v57 = vadd.f32 %v10818_v0, %v8874_v7  ;;  %v10829_v7 = vld [vmem:[%s11162_s11 + $0x1d0] sm:$0xff] }
 0x5f1   : > { %9088 = vst [vmem:[%s13601_s16 + $0x160] sm:$0xff] %v9024_v48  ;;  %v9026_v3 = vmax.f32 %v8962_v28, 0.0  ;;  %v10830_v28 = vld [vmem:[%s11162_s11 + $0x1d8] sm:$0xff] }
 0x5f2   : > { %9089 = vst [vmem:[%s13601_s16 + $0x168] sm:$0xff] %v9025_v24  ;;  %v9027_v54 = vmax.f32 %v8963_v57, 0.0  ;;  %v8877_v9 = vpop.f32.mrb[148].mxu0 }
 0x5f3   : > { %9090 = vst [vmem:[%s13601_s16 + $0x170] sm:$0xff] %v9026_v3  ;;  %v8878_v23 = vadd.f32 %v8877_v9, %v13587_v17  ;;  %v8879_v16 = vpop.f32.mrb[149].mxu0 }
 0x5f4   : > { %9091 = vst [vmem:[%s13601_s16 + $0x178] sm:$0xff] %v9027_v54  ;;  %v8880_v42 = vadd.f32 %v8879_v16, %v13589_v41  ;;  %v8881_v6 = vpop.f32.mrb[150].mxu0 }
 0x5f5   : > { %v8964_v43 = vadd.f32 %v10819_v21, %v8878_v23  ;;  %v8882_v2 = vadd.f32 %v8881_v6, %v13587_v17  ;;  %v8883_v22 = vpop.f32.mrb[151].mxu0 }
 0x5f6   : > { %v8965_v1 = vadd.f32 %v10820_v38, %v8880_v42  ;;  %v8884_v45 = vadd.f32 %v8883_v22, %v13589_v41  ;;  %v10831_v42 = vld [vmem:[%s11162_s11 + $0x1e0] sm:$0xff] }
 0x5f7   : > { %v9028_v15 = vmax.f32 %v8964_v43, 0.0  ;;  %v8966_v8 = vadd.f32 %v10821_v44, %v8882_v2  ;;  %v10832_v2 = vld [vmem:[%s11162_s11 + $0x1e8] sm:$0xff] }
 0x5f8   : > { %v9029_v53 = vmax.f32 %v8965_v1, 0.0  ;;  %v8967_v33 = vadd.f32 %v10822_v25, %v8884_v45  ;;  %v10833_v45 = vld [vmem:[%s11162_s11 + $0x1f0] sm:$0xff] }
 0x5f9   : > { %9092 = vst [vmem:[%s13601_s16 + $0x180] sm:$0xff] %v9028_v15  ;;  %v9030_v50 = vmax.f32 %v8966_v8, 0.0  ;;  %v10834_v8 = vld [vmem:[%s11162_s11 + $0x1f8] sm:$0xff]  ;;  %s10974_s11 = smov [#allocation8]  }
 0x5fa   : > { %9093 = vst [vmem:[%s13601_s16 + $0x188] sm:$0xff] %v9029_v53  ;;  %v9031_v61 = vmax.f32 %v8967_v33, 0.0  ;;  %v8887_v20 = vpop.f32.mrb[152].mxu0  ;;  %s10897_s21 = sshll.u32 %s10974_s11, 4  ;;  %s10898_s21 = int_to_ptr.vmem [resolvable:$false] %s10897_s21 }
 0x5fb   : > { %9094 = vst [vmem:[%s13601_s16 + $0x190] sm:$0xff] %v9030_v50  ;;  %v8888_v46 = vadd.f32 %v8887_v20, %v13587_v17  ;;  %v8889_v52 = vpop.f32.mrb[153].mxu0  ;;  %s10899_s10 = scalar_lea.vmem %s10898_s21, 16384  ;;  %p10900_p10 = scmp.lt.s32.totalorder %s13791_s14, %s10898_s21 }
 0x5fc   : > { %9095 = vst [vmem:[%s13601_s16 + $0x198] sm:$0xff] %v9031_v61  ;;  %v8890_v27 = vadd.f32 %v8889_v52, %v13589_v41  ;;  %v8891_v18 = vpop.f32.mrb[154].mxu0  ;;  %p10901_p13 = scmp.lt.s32.totalorder %s10899_s10, %s10893_s30 }
 0x5fd   : > { %v8968_v31 = vadd.f32 %v10823_v10, %v8888_v46  ;;  %v8892_v34 = vadd.f32 %v8891_v18, %v13587_v17  ;;  %v8893_v51 = vpop.f32.mrb[155].mxu0 }
 0x5fe   : > { %v8969_v11 = vadd.f32 %v10824_v5, %v8890_v27  ;;  %v8894_v60 = vadd.f32 %v8893_v51, %v13589_v41  ;;  %p10902_p3 = por %p10901_p13, %p10900_p10 }
 0x5ff   : > { %v9032_v36 = vmax.f32 %v8968_v31, 0.0  ;;  %v8970_v19 = vadd.f32 %v10825_v62, %v8892_v34 }
 0x600   : > { %v9033_v37 = vmax.f32 %v8969_v11, 0.0  ;;  %v8971_v56 = vadd.f32 %v10826_v32, %v8894_v60  ;;  %p10903_p7 = pnand %p10902_p3, %p10896_p8 }
 0x601   : > { %9096 = vst [vmem:[%s13601_s16 + $0x1a0] sm:$0xff] %v9032_v36  ;;  %v9034_v30 = vmax.f32 %v8970_v19, 0.0 }
 0x602   : > { %9097 = vst [vmem:[%s13601_s16 + $0x1a8] sm:$0xff] %v9033_v37  ;;  %v9035_v13 = vmax.f32 %v8971_v56, 0.0  ;;  %v8897_v14 = vpop.f32.mrb[156].mxu0 }
 0x603   : > { %9098 = vst [vmem:[%s13601_s16 + $0x1b0] sm:$0xff] %v9034_v30  ;;  %v8898_v59 = vadd.f32 %v8897_v14, %v13587_v17  ;;  %v8899_v47 = vpop.f32.mrb[157].mxu0 }
 0x604   : > { %9099 = vst [vmem:[%s13601_s16 + $0x1b8] sm:$0xff] %v9035_v13  ;;  %v8900_v12 = vadd.f32 %v8899_v47, %v13589_v41  ;;  %v8901_v4 = vpop.f32.mrb[158].mxu0 }
 0x605   : > { %v8972_v55 = vadd.f32 %v10827_v35, %v8898_v59  ;;  %v8902_v63 = vadd.f32 %v8901_v4, %v13587_v17  ;;  %v8903_v49 = vpop.f32.mrb[159].mxu0 }
 0x606   : > { %v8973_v29 = vadd.f32 %v10828_v58, %v8900_v12  ;;  %v8904_v39 = vadd.f32 %v8903_v49, %v13589_v41 }
 0x607   : > { %v9036_v40 = vmax.f32 %v8972_v55, 0.0  ;;  %v8974_v48 = vadd.f32 %v10829_v7, %v8902_v63 }
 0x608   : > { %v9037_v26 = vmax.f32 %v8973_v29, 0.0  ;;  %v8975_v24 = vadd.f32 %v10830_v28, %v8904_v39 }
 0x609   : > { %9100 = vst [vmem:[%s13601_s16 + $0x1c0] sm:$0xff] %v9036_v40  ;;  %v9038_v0 = vmax.f32 %v8974_v48, 0.0 }
 0x60a   : > { %9101 = vst [vmem:[%s13601_s16 + $0x1c8] sm:$0xff] %v9037_v26  ;;  %v9039_v57 = vmax.f32 %v8975_v24, 0.0  ;;  %v8907_v3 = vpop.f32.mrb[160].mxu0 }
 0x60b   : > { %9102 = vst [vmem:[%s13601_s16 + $0x1d0] sm:$0xff] %v9038_v0  ;;  %v8908_v54 = vadd.f32 %v8907_v3, %v13587_v17  ;;  %v8909_v9 = vpop.f32.mrb[161].mxu0 }
 0x60c   : > { %9103 = vst [vmem:[%s13601_s16 + $0x1d8] sm:$0xff] %v9039_v57  ;;  %v8910_v23 = vadd.f32 %v8909_v9, %v13589_v41  ;;  %v8911_v16 = vpop.f32.mrb[162].mxu0 }
 0x60d   : > { %v8976_v6 = vadd.f32 %v10831_v42, %v8908_v54  ;;  %v8912_v21 = vadd.f32 %v8911_v16, %v13587_v17  ;;  %v8913_v43 = vpop.f32.mrb[163].mxu0 }
 0x60e   : > { %v8977_v22 = vadd.f32 %v10832_v2, %v8910_v23  ;;  %v8914_v38 = vadd.f32 %v8913_v43, %v13589_v41 }
 0x60f   : > { %v9040_v1 = vmax.f32 %v8976_v6, 0.0  ;;  %v8978_v15 = vadd.f32 %v10833_v45, %v8912_v21 }
 0x610   : > { %v9041_v44 = vmax.f32 %v8977_v22, 0.0  ;;  %v8979_v53 = vadd.f32 %v10834_v8, %v8914_v38 }
 0x611   : > { %9104 = vst [vmem:[%s13601_s16 + $0x1e0] sm:$0xff] %v9040_v1  ;;  %v9042_v17 = vmax.f32 %v8978_v15, 0.0 }
 0x612   : > { %9105 = vst [vmem:[%s13601_s16 + $0x1e8] sm:$0xff] %v9041_v44  ;;  %v9043_v41 = vmax.f32 %v8979_v53, 0.0 }
 0x613   : > { %9106 = vst [vmem:[%s13601_s16 + $0x1f0] sm:$0xff] %v9042_v17 }
 0x614   : > { %9107 = vst [vmem:[%s13601_s16 + $0x1f8] sm:$0xff] %v9043_v41 }
 0x615   : > { %10906 = shalt.err (!%p10903_p7)
}
 0x616   : > { %s10907_s22 = scalar_lea.hbm %s13789_s17, 8192  ;;  %s10911_s16 = scalar_lea.hbm %s13845_s7, 16384 }
 0x617   : > { %p10908_p9 = scmp.ne.s32.totalorder %s13789_s17, %s10907_s22  ;;  %p10912_p5 = scmp.lt.u32.totalorder %s13789_s17, %s13845_s7 }
 0x618   : > { %p10913_p11 = scmp.lt.u32.totalorder %s10911_s16, %s10907_s22  ;;  %p10915_p4 = scmp.lt.u32.totalorder %s10907_s22, %s13789_s17 }
 0x619   : > { %p10909_p2 = pnand %p10908_p9, %p11108_p12 }
 0x61a   : > { %p10914_p1 = por %p10913_p11, %p10912_p5 }
 0x61b   : > { %p10910_p0 = pneg %p10909_p2 }
 0x61c   : > { %p10916_p6 = por %p10915_p4, %p10914_p1 }
 0x61e   : > { %p10917_p8 = pnand %p10916_p6, %p10910_p0 }
 0x620   : > { %10920 = shalt.err (!%p10917_p8)
}
 0x621   : > { %s10975_s29 = smov 256   ;;  %s10976_s30 = smov 16  }
 0x622   : > { %10567 = dma.vmem_to_hbm [thread:$0]  (%p11108_p12), %s13791_s14, 8192, %s13789_s17, %s9109_s28, %s10975_s29, %s10975_s29, %s10976_s30  }
 0x623 PF: > { %s9137_s11 = sand.u32 1, %s10951_s24   ;;  %p14003_p10 = scmp.ne.s32.totalorder %s13863_s8, 0 }
 0x624   : > { %p14004_p13 = scmp.ge.s32.totalorder %s10963_s27, 2  ;;  %s9138_s21 = scalar_lea.sflag [#allocation5], %s9137_s11 }
 0x626   : > { %p10578_p3 = pnand %p14004_p13, %p14003_p10 }
 0x628   : > { %10946 = dma.done.wait (!%p10578_p3), %s9138_s21, 8192  }
 0x629   : > { %10948 = vsyncadd (!%p10578_p3), %s9138_s21, 4294959104  ;;  %p21_p7 = scmp.ge.s32.totalorder %s11073_s13, 4   ;;  %s14005_s24 = smov %s10955_s25 }
 0x62a   : > { %s14006_s25 = smov %s10959_s26  ;;  %s14007_s26 = smov %s11104_s18 }
 0x62b   : > { %s14008_s27 = smov %s11073_s13  ;;  %23 = sbr.rel (!%p21_p7) target bundleno = 6 (0x6), region = 105 }
 0x632   :  { %9143 = vsyncpa [#allocation4], 1 }
 0x633   :  { %9145 = vsyncpa [#allocation4 + $0x1], 1 }
 0x634   :  { %9146 = vsyncpa [#allocation7], 1 }
 0x635   :  { %9147 = vsyncpa [#allocation5], 1 }
 0x636   :  { %9149 = vsyncpa [#allocation5 + $0x1], 1 }

</bundles_post_ra>
